<compile_context>
chip_gen: v5e
topology: v5e:2x2
jax: 0.10.0
libtpu: 0.0.40
codegen_flags: <defaults>
</compile_context>

<pallas_src>
import jax
import jax.numpy as jnp
from jax.experimental import pallas as pl
from jax.experimental.pallas import tpu as pltpu

L = 171      # sequence length (second Linear has in_features=171)
H = 2560     # ESM2-3b hidden size
OUT = 3


def _pred_head_kernel(x_ref, w1_ref, b1_ref, w2t_ref, b2_ref, o_ref):
    # x_ref  : (Bt, L, H)  input dtype (f32 or bf16)
    # w1_ref : (1, H)      f32, VMEM (row layout; avoids (H,1) lane padding)
    # b1_ref : (1,)        f32, SMEM scalar
    # w2t_ref: (L, OUT)    f32, VMEM
    # b2_ref : (1, OUT)    f32, VMEM
    # o_ref  : (Bt, OUT)   f32
    x = x_ref[...].astype(jnp.float32)            # (Bt, L, H), f32 accumulate
    w1 = w1_ref[...]                              # (1, H) already f32

    # Linear(H -> 1): VPU multiply + lane-axis reduce (hidden under the x DMA).
    h = jnp.sum(x * w1[None, :, :], axis=-1)      # (Bt, L)
    h = jnp.maximum(h + b1_ref[0], 0.0)           # bias + ReLU on the VPU (f32)

    # 'b l h -> b (l h)' is a no-op (h == 1); Linear(L -> OUT) as a dense 2-D
    # matmul giving a sublane-dense (Bt, OUT) store.
    out = jnp.dot(h, w2t_ref[...], preferred_element_type=jnp.float32)
    o_ref[...] = out + b2_ref[...]


def pred_head_esm2_3b(x, w1, b1, w2, b2, *, block_b=4):
    """Forward pass of PredHeadESM2_3b.

    x : (B, L, H) float32 or bfloat16 (bf16 halves HBM traffic).
    w1: (1, H), b1: (1,), w2: (OUT, L), b2: (OUT,)  -- PyTorch Linear layout.
    Returns (B, OUT) float32.
    """
    B = x.shape[0]
    assert x.shape[1:] == (L, H), x.shape

    # Batch tile: bigger tiles amortize per-step pipeline overhead on this
    # memory-bound head.  Clamp to B; a ragged final block is handled by
    # Pallas' boundary masking (no host-side padding copy of x).
    block_b = max(1, min(int(block_b), B))
    num_blocks = pl.cdiv(B, block_b)

    w1_row = jnp.asarray(w1, jnp.float32).reshape(1, H)       # (1, H)
    b1_s = jnp.asarray(b1, jnp.float32).reshape(1)            # (1,)  -> SMEM
    w2_t = jnp.asarray(w2, jnp.float32).T.reshape(L, OUT)     # (L, OUT)
    b2_row = jnp.asarray(b2, jnp.float32).reshape(1, OUT)     # (1, OUT)

    out = pl.pallas_call(
        _pred_head_kernel,
        out_shape=jax.ShapeDtypeStruct((B, OUT), jnp.float32),
        grid_spec=pltpu.PrefetchScalarGridSpec(
            num_scalar_prefetch=0,
            grid=(num_blocks,),
            in_specs=[
                pl.BlockSpec((block_b, L, H), lambda i: (i, 0, 0)),
                pl.BlockSpec((1, H), lambda i: (0, 0)),
                pl.BlockSpec(memory_space=pltpu.MemorySpace.SMEM),   # b1 scalar
                pl.BlockSpec((L, OUT), lambda i: (0, 0)),
                pl.BlockSpec((1, OUT), lambda i: (0, 0)),
            ],
            out_specs=pl.BlockSpec((block_b, OUT), lambda i: (i, 0)),
        ),
        compiler_params=pltpu.CompilerParams(
            dimension_semantics=("parallel",),
            vmem_limit_bytes=48 * 1024 * 1024,
        ),
    )(x, w1_row, b1_s, w2_t, b2_row)

    return out


def _reference(x, w1, b1, w2, b2):
    hp = jax.lax.Precision.HIGHEST
    h = jnp.einsum("blh,oh->blo", x, w1, precision=hp) + b1   # (B, L, 1)
    h = jnp.maximum(h, 0.0)
    h = h.reshape(x.shape[0], L)                              # (B, L)
    return jnp.matmul(h, w2.T, precision=hp) + b2             # (B, OUT)


if __name__ == "__main__":
    key = jax.random.PRNGKey(0)
    kx, kx2, k1w, k1b, k2w, k2b = jax.random.split(key, 6)

    B = 2
    x = jax.random.normal(kx, (B, L, H), dtype=jnp.float32)

    # nn.Linear-style uniform(-1/sqrt(fan_in), 1/sqrt(fan_in)) init.
    lim1 = 1.0 / jnp.sqrt(jnp.float32(H))
    w1 = jax.random.uniform(k1w, (1, H), minval=-lim1, maxval=lim1, dtype=jnp.float32)
    b1 = jax.random.uniform(k1b, (1,), minval=-lim1, maxval=lim1, dtype=jnp.float32)

    lim2 = 1.0 / jnp.sqrt(jnp.float32(L))
    w2 = jax.random.uniform(k2w, (OUT, L), minval=-lim2, maxval=lim2, dtype=jnp.float32)
    b2 = jax.random.uniform(k2b, (OUT,), minval=-lim2, maxval=lim2, dtype=jnp.float32)

    # 1) f32, small batch (single grid step).
    out = jax.block_until_ready(pred_head_esm2_3b(x, w1, b1, w2, b2))
    ref = _reference(x, w1, b1, w2, b2)
    assert out.shape == (B, OUT)
    assert jnp.allclose(out, ref, atol=1e-4, rtol=1e-4), (out, ref)

    # 2) Ragged batch (B=5, Bt=4): exercises the multi-step batch-tiled grid
    #    and the partial (masked) final block -- no host-side padding copy.
    B2 = 5
    x2 = jax.random.normal(kx2, (B2, L, H), dtype=jnp.float32)
    out2 = jax.block_until_ready(pred_head_esm2_3b(x2, w1, b1, w2, b2, block_b=4))
    ref2 = _reference(x2, w1, b1, w2, b2)
    assert out2.shape == (B2, OUT)
    assert jnp.allclose(out2, ref2, atol=1e-4, rtol=1e-4), (out2, ref2)

    # 3) bf16 activations (half the HBM bytes); in-kernel accumulation is f32.
    x_bf16 = x.astype(jnp.bfloat16)
    out3 = jax.block_until_ready(pred_head_esm2_3b(x_bf16, w1, b1, w2, b2))
    ref3 = _reference(x_bf16.astype(jnp.float32), w1, b1, w2, b2)
    assert jnp.allclose(out3, ref3, atol=1e-3, rtol=1e-3), (out3, ref3)

    print("KERNEL_OK")
</pallas_src>

<mosaic_0001>
module attributes {stable_mosaic.version = 11 : i64} {
  func.func @_pred_head_kernel(%arg0: i32, %arg1: memref<2x171x2560xf32, #tpu.memory_space<vmem>>, %arg2: memref<1x2560xf32, #tpu.memory_space<vmem>>, %arg3: memref<1xf32, #tpu.memory_space<smem>>, %arg4: memref<171x3xf32, #tpu.memory_space<vmem>>, %arg5: memref<1x3xf32, #tpu.memory_space<vmem>>, %arg6: memref<2x3xf32, #tpu.memory_space<vmem>>) attributes {dimension_semantics = [#tpu.dimension_semantics<parallel>], iteration_bounds = array<i64: 1>, scalar_prefetch = 0 : i64, scratch_operands = 0 : i64, tpu.core_type = #tpu.core_type<tc>, window_params = [{transform_indices = @transform_0, window_bounds = array<i64: 2, 171, 2560>}, {pipeline_mode = #tpu.pipeline_mode<synchronous>, transform_indices = @transform_1, window_bounds = array<i64: 1, 2560>}, {transform_indices = @transform_2, window_bounds = array<i64: 1>}, {pipeline_mode = #tpu.pipeline_mode<synchronous>, transform_indices = @transform_3, window_bounds = array<i64: 171, 3>}, {pipeline_mode = #tpu.pipeline_mode<synchronous>, transform_indices = @transform_4, window_bounds = array<i64: 1, 3>}, {transform_indices = @transform_5, window_bounds = array<i64: 2, 3>}]} {
    %c0 = arith.constant 0 : index
    %c0_0 = arith.constant 0 : index
    %c0_1 = arith.constant 0 : index
    %0 = vector.load %arg1[%c0, %c0_0, %c0_1] : memref<2x171x2560xf32, #tpu.memory_space<vmem>>, vector<2x171x2560xf32>
    %c0_2 = arith.constant 0 : index
    %c0_3 = arith.constant 0 : index
    %1 = vector.load %arg2[%c0_2, %c0_3] : memref<1x2560xf32, #tpu.memory_space<vmem>>, vector<1x2560xf32>
    %2 = vector.shape_cast %1 : vector<1x2560xf32> to vector<1x1x2560xf32>
    %3 = vector.broadcast %2 : vector<1x1x2560xf32> to vector<2x171x2560xf32>
    %4 = arith.mulf %0, %3 : vector<2x171x2560xf32>
    %cst = arith.constant dense<0.000000e+00> : vector<2x171xf32>
    %5 = vector.multi_reduction <add>, %4, %cst [2] : vector<2x171x2560xf32> to vector<2x171xf32>
    %c0_4 = arith.constant 0 : index
    %6 = memref.load %arg3[%c0_4] : memref<1xf32, #tpu.memory_space<smem>>
    %7 = vector.broadcast %6 : f32 to vector<2x171xf32>
    %8 = arith.addf %5, %7 : vector<2x171xf32>
    %cst_5 = arith.constant 0.000000e+00 : f32
    %9 = vector.broadcast %cst_5 : f32 to vector<2x171xf32>
    %10 = arith.maximumf %8, %9 : vector<2x171xf32>
    %c0_6 = arith.constant 0 : index
    %c0_7 = arith.constant 0 : index
    %11 = vector.load %arg4[%c0_6, %c0_7] : memref<171x3xf32, #tpu.memory_space<vmem>>, vector<171x3xf32>
    %cst_8 = arith.constant dense<0.000000e+00> : vector<2x3xf32>
    %12 = tpu.matmul %10, %11, %cst_8 {dimension_numbers = #tpu.dot_dimension_numbers<[1], [0], [0], [1], [0, 0, 1, 1], [], []>} : vector<2x171xf32>, vector<171x3xf32>, vector<2x3xf32> -> vector<2x3xf32>
    %c0_9 = arith.constant 0 : index
    %c0_10 = arith.constant 0 : index
    %13 = vector.load %arg5[%c0_9, %c0_10] : memref<1x3xf32, #tpu.memory_space<vmem>>, vector<1x3xf32>
    %14 = vector.broadcast %13 : vector<1x3xf32> to vector<2x3xf32>
    %15 = arith.addf %12, %14 : vector<2x3xf32>
    %c0_11 = arith.constant 0 : index
    %c0_12 = arith.constant 0 : index
    %16 = vector.load %arg6[%c0_11, %c0_12] : memref<2x3xf32, #tpu.memory_space<vmem>>, vector<2x3xf32>
    tpu.vector_store %arg6[%c0_11, %c0_12], %15 {strides = array<i32>} : memref<2x3xf32, #tpu.memory_space<vmem>>, vector<2x3xf32>,
    return
  }
  func.func @transform_0(%arg0: i32) -> (i32, i32, i32) {
    %c0_i32 = arith.constant 0 : i32
    %c0_i32_0 = arith.constant 0 : i32
    %c0_i32_1 = arith.constant 0 : i32
    return %arg0, %c0_i32, %c0_i32_0 : i32, i32, i32
  }
  func.func @transform_1(%arg0: i32) -> (i32, i32) {
    %c0_i32 = arith.constant 0 : i32
    %c0_i32_0 = arith.constant 0 : i32
    %c0_i32_1 = arith.constant 0 : i32
    return %c0_i32, %c0_i32_0 : i32, i32
  }
  func.func @transform_2(%arg0: i32) -> i32 {
    %c0_i32 = arith.constant 0 : i32
    %c0_i32_0 = arith.constant 0 : i32
    return %c0_i32 : i32
  }
  func.func @transform_3(%arg0: i32) -> (i32, i32) {
    %c0_i32 = arith.constant 0 : i32
    %c0_i32_0 = arith.constant 0 : i32
    %c0_i32_1 = arith.constant 0 : i32
    return %c0_i32, %c0_i32_0 : i32, i32
  }
  func.func @transform_4(%arg0: i32) -> (i32, i32) {
    %c0_i32 = arith.constant 0 : i32
    %c0_i32_0 = arith.constant 0 : i32
    %c0_i32_1 = arith.constant 0 : i32
    return %c0_i32, %c0_i32_0 : i32, i32
  }
  func.func @transform_5(%arg0: i32) -> (i32, i32) {
    %c0_i32 = arith.constant 0 : i32
    %c0_i32_0 = arith.constant 0 : i32
    return %arg0, %c0_i32 : i32, i32
  }
}

</mosaic_0001>

<bundles_post_ra>
// kernel: tpu_custom_call.1
= control target key start
LH: loop header
LB: loop body
LE: loop exit
PB: predicated region body
PF: predicated region fallthrough
CT: control target
= control target key end

     0   :  { %s7736_s0 = inlined_call_operand.vmem [shape: f32[2,171,2560], index: 0, kind: input, shape index: {}]   ;;  %s7737_s1 = inlined_call_operand.vmem [shape: f32[1,2560], index: 1, kind: input, shape index: {}]   ;;  %s7738_s2 = inlined_call_operand.<no memory space> [shape: f32[1], index: 2, kind: input, shape index: {}]   ;;  %s7739_s3 = inlined_call_operand.vmem [shape: f32[171,3], index: 3, kind: input, shape index: {}]   ;;  %s7740_s4 = inlined_call_operand.vmem [shape: f32[1,3], index: 4, kind: input, shape index: {}]   ;;  %s7741_s5 = inlined_call_operand.hbm [shape: f32[2,3], index: 5, kind: output, shape index: {}]  }
   0x1   :  { %v902_v0 = vld [vmem:[%s7737_s1] sm:$0xff]  ;;  %v463_v4 = vld [vmem:[%s7736_s0 + $0xdc8] sm:$0xff]  ;;  %v464_v6 = vld [vmem:[%s7736_s0 + $0xdd0] sm:$0xff] }
   0x2   :  { %v3201_v1 = vperm.slane %v902_v0, 0  ;;  %v3203_v2 = vperm.slane %v902_v0, 1  ;;  %v462_v3 = vld [vmem:[%s7736_s0 + $0xdc0] sm:$0xff]  ;;  %v3211_v5 = vperm.slane %v902_v0, 2  ;;  %v3216_v7 = vperm.slane %v902_v0, 3  ;;  %v465_v10 = vld [vmem:[%s7736_s0 + $0xdd8] sm:$0xff] }
   0x3   :  { %v903_v11 = vld [vmem:[%s7737_s1 + $0x8] sm:$0xff]  ;;  %v3226_v12 = vperm.slane %v902_v0, 4  ;;  %v466_v14 = vld [vmem:[%s7736_s0 + $0xde0] sm:$0xff]  ;;  %v3232_v15 = vperm.slane %v902_v0, 5  ;;  %v3234_v16 = vperm.slane %v902_v0, 6  ;;  %v3245_v20 = vperm.slane %v902_v0, 7 }
   0x4   :  { %v1388_v8 = vmul.f32 %v3201_v1, %v462_v3  ;;  %v1389_v9 = vmul.f32 %v3203_v2, %v463_v4  ;;  %v1390_v13 = vmul.f32 %v3211_v5, %v464_v6  ;;  %v62_v17 = vld [vmem:[%s7736_s0 + $0x140] sm:$0xff]  ;;  %v63_v18 = vld [vmem:[%s7736_s0 + $0x148] sm:$0xff]  ;;  %v904_v19 = vld [vmem:[%s7737_s1 + $0x10] sm:$0xf]  ;;  %v3247_v21 = vperm.slane %v903_v11, 0 }
   0x5   :  { %v1391_v22 = vmul.f32 %v3216_v7, %v465_v10  ;;  %v467_v24 = vld [vmem:[%s7736_s0 + $0xde8] sm:$0xff]  ;;  %v3253_v25 = vperm.slane %v903_v11, 1  ;;  %v3255_v26 = vperm.slane %v903_v11, 2  ;;  %v3257_v27 = vperm.slane %v903_v11, 3  ;;  %v64_v29 = vld [vmem:[%s7736_s0 + $0x150] sm:$0xff]  ;;  %v469_v31 = vld [vmem:[%s7736_s0 + $0xdf8] sm:$0xff] }
   0x6   :  { %v2311_v23 = vadd.f32 %v1389_v9, %v1388_v8  ;;  %v3259_v28 = vperm.slane %v903_v11, 4  ;;  %v468_v30 = vld [vmem:[%s7736_s0 + $0xdf0] sm:$0xff]  ;;  %v470_v32 = vld [vmem:[%s7736_s0 + $0xe00] sm:$0xff]  ;;  %v1392_v33 = vmul.f32 %v3226_v12, %v466_v14  ;;  %v988_v35 = vmul.f32 %v3201_v1, %v62_v17  ;;  %v471_v37 = vld [vmem:[%s7736_s0 + $0xe08] sm:$0xff] }
   0x7   :  { %v989_v36 = vmul.f32 %v3203_v2, %v63_v18  ;;  %v3279_v38 = vperm.slane %v903_v11, 5  ;;  %v3281_v39 = vperm.slane %v903_v11, 6  ;;  %v3283_v40 = vperm.slane %v903_v11, 7  ;;  %v65_v42 = vld [vmem:[%s7736_s0 + $0x158] sm:$0xff]  ;;  %v472_v43 = vld [vmem:[%s7736_s0 + $0xe10] sm:$0xff]  ;;  %v474_v45 = vld [vmem:[%s7736_s0 + $0xe20] sm:$0xff] }
   0x8   :  { %v2312_v34 = vadd.f32 %v2311_v23, %v1390_v13  ;;  %v3285_v41 = vperm.slane %v904_v19, 0  ;;  %v473_v44 = vld [vmem:[%s7736_s0 + $0xe18] sm:$0xff]  ;;  %v3299_v46 = vperm.slane %v904_v19, 1  ;;  %v1393_v47 = vmul.f32 %v3232_v15, %v467_v24  ;;  %v475_v50 = vld [vmem:[%s7736_s0 + $0xe28] sm:$0xff]  ;;  %v476_v51 = vld [vmem:[%s7736_s0 + $0xe30] sm:$0xff] }
   0x9   :  { %v990_v49 = vmul.f32 %v3211_v5, %v64_v29  ;;  %v3309_v52 = vperm.slane %v904_v19, 2  ;;  %v3311_v53 = vperm.slane %v904_v19, 3  ;;  %v1394_v54 = vmul.f32 %v3234_v16, %v468_v30  ;;  %v66_v56 = vld [vmem:[%s7736_s0 + $0x160] sm:$0xff]  ;;  %v477_v57 = vld [vmem:[%s7736_s0 + $0xe38] sm:$0xff]  ;;  %v23_v63 = vld [vmem:[%s7736_s0 + $0x8] sm:$0xff] }
   0xa   :  { %v2313_v48 = vadd.f32 %v2312_v34, %v1391_v22  ;;  %v1395_v55 = vmul.f32 %v3245_v20, %v469_v31  ;;  %v1396_v58 = vmul.f32 %v3247_v21, %v470_v32  ;;  %v991_v60 = vmul.f32 %v3216_v7, %v65_v42  ;;  %v22_v62 = vld [vmem:[%s7736_s0] sm:$0xff]  ;;  %v479_v3 = vld [vmem:[%s7736_s0 + $0xe48] sm:$0xff]  ;;  %v480_v11 = vld [vmem:[%s7736_s0 + $0xe50] sm:$0xff] }
   0xb   :  { %v1870_v61 = vadd.f32 %v989_v36, %v988_v35  ;;  %v478_v0 = vld [vmem:[%s7736_s0 + $0xe40] sm:$0xff]  ;;  %v1397_v4 = vmul.f32 %v3253_v25, %v471_v37  ;;  %v3337_v6 = vmul.f32 %v3255_v26, %v472_v43  ;;  %v3340_v8 = vmul.f32 %v3257_v27, %v473_v44  ;;  %v67_v10 = vld [vmem:[%s7736_s0 + $0x168] sm:$0xff]  ;;  %v481_v13 = vld [vmem:[%s7736_s0 + $0xe58] sm:$0xff] }
   0xc   :  { %v2314_v59 = vadd.f32 %v2313_v48, %v1392_v33  ;;  %v3343_v9 = vmul.f32 %v3259_v28, %v474_v45  ;;  %v3355_v14 = vmul.f32 %v3279_v38, %v475_v50  ;;  %v992_v18 = vmul.f32 %v3226_v12, %v66_v56  ;;  %v24_v22 = vld [vmem:[%s7736_s0 + $0x10] sm:$0xff]  ;;  %v69_v30 = vld [vmem:[%s7736_s0 + $0x178] sm:$0xff]  ;;  %v70_v35 = vld [vmem:[%s7736_s0 + $0x180] sm:$0xff] }
   0xd   :  { %v1871_v19 = vadd.f32 %v1870_v61, %v990_v49  ;;  %v3362_v23 = vmul.f32 %v3281_v39, %v476_v51  ;;  %v3365_v24 = vmul.f32 %v3283_v40, %v477_v57  ;;  %v68_v29 = vld [vmem:[%s7736_s0 + $0x170] sm:$0xff]  ;;  %v948_v31 = vmul.f32 %v3201_v1, %v22_v62  ;;  %v71_v36 = vld [vmem:[%s7736_s0 + $0x188] sm:$0xff]  ;;  %v25_v43 = vld [vmem:[%s7736_s0 + $0x18] sm:$0xff] }
   0xe   :  { %v2315_v17 = vadd.f32 %v2314_v59, %v1393_v47  ;;  %v949_v32 = vmul.f32 %v3203_v2, %v23_v63  ;;  %v3376_v33 = vmul.f32 %v3285_v41, %v478_v0  ;;  %v993_v37 = vmul.f32 %v3232_v15, %v67_v10  ;;  %v72_v48 = vld [vmem:[%s7736_s0 + $0x190] sm:$0xff]  ;;  %v73_v49 = vld [vmem:[%s7736_s0 + $0x198] sm:$0xff]  ;;  %v75_v56 = vld [vmem:[%s7736_s0 + $0x1a8] sm:$0xff] }
   0xf   :  { %v1872_v42 = vadd.f32 %v1871_v19, %v991_v60  ;;  %v3389_v44 = vmul.f32 %v3299_v46, %v479_v3  ;;  %v3392_v45 = vmul.f32 %v3309_v52, %v480_v11  ;;  %v3395_v47 = vmul.f32 %v3311_v53, %v481_v13  ;;  %v26_v61 = vld [vmem:[%s7736_s0 + $0x20] sm:$0xff]  ;;  %v77_v62 = vld [vmem:[%s7736_s0 + $0x1b8] sm:$0xff]  ;;  %v27_v19 = vld [vmem:[%s7736_s0 + $0x28] sm:$0xff] }
  0x10   :  { %v2316_v34 = vadd.f32 %v2315_v17, %v1394_v54  ;;  %v950_v50 = vmul.f32 %v3211_v5, %v24_v22  ;;  %v74_v54 = vld [vmem:[%s7736_s0 + $0x1a0] sm:$0xff]  ;;  %v994_v57 = vmul.f32 %v3234_v16, %v68_v29  ;;  %v995_v59 = vmul.f32 %v3245_v20, %v69_v30  ;;  %v483_v29 = vld [vmem:[%s7736_s0 + $0xe68] sm:$0xff] }
  0x11   :  { %v1873_v60 = vadd.f32 %v1872_v42, %v992_v18  ;;  %v996_v63 = vmul.f32 %v3247_v21, %v70_v35  ;;  %v997_v0 = vmul.f32 %v3253_v25, %v71_v36  ;;  %v951_v3 = vmul.f32 %v3216_v7, %v25_v43  ;;  %v482_v22 = vld [vmem:[%s7736_s0 + $0xe60] sm:$0xff]  ;;  %v79_v30 = vld [vmem:[%s7736_s0 + $0x1c8] sm:$0xff] }
  0x12   :  { %v2317_v51 = vadd.f32 %v2316_v34, %v1395_v55  ;;  %v76_v55 = vld [vmem:[%s7736_s0 + $0x1b0] sm:$0xff]  ;;  %v1828_v10 = vadd.f32 %v949_v32, %v948_v31  ;;  %v998_v13 = vmul.f32 %v3255_v26, %v72_v48  ;;  %v3426_v17 = vmul.f32 %v3257_v27, %v73_v49 }
  0x13   :  { %v1874_v18 = vadd.f32 %v1873_v60, %v993_v37  ;;  %v3444_v31 = vmul.f32 %v3259_v28, %v74_v54  ;;  %v3447_v32 = vmul.f32 %v3279_v38, %v75_v56  ;;  %v952_v34 = vmul.f32 %v3226_v12, %v26_v61  ;;  %v80_v37 = vld [vmem:[%s7736_s0 + $0x1d0] sm:$0xff] }
  0x14   :  { %v2318_v11 = vadd.f32 %v2317_v51, %v1396_v58  ;;  %v78_v58 = vld [vmem:[%s7736_s0 + $0x1c0] sm:$0xff]  ;;  %v1829_v35 = vadd.f32 %v1828_v10, %v950_v50  ;;  %v3454_v42 = vmul.f32 %v3281_v39, %v76_v55  ;;  %v3457_v43 = vmul.f32 %v3283_v40, %v77_v62  ;;  %v28_v49 = vld [vmem:[%s7736_s0 + $0x30] sm:$0xff]  ;;  %v29_v51 = vld [vmem:[%s7736_s0 + $0x38] sm:$0xff] }
  0x15   :  { %v1875_v48 = vadd.f32 %v1874_v18, %v994_v57  ;;  %v484_v50 = vld [vmem:[%s7736_s0 + $0xe70] sm:$0xff]  ;;  %v953_v54 = vmul.f32 %v3232_v15, %v27_v19  ;;  %v1408_v57 = vmul.f32 %v3201_v1, %v482_v22  ;;  %v1409_v60 = vmul.f32 %v3203_v2, %v483_v29 }
  0x16   :  { %v2319_v36 = vadd.f32 %v2318_v11, %v1397_v4  ;;  %v81_v4 = vld [vmem:[%s7736_s0 + $0x1d8] sm:$0xff]  ;;  %v1830_v56 = vadd.f32 %v1829_v35, %v951_v3  ;;  %v3476_v55 = vmul.f32 %v3285_v41, %v78_v58  ;;  %v3479_v62 = vmul.f32 %v3299_v46, %v79_v30  ;;  %v30_v11 = vld [vmem:[%s7736_s0 + $0x40] sm:$0xff]  ;;  %v32_v19 = vld [vmem:[%s7736_s0 + $0x50] sm:$0xff] }
  0x17   :  { %v1876_v10 = vadd.f32 %v1875_v48, %v995_v59  ;;  %v485_v3 = vld [vmem:[%s7736_s0 + $0xe78] sm:$0xff]  ;;  %v3488_v18 = vmul.f32 %v3309_v52, %v80_v37  ;;  %v954_v59 = vmul.f32 %v3234_v16, %v28_v49  ;;  %v1410_v29 = vmul.f32 %v3211_v5, %v484_v50  ;;  %v486_v48 = vld [vmem:[%s7736_s0 + $0xe80] sm:$0xff] }
  0x18   :  { %v2320_v61 = vadd.f32 %v2319_v36, %v3337_v6  ;;  %v31_v6 = vld [vmem:[%s7736_s0 + $0x48] sm:$0xff]  ;;  %v1831_v22 = vadd.f32 %v1830_v56, %v952_v34  ;;  %v3500_v30 = vmul.f32 %v3311_v53, %v81_v4  ;;  %v33_v36 = vld [vmem:[%s7736_s0 + $0x58] sm:$0xff]  ;;  %v955_v37 = vmul.f32 %v3245_v20, %v29_v51  ;;  %v34_v34 = vld [vmem:[%s7736_s0 + $0x60] sm:$0xff] }
  0x19   :  { %7742 = vst [vmem:[#allocation6_spill] sm:$0xff] %v3488_v18  ;;  %v1877_v35 = vadd.f32 %v1876_v10, %v996_v63  ;;  %v956_v63 = vmul.f32 %v3247_v21, %v30_v11  ;;  %v1411_v50 = vmul.f32 %v3216_v7, %v485_v3  ;;  %v2332_v4 = vadd.f32 %v1409_v60, %v1408_v57  ;;  %v487_v18 = vld [vmem:[%s7736_s0 + $0xe88] sm:$0xff] }
  0x1a   :  { %v2321_v58 = vadd.f32 %v2320_v61, %v3340_v8  ;;  %7743 = vst [vmem:[#allocation7_spill] sm:$0xff] %v3500_v30  ;;  %v35_v8 = vld [vmem:[%s7736_s0 + $0x68] sm:$0xff]  ;;  %v1832_v49 = vadd.f32 %v1831_v22, %v953_v54  ;;  %v36_v61 = vld [vmem:[%s7736_s0 + $0x70] sm:$0xff]  ;;  %v957_v10 = vmul.f32 %v3253_v25, %v31_v6  ;;  %v958_v30 = vmul.f32 %v3255_v26, %v32_v19  ;;  %v37_v54 = vld [vmem:[%s7736_s0 + $0x78] sm:$0xff] }
  0x1b   :  { %v1878_v56 = vadd.f32 %v1877_v35, %v997_v0  ;;  %v959_v57 = vmul.f32 %v3257_v27, %v33_v36  ;;  %v488_v0 = vld [vmem:[%s7736_s0 + $0xe90] sm:$0xff]  ;;  %v1412_v60 = vmul.f32 %v3226_v12, %v486_v48  ;;  %v2333_v11 = vadd.f32 %v2332_v4, %v1410_v29  ;;  %v38_v29 = vld [vmem:[%s7736_s0 + $0x80] sm:$0xff]  ;;  %v489_v4 = vld [vmem:[%s7736_s0 + $0xe98] sm:$0xff] }
  0x1c   :  { %v2322_v51 = vadd.f32 %v2321_v58, %v3343_v9  ;;  %v1833_v9 = vadd.f32 %v1832_v49, %v954_v59  ;;  %v960_v19 = vmul.f32 %v3259_v28, %v34_v34  ;;  %v3537_v22 = vmul.f32 %v3279_v38, %v35_v8  ;;  %v502_v58 = vld [vmem:[%s7736_s0 + $0xf00] sm:$0xff]  ;;  %v503_v59 = vld [vmem:[%s7736_s0 + $0xf08] sm:$0xff] }
  0x1d   :  { %v1879_v6 = vadd.f32 %v1878_v56, %v998_v13  ;;  %v3552_v13 = vmul.f32 %v3281_v39, %v36_v61  ;;  %v1413_v36 = vmul.f32 %v3232_v15, %v487_v18  ;;  %v2334_v48 = vadd.f32 %v2333_v11, %v1411_v50  ;;  %v40_v18 = vld [vmem:[%s7736_s0 + $0x90] sm:$0xff] }
  0x1e   :  { %v2323_v3 = vadd.f32 %v2322_v51, %v3355_v14  ;;  %v39_v14 = vld [vmem:[%s7736_s0 + $0x88] sm:$0xff]  ;;  %v1834_v35 = vadd.f32 %v1833_v9, %v955_v37  ;;  %v3558_v49 = vmul.f32 %v3283_v40, %v37_v54  ;;  %v1414_v51 = vmul.f32 %v3234_v16, %v488_v0  ;;  %v504_v37 = vld [vmem:[%s7736_s0 + $0xf10] sm:$0xff] }
  0x1f   :  { %v1880_v8 = vadd.f32 %v1879_v6, %v3426_v17  ;;  %v490_v17 = vld [vmem:[%s7736_s0 + $0xea0] sm:$0xff]  ;;  %v2335_v50 = vadd.f32 %v2334_v48, %v1412_v60  ;;  %v1428_v56 = vmul.f32 %v3201_v1, %v502_v58  ;;  %v1429_v61 = vmul.f32 %v3203_v2, %v503_v59  ;;  %v41_v60 = vld [vmem:[%s7736_s0 + $0x98] sm:$0xff] }
  0x20   :  { %v2324_v34 = vadd.f32 %v2323_v3, %v3362_v23  ;;  %v1835_v23 = vadd.f32 %v1834_v35, %v956_v63  ;;  %v3578_v0 = vmul.f32 %v3285_v41, %v38_v29  ;;  %v3581_v11 = vmul.f32 %v3299_v46, %v39_v14  ;;  %v505_v63 = vld [vmem:[%s7736_s0 + $0xf18] sm:$0xff] }
  0x21   :  { %v1881_v9 = vadd.f32 %v1880_v8, %v3444_v31  ;;  %v1415_v31 = vmul.f32 %v3245_v20, %v489_v4  ;;  %v2336_v6 = vadd.f32 %v2335_v50, %v1413_v36  ;;  %v1430_v58 = vmul.f32 %v3211_v5, %v504_v37  ;;  %v492_v36 = vld [vmem:[%s7736_s0 + $0xeb0] sm:$0xff] }
  0x22   :  { %v2325_v54 = vadd.f32 %v2324_v34, %v3365_v24  ;;  %v1836_v3 = vadd.f32 %v1835_v23, %v957_v10  ;;  %v491_v24 = vld [vmem:[%s7736_s0 + $0xea8] sm:$0xff]  ;;  %v3597_v14 = vmul.f32 %v3309_v52, %v40_v18  ;;  %v1416_v35 = vmul.f32 %v3247_v21, %v490_v17  ;;  %v506_v10 = vld [vmem:[%s7736_s0 + $0xf20] sm:$0xff] }
  0x23   :  { %v1882_v29 = vadd.f32 %v1881_v9, %v3447_v32  ;;  %v2337_v34 = vadd.f32 %v2336_v6, %v1414_v51  ;;  %v1431_v32 = vmul.f32 %v3216_v7, %v505_v63  ;;  %v2353_v8 = vadd.f32 %v1429_v61, %v1428_v56  ;;  %v507_v23 = vld [vmem:[%s7736_s0 + $0xf28] sm:$0xff]  ;;  %v494_v51 = vld [vmem:[%s7736_s0 + $0xec0] sm:$0xff]  ;;  %v508_v63 = vld [vmem:[%s7736_s0 + $0xf30] sm:$0xff] }
  0x24   :  { %v2326_v59 = vadd.f32 %v2325_v54, %v3376_v33  ;;  %v1837_v48 = vadd.f32 %v1836_v3, %v958_v30  ;;  %v493_v33 = vld [vmem:[%s7736_s0 + $0xeb8] sm:$0xff]  ;;  %v3613_v18 = vmul.f32 %v3311_v53, %v41_v60  ;;  %v1417_v30 = vmul.f32 %v3253_v25, %v491_v24 }
  0x25   :  { %v1883_v37 = vadd.f32 %v1882_v29, %v3454_v42  ;;  %v2338_v50 = vadd.f32 %v2337_v34, %v1415_v31  ;;  %v1432_v42 = vmul.f32 %v3226_v12, %v506_v10  ;;  %v2354_v56 = vadd.f32 %v2353_v8, %v1430_v58 }
  0x26   :  { %v2327_v4 = vadd.f32 %v2326_v59, %v3389_v44  ;;  %v1838_v17 = vadd.f32 %v1837_v48, %v959_v57  ;;  %v495_v44 = vld [vmem:[%s7736_s0 + $0xec8] sm:$0xff]  ;;  %v1418_v9 = vmul.f32 %v3255_v26, %v492_v36  ;;  %v1419_v57 = vmul.f32 %v3257_v27, %v493_v33 }
  0x27   :  { %v1884_v54 = vadd.f32 %v1883_v37, %v3457_v43 }
  0x28   :  { %v2328_v61 = vadd.f32 %v2327_v4, %v3392_v45 }
  0x29   :  { %11 = vsyncpa [#allocation4], 0  ;;  %v1839_v60 = vadd.f32 %v1838_v17, %v960_v19  ;;  %v496_v3 = vld [vmem:[%s7736_s0 + $0xed0] sm:$0xff]  ;;  %v2339_v24 = vadd.f32 %v2338_v50, %v1416_v35  ;;  %v1433_v31 = vmul.f32 %v3232_v15, %v507_v23  ;;  %v2355_v45 = vadd.f32 %v2354_v56, %v1431_v32  ;;  %v42_v43 = vld [vmem:[%s7736_s0 + $0xa0] sm:$0xff]  ;;  %s3167_s8 = smov [#allocation3]   ;;  %s3128_s11 = sshll.u32 %s7741_s5, 4  ;;  %s3129_s11 = int_to_ptr.hbm [resolvable:$true] %s3128_s11 }
  0x2a   :  { %v43_v6 = vld [vmem:[%s7736_s0 + $0xa8] sm:$0xff]  ;;  %v2329_v58 = vadd.f32 %v2328_v61, %v3395_v47  ;;  %v1885_v19 = vadd.f32 %v1884_v54, %v3476_v55  ;;  %v1420_v59 = vmul.f32 %v3259_v28, %v494_v51  ;;  %v1421_v29 = vmul.f32 %v3279_v38, %v495_v44  ;;  %v509_v35 = vld [vmem:[%s7736_s0 + $0xf38] sm:$0xff]  ;;  %v498_v47 = vld [vmem:[%s7736_s0 + $0xee0] sm:$0xff] }
  0x2b   :  { %v1840_v10 = vadd.f32 %v1839_v60, %v3537_v22  ;;  %v497_v48 = vld [vmem:[%s7736_s0 + $0xed8] sm:$0xff]  ;;  %v2340_v36 = vadd.f32 %v2339_v24, %v1417_v30  ;;  %v1434_v55 = vmul.f32 %v3234_v16, %v508_v63  ;;  %v2356_v33 = vadd.f32 %v2355_v45, %v1432_v42  ;;  %v44_v34 = vld [vmem:[%s7736_s0 + $0xb0] sm:$0xff]  ;;  %v510_v8 = vld [vmem:[%s7736_s0 + $0xf40] sm:$0xff] }
  0x2c   :  { %2330 = vadd.xlane.f32.xlu1 %v2329_v58  ;;  %v1886_v32 = vadd.f32 %v1885_v19, %v3479_v62  ;;  %v1422_v22 = vmul.f32 %v3281_v39, %v496_v3  ;;  %v968_v4 = vmul.f32 %v3201_v1, %v42_v43  ;;  %v969_v37 = vmul.f32 %v3203_v2, %v43_v6  ;;  %v499_v23 = vld [vmem:[%s7736_s0 + $0xee8] sm:$0xff]  ;;  %v45_v44 = vld [vmem:[%s7736_s0 + $0xb8] sm:$0xff]  ;;  %v500_v63 = vld [vmem:[%s7736_s0 + $0xef0] sm:$0xff] }
  0x2d   :  { %v1841_v30 = vadd.f32 %v1840_v10, %v3552_v13  ;;  %v2341_v17 = vadd.f32 %v2340_v36, %v1418_v9  ;;  %v1435_v51 = vmul.f32 %v3245_v20, %v509_v35  ;;  %v2357_v62 = vadd.f32 %v2356_v33, %v1433_v31  ;;  %v7744_v50 = vld [vmem:[#allocation6_spill] sm:$0xff]  ;;  %v501_v60 = vld [vmem:[%s7736_s0 + $0xef8] sm:$0xff]  ;;  %v7745_v43 = vld [vmem:[#allocation7_spill] sm:$0xff] }
  0x2e   :  { %v1887_v42 = vadd.f32 %v1886_v32, %v7744_v50  ;;  %v1423_v56 = vmul.f32 %v3283_v40, %v497_v48  ;;  %v3679_v61 = vmul.f32 %v3285_v41, %v498_v47  ;;  %v511_v13 = vld [vmem:[%s7736_s0 + $0xf48] sm:$0xff]  ;;  %v970_v54 = vmul.f32 %v3211_v5, %v44_v34  ;;  %v46_v45 = vld [vmem:[%s7736_s0 + $0xc0] sm:$0xff]  ;;  %v512_v58 = vld [vmem:[%s7736_s0 + $0xf50] sm:$0xff] }
  0x2f   :  { %v1842_v9 = vadd.f32 %v1841_v30, %v3558_v49  ;;  %v2342_v3 = vadd.f32 %v2341_v17, %v1419_v57  ;;  %v1436_v24 = vmul.f32 %v3247_v21, %v510_v8  ;;  %v2358_v31 = vadd.f32 %v2357_v62, %v1434_v55  ;;  %v513_v48 = vld [vmem:[%s7736_s0 + $0xf58] sm:$0xff]  ;;  %v514_v47 = vld [vmem:[%s7736_s0 + $0xf60] sm:$0xff]  ;;  %v47_v33 = vld [vmem:[%s7736_s0 + $0xc8] sm:$0xff] }
  0x30   :  { %v1888_v6 = vadd.f32 %v1887_v42, %v7745_v43  ;;  %v3698_v49 = vmul.f32 %v3299_v46, %v499_v23  ;;  %v971_v19 = vmul.f32 %v3216_v7, %v45_v44  ;;  %v1849_v35 = vadd.f32 %v969_v37, %v968_v4  ;;  %v48_v17 = vld [vmem:[%s7736_s0 + $0xd0] sm:$0xff]  ;;  %v523_v62 = vld [vmem:[%s7736_s0 + $0xfa8] sm:$0xff] }
  0x31   :  { %v1843_v57 = vadd.f32 %v1842_v9, %v3578_v0  ;;  %v2343_v10 = vadd.f32 %v2342_v3, %v1420_v59  ;;  %v1437_v36 = vmul.f32 %v3253_v25, %v511_v13  ;;  %v2359_v55 = vadd.f32 %v2358_v31, %v1435_v51  ;;  %v515_v59 = vld [vmem:[%s7736_s0 + $0xf68] sm:$0xff]  ;;  %v522_v51 = vld [vmem:[%s7736_s0 + $0xfa0] sm:$0xff]  ;;  %v517_v9 = vld [vmem:[%s7736_s0 + $0xf78] sm:$0xff] }
  0x32   :  { %1889 = vadd.xlane.f32.xlu2 %v1888_v6  ;;  %v3716_v34 = vmul.f32 %v3309_v52, %v500_v63  ;;  %v3719_v0 = vmul.f32 %v3311_v53, %v501_v60  ;;  %v972_v32 = vmul.f32 %v3226_v12, %v46_v45  ;;  %v1850_v8 = vadd.f32 %v1849_v35, %v970_v54  ;;  %v49_v3 = vld [vmem:[%s7736_s0 + $0xd8] sm:$0xff] }
  0x33   :  { %v1844_v4 = vadd.f32 %v1843_v57, %v3581_v11  ;;  %v2344_v37 = vadd.f32 %v2343_v10, %v1421_v29  ;;  %v1438_v30 = vmul.f32 %v3255_v26, %v512_v58  ;;  %v2360_v23 = vadd.f32 %v2359_v55, %v1436_v24  ;;  %v516_v11 = vld [vmem:[%s7736_s0 + $0xf70] sm:$0xff]  ;;  %v50_v10 = vld [vmem:[%s7736_s0 + $0xe0] sm:$0xff] }
  0x34   :  { %v1439_v29 = vmul.f32 %v3257_v27, %v513_v48  ;;  %v1440_v44 = vmul.f32 %v3259_v28, %v514_v47  ;;  %v973_v50 = vmul.f32 %v3232_v15, %v47_v33  ;;  %v1851_v42 = vadd.f32 %v1850_v8, %v971_v19  ;;  %v524_v24 = vld [vmem:[%s7736_s0 + $0xfb0] sm:$0xff]  ;;  %v525_v48 = vld [vmem:[%s7736_s0 + $0xfb8] sm:$0xff] }
  0x35   :  { %v1845_v13 = vadd.f32 %v1844_v4, %v3597_v14  ;;  %v2345_v54 = vadd.f32 %v2344_v37, %v1422_v22  ;;  %v1441_v63 = vmul.f32 %v3279_v38, %v515_v59  ;;  %v2361_v60 = vadd.f32 %v2360_v23, %v1437_v36  ;;  %v518_v14 = vld [vmem:[%s7736_s0 + $0xf80] sm:$0xff]  ;;  %v519_v22 = vld [vmem:[%s7736_s0 + $0xf88] sm:$0xff]  ;;  %v520_v47 = vld [vmem:[%s7736_s0 + $0xf90] sm:$0xff] }
  0x36   :  { %v974_v31 = vmul.f32 %v3234_v16, %v48_v17  ;;  %v1852_v45 = vadd.f32 %v1851_v42, %v972_v32  ;;  %v1448_v43 = vmul.f32 %v3201_v1, %v522_v51  ;;  %v1449_v6 = vmul.f32 %v3203_v2, %v523_v62  ;;  %v51_v37 = vld [vmem:[%s7736_s0 + $0xe8] sm:$0xff]  ;;  %v52_v23 = vld [vmem:[%s7736_s0 + $0xf0] sm:$0xff] }
  0x37   :  { %v1846_v58 = vadd.f32 %v1845_v13, %v3613_v18  ;;  %v2346_v19 = vadd.f32 %v2345_v54, %v1423_v56  ;;  %v1442_v35 = vmul.f32 %v3281_v39, %v516_v11  ;;  %v2362_v57 = vadd.f32 %v2361_v60, %v1438_v30  ;;  %v521_v18 = vld [vmem:[%s7736_s0 + $0xf98] sm:$0xff]  ;;  %v526_v30 = vld [vmem:[%s7736_s0 + $0xfc0] sm:$0xff]  ;;  %v55_v60 = vld [vmem:[%s7736_s0 + $0x108] sm:$0xff] }
  0x38   :  { %v1443_v56 = vmul.f32 %v3283_v40, %v517_v9  ;;  %v975_v36 = vmul.f32 %v3245_v20, %v49_v3  ;;  %v1853_v55 = vadd.f32 %v1852_v45, %v973_v50  ;;  %v1450_v33 = vmul.f32 %v3211_v5, %v524_v24  ;;  %v54_v54 = vld [vmem:[%s7736_s0 + $0x100] sm:$0xff]  ;;  %v527_v9 = vld [vmem:[%s7736_s0 + $0xfc8] sm:$0xff]  ;;  %v528_v24 = vld [vmem:[%s7736_s0 + $0xfd0] sm:$0xff] }
  0x39   :  { %1847 = vadd.xlane.f32.xlu0 %v1846_v58  ;;  %v2347_v59 = vadd.f32 %v2346_v19, %v3679_v61  ;;  %v1444_v32 = vmul.f32 %v3285_v41, %v518_v14  ;;  %v3782_v8 = vmul.f32 %v3299_v46, %v519_v22  ;;  %v2363_v4 = vadd.f32 %v2362_v57, %v1439_v29  ;;  %v53_v61 = vld [vmem:[%s7736_s0 + $0xf8] sm:$0xff]  ;;  %v103_v58 = vld [vmem:[%s7736_s0 + $0x288] sm:$0xff]  ;;  %v56_v19 = vld [vmem:[%s7736_s0 + $0x110] sm:$0xff] }
  0x3a   :  { %v976_v17 = vmul.f32 %v3247_v21, %v50_v10  ;;  %v1854_v51 = vadd.f32 %v1853_v55, %v974_v31  ;;  %v1451_v62 = vmul.f32 %v3216_v7, %v525_v48  ;;  %v2374_v11 = vadd.f32 %v1449_v6, %v1448_v43  ;;  %v102_v6 = vld [vmem:[%s7736_s0 + $0x280] sm:$0xff] }
  0x3b   :  { %v2348_v29 = vadd.f32 %v2347_v59, %v3698_v49  ;;  %v3800_v50 = vmul.f32 %v3309_v52, %v520_v47  ;;  %v3803_v42 = vmul.f32 %v3311_v53, %v521_v18  ;;  %v2364_v13 = vadd.f32 %v2363_v4, %v1440_v44  ;;  %v104_v4 = vld [vmem:[%s7736_s0 + $0x290] sm:$0xff] }
  0x3c   :  { %v977_v49 = vmul.f32 %v3253_v25, %v51_v37  ;;  %v1855_v3 = vadd.f32 %v1854_v51, %v975_v36  ;;  %v1452_v44 = vmul.f32 %v3226_v12, %v526_v30  ;;  %v2375_v14 = vadd.f32 %v2374_v11, %v1450_v33  ;;  %v529_v33 = vld [vmem:[%s7736_s0 + $0xfd8] sm:$0xff]  ;;  %v59_v37 = vld [vmem:[%s7736_s0 + $0x128] sm:$0xff]  ;;  %v530_v30 = vld [vmem:[%s7736_s0 + $0xfe0] sm:$0xff] }
  0x3d   :  { %v2349_v22 = vadd.f32 %v2348_v29, %v3716_v34  ;;  %v2365_v31 = vadd.f32 %v2364_v13, %v1441_v63  ;;  %v978_v45 = vmul.f32 %v3255_v26, %v52_v23  ;;  %v979_v43 = vmul.f32 %v3257_v27, %v53_v61  ;;  %v57_v34 = vld [vmem:[%s7736_s0 + $0x118] sm:$0xff]  ;;  %v58_v63 = vld [vmem:[%s7736_s0 + $0x120] sm:$0xff] }
  0x3e   :  { %v980_v57 = vmul.f32 %v3259_v28, %v54_v54  ;;  %v1856_v10 = vadd.f32 %v1855_v3, %v976_v17  ;;  %v1453_v48 = vmul.f32 %v3232_v15, %v527_v9  ;;  %v2376_v47 = vadd.f32 %v2375_v14, %v1451_v62  ;;  %v105_v13 = vld [vmem:[%s7736_s0 + $0x298] sm:$0xff] }
  0x3f   :  { %v2350_v18 = vadd.f32 %v2349_v22, %v3719_v0  ;;  %v2366_v36 = vadd.f32 %v2365_v31, %v1442_v35  ;;  %v981_v55 = vmul.f32 %v3279_v38, %v55_v60  ;;  %v1454_v59 = vmul.f32 %v3234_v16, %v528_v24  ;;  %v60_v0 = vld [vmem:[%s7736_s0 + $0x130] sm:$0xff]  ;;  %v61_v54 = vld [vmem:[%s7736_s0 + $0x138] sm:$0xff] }
  0x40   :  { %v1857_v35 = vadd.f32 %v1856_v10, %v977_v49  ;;  %v2377_v23 = vadd.f32 %v2376_v47, %v1452_v44  ;;  %v1028_v61 = vmul.f32 %v3201_v1, %v102_v6  ;;  %v1029_v17 = vmul.f32 %v3203_v2, %v103_v58  ;;  %v532_v60 = vld [vmem:[%s7736_s0 + $0xff0] sm:$0xff]  ;;  %v533_v58 = vld [vmem:[%s7736_s0 + $0xff8] sm:$0xff] }
  0x41   :  { %2351 = vadd.xlane.f32.xlu1 %v2350_v18  ;;  %v2367_v51 = vadd.f32 %v2366_v36, %v1443_v56  ;;  %v982_v62 = vmul.f32 %v3281_v39, %v56_v19  ;;  %v3861_v11 = vmul.f32 %v3283_v40, %v57_v34  ;;  %v3864_v29 = vmul.f32 %v3285_v41, %v58_v63  ;;  %v531_v56 = vld [vmem:[%s7736_s0 + $0xfe8] sm:$0xff] }
  0x42   :  { %v1858_v9 = vadd.f32 %v1857_v35, %v978_v45  ;;  %v1455_v49 = vmul.f32 %v3245_v20, %v529_v33  ;;  %v2378_v3 = vadd.f32 %v2377_v23, %v1453_v48  ;;  %v1030_v24 = vmul.f32 %v3211_v5, %v104_v4  ;;  %v106_v45 = vld [vmem:[%s7736_s0 + $0x2a0] sm:$0xff]  ;;  %v535_v19 = vld [vmem:[%s7736_s0 + $0x1008] sm:$0xff] }
  0x43   :  { %v2368_v44 = vadd.f32 %v2367_v51, %v1444_v32  ;;  %v3881_v14 = vmul.f32 %v3299_v46, %v59_v37  ;;  %v3884_v22 = vmul.f32 %v3309_v52, %v60_v0  ;;  %v1456_v31 = vmul.f32 %v3247_v21, %v530_v30  ;;  %v534_v32 = vld [vmem:[%s7736_s0 + $0x1000] sm:$0xff]  ;;  %v107_v36 = vld [vmem:[%s7736_s0 + $0x2a8] sm:$0xff]  ;;  %v84_v51 = vld [vmem:[%s7736_s0 + $0x1f0] sm:$0xff] }
  0x44   :  { %v1859_v6 = vadd.f32 %v1858_v9, %v979_v43  ;;  %v2379_v34 = vadd.f32 %v2378_v3, %v1454_v59  ;;  %v1031_v63 = vmul.f32 %v3216_v7, %v105_v13  ;;  %v1912_v10 = vadd.f32 %v1029_v17, %v1028_v61  ;;  %v536_v59 = vld [vmem:[%s7736_s0 + $0x1010] sm:$0xff]  ;;  %v82_v0 = vld [vmem:[%s7736_s0 + $0x1e0] sm:$0xff]  ;;  %v83_v35 = vld [vmem:[%s7736_s0 + $0x1e8] sm:$0xff] }
  0x45   :  { %v2369_v48 = vadd.f32 %v2368_v44, %v3782_v8  ;;  %v3902_v43 = vmul.f32 %v3311_v53, %v61_v54  ;;  %v1457_v47 = vmul.f32 %v3253_v25, %v531_v56  ;;  %v1458_v18 = vmul.f32 %v3255_v26, %v532_v60  ;;  %v108_v17 = vld [vmem:[%s7736_s0 + $0x2b0] sm:$0xff]  ;;  %v538_v54 = vld [vmem:[%s7736_s0 + $0x1020] sm:$0xff]  ;;  %v539_v9 = vld [vmem:[%s7736_s0 + $0x1028] sm:$0xff] }
  0x46   :  { %v1860_v33 = vadd.f32 %v1859_v6, %v980_v57  ;;  %v2380_v4 = vadd.f32 %v2379_v34, %v1455_v49  ;;  %v1032_v37 = vmul.f32 %v3226_v12, %v106_v45  ;;  %v1913_v8 = vadd.f32 %v1912_v10, %v1030_v24  ;;  %v109_v24 = vld [vmem:[%s7736_s0 + $0x2b8] sm:$0xff] }
  0x47   :  { %v2370_v30 = vadd.f32 %v2369_v48, %v3800_v50  ;;  %v1459_v57 = vmul.f32 %v3257_v27, %v533_v58  ;;  %v1460_v23 = vmul.f32 %v3259_v28, %v534_v32  ;;  %v3923_v61 = vmul.f32 %v3279_v38, %v535_v19  ;;  %v537_v50 = vld [vmem:[%s7736_s0 + $0x1018] sm:$0xff]  ;;  %v110_v48 = vld [vmem:[%s7736_s0 + $0x2c0] sm:$0xff] }
  0x48   :  { %v1861_v13 = vadd.f32 %v1860_v33, %v981_v55  ;;  %v2381_v56 = vadd.f32 %v2380_v4, %v1456_v31  ;;  %v1033_v60 = vmul.f32 %v3232_v15, %v107_v36  ;;  %v1914_v49 = vadd.f32 %v1913_v8, %v1031_v63  ;;  %v540_v31 = vld [vmem:[%s7736_s0 + $0x1030] sm:$0xff]  ;;  %v85_v34 = vld [vmem:[%s7736_s0 + $0x1f8] sm:$0xff] }
  0x49   :  { %v2371_v3 = vadd.f32 %v2370_v30, %v3803_v42  ;;  %v3943_v55 = vmul.f32 %v3281_v39, %v536_v59  ;;  %v1008_v44 = vmul.f32 %v3201_v1, %v82_v0  ;;  %v1009_v45 = vmul.f32 %v3203_v2, %v83_v35  ;;  %v541_v42 = vld [vmem:[%s7736_s0 + $0x1038] sm:$0xff]  ;;  %v111_v59 = vld [vmem:[%s7736_s0 + $0x2c8] sm:$0xff]  ;;  %v112_v4 = vld [vmem:[%s7736_s0 + $0x2d0] sm:$0xff] }
  0x4a   :  { %v1862_v6 = vadd.f32 %v1861_v13, %v982_v62  ;;  %v2382_v58 = vadd.f32 %v2381_v56, %v1457_v47  ;;  %v1034_v32 = vmul.f32 %v3234_v16, %v108_v17  ;;  %v1915_v19 = vadd.f32 %v1914_v49, %v1032_v37  ;;  %v86_v0 = vld [vmem:[%s7736_s0 + $0x200] sm:$0xff] }
  0x4b   :  { %2372 = vadd.xlane.f32.xlu2 %v2371_v3  ;;  %v3961_v63 = vmul.f32 %v3283_v40, %v537_v50  ;;  %v3964_v62 = vmul.f32 %v3285_v41, %v538_v54  ;;  %v3967_v10 = vmul.f32 %v3299_v46, %v539_v9  ;;  %v1010_v47 = vmul.f32 %v3211_v5, %v84_v51  ;;  %v114_v50 = vld [vmem:[%s7736_s0 + $0x2e0] sm:$0xff]  ;;  %v115_v54 = vld [vmem:[%s7736_s0 + $0x2e8] sm:$0xff] }
  0x4c   :  { %v1863_v36 = vadd.f32 %v1862_v6, %v3861_v11  ;;  %v2383_v33 = vadd.f32 %v2382_v58, %v1458_v18  ;;  %v1035_v37 = vmul.f32 %v3245_v20, %v109_v24  ;;  %v1916_v8 = vadd.f32 %v1915_v19, %v1033_v60  ;;  %v113_v18 = vld [vmem:[%s7736_s0 + $0x2d8] sm:$0xff]  ;;  %v87_v60 = vld [vmem:[%s7736_s0 + $0x208] sm:$0xff]  ;;  %v122_v58 = vld [vmem:[%s7736_s0 + $0x320] sm:$0xff] }
  0x4d   :  { %v3985_v35 = vmul.f32 %v3309_v52, %v540_v31  ;;  %v3988_v11 = vmul.f32 %v3311_v53, %v541_v42  ;;  %v1011_v30 = vmul.f32 %v3216_v7, %v85_v34  ;;  %v1891_v17 = vadd.f32 %v1009_v45, %v1008_v44  ;;  %v88_v42 = vld [vmem:[%s7736_s0 + $0x210] sm:$0xff] }
  0x4e   :  { %v1864_v51 = vadd.f32 %v1863_v36, %v3864_v29  ;;  %v2384_v13 = vadd.f32 %v2383_v33, %v1459_v57  ;;  %v1036_v9 = vmul.f32 %v3247_v21, %v110_v48  ;;  %v1917_v56 = vadd.f32 %v1916_v8, %v1034_v32  ;;  %v116_v29 = vld [vmem:[%s7736_s0 + $0x2f0] sm:$0xff]  ;;  %v123_v32 = vld [vmem:[%s7736_s0 + $0x328] sm:$0xff]  ;;  %v118_v33 = vld [vmem:[%s7736_s0 + $0x300] sm:$0xff] }
  0x4f   :  { %v1037_v57 = vmul.f32 %v3253_v25, %v111_v59  ;;  %v1038_v49 = vmul.f32 %v3255_v26, %v112_v4  ;;  %v1012_v3 = vmul.f32 %v3226_v12, %v86_v0  ;;  %v1892_v24 = vadd.f32 %v1891_v17, %v1010_v47  ;;  %v124_v8 = vld [vmem:[%s7736_s0 + $0x330] sm:$0xff] }
  0x50   :  { %v1865_v44 = vadd.f32 %v1864_v51, %v3881_v14  ;;  %v2385_v45 = vadd.f32 %v2384_v13, %v1460_v23  ;;  %v1039_v6 = vmul.f32 %v3257_v27, %v113_v18  ;;  %v1918_v31 = vadd.f32 %v1917_v56, %v1035_v37  ;;  %v117_v14 = vld [vmem:[%s7736_s0 + $0x2f8] sm:$0xff] }
  0x51   :  { %v1040_v23 = vmul.f32 %v3259_v28, %v114_v50  ;;  %v4027_v19 = vmul.f32 %v3279_v38, %v115_v54  ;;  %v1013_v34 = vmul.f32 %v3232_v15, %v87_v60  ;;  %v1893_v48 = vadd.f32 %v1892_v24, %v1011_v30  ;;  %v89_v37 = vld [vmem:[%s7736_s0 + $0x218] sm:$0xff] }
  0x52   :  { %v1866_v47 = vadd.f32 %v1865_v44, %v3884_v22  ;;  %v2386_v36 = vadd.f32 %v2385_v45, %v3923_v61  ;;  %v4036_v59 = vmul.f32 %v3281_v39, %v116_v29  ;;  %v1919_v4 = vadd.f32 %v1918_v31, %v1036_v9  ;;  %v119_v22 = vld [vmem:[%s7736_s0 + $0x308] sm:$0xff]  ;;  %v120_v61 = vld [vmem:[%s7736_s0 + $0x310] sm:$0xff]  ;;  %v90_v9 = vld [vmem:[%s7736_s0 + $0x220] sm:$0xff] }
  0x53   :  { %v1014_v0 = vmul.f32 %v3234_v16, %v88_v42  ;;  %v1894_v18 = vadd.f32 %v1893_v48, %v1012_v3  ;;  %v1048_v30 = vmul.f32 %v3201_v1, %v122_v58  ;;  %v1049_v17 = vmul.f32 %v3203_v2, %v123_v32  ;;  %v125_v56 = vld [vmem:[%s7736_s0 + $0x338] sm:$0xff]  ;;  %v92_v42 = vld [vmem:[%s7736_s0 + $0x230] sm:$0xff]  ;;  %v126_v58 = vld [vmem:[%s7736_s0 + $0x340] sm:$0xff] }
  0x54   :  { %v1867_v51 = vadd.f32 %v1866_v47, %v3902_v43  ;;  %v2387_v13 = vadd.f32 %v2386_v36, %v3943_v55  ;;  %v4056_v50 = vmul.f32 %v3283_v40, %v117_v14  ;;  %v1920_v54 = vadd.f32 %v1919_v4, %v1037_v57  ;;  %v121_v60 = vld [vmem:[%s7736_s0 + $0x318] sm:$0xff]  ;;  %v91_v55 = vld [vmem:[%s7736_s0 + $0x228] sm:$0xff] }
  0x55   :  { %v4068_v43 = vmul.f32 %v3285_v41, %v118_v33  ;;  %v1015_v29 = vmul.f32 %v3245_v20, %v89_v37  ;;  %v1895_v57 = vadd.f32 %v1894_v18, %v1013_v34  ;;  %v1050_v3 = vmul.f32 %v3211_v5, %v124_v8  ;;  %v93_v32 = vld [vmem:[%s7736_s0 + $0x238] sm:$0xff]  ;;  %v95_v4 = vld [vmem:[%s7736_s0 + $0x248] sm:$0xff] }
  0x56   :  { %1868 = vadd.xlane.f32.xlu0 %v1867_v51  ;;  %v2388_v24 = vadd.f32 %v2387_v13, %v3961_v63  ;;  %v4077_v44 = vmul.f32 %v3299_v46, %v119_v22  ;;  %v4080_v45 = vmul.f32 %v3309_v52, %v120_v61  ;;  %v1921_v31 = vadd.f32 %v1920_v54, %v1038_v49  ;;  %v94_v63 = vld [vmem:[%s7736_s0 + $0x240] sm:$0xff]  ;;  %v127_v8 = vld [vmem:[%s7736_s0 + $0x348] sm:$0xff]  ;;  %v96_v22 = vld [vmem:[%s7736_s0 + $0x250] sm:$0xff] }
  0x57   :  { %v1016_v14 = vmul.f32 %v3247_v21, %v90_v9  ;;  %v1896_v34 = vadd.f32 %v1895_v57, %v1014_v0  ;;  %v1051_v49 = vmul.f32 %v3216_v7, %v125_v56  ;;  %v1933_v48 = vadd.f32 %v1049_v17, %v1048_v30  ;;  %v562_v54 = vld [vmem:[%s7736_s0 + $0x10e0] sm:$0xff]  ;;  %v563_v9 = vld [vmem:[%s7736_s0 + $0x10e8] sm:$0xff]  ;;  %v97_v56 = vld [vmem:[%s7736_s0 + $0x258] sm:$0xff] }
  0x58   :  { %v2389_v47 = vadd.f32 %v2388_v24, %v3964_v62  ;;  %v4098_v36 = vmul.f32 %v3311_v53, %v121_v60  ;;  %v1922_v33 = vadd.f32 %v1921_v31, %v1039_v6  ;;  %v1017_v37 = vmul.f32 %v3253_v25, %v91_v55  ;;  %v128_v6 = vld [vmem:[%s7736_s0 + $0x350] sm:$0xff]  ;;  %v129_v31 = vld [vmem:[%s7736_s0 + $0x358] sm:$0xff] }
  0x59   :  { %v1018_v62 = vmul.f32 %v3255_v26, %v92_v42  ;;  %v1897_v61 = vadd.f32 %v1896_v34, %v1015_v29  ;;  %v1052_v0 = vmul.f32 %v3226_v12, %v126_v58  ;;  %v1934_v18 = vadd.f32 %v1933_v48, %v1050_v3  ;;  %v564_v58 = vld [vmem:[%s7736_s0 + $0x10f0] sm:$0xff] }
  0x5a   :  { %v2390_v30 = vadd.f32 %v2389_v47, %v3967_v10  ;;  %v1923_v17 = vadd.f32 %v1922_v33, %v1040_v23  ;;  %v1019_v51 = vmul.f32 %v3257_v27, %v93_v32  ;;  %v1020_v13 = vmul.f32 %v3259_v28, %v94_v63  ;;  %v98_v10 = vld [vmem:[%s7736_s0 + $0x260] sm:$0xff]  ;;  %v99_v32 = vld [vmem:[%s7736_s0 + $0x268] sm:$0xff] }
  0x5b   :  { %v1021_v23 = vmul.f32 %v3279_v38, %v95_v4  ;;  %v1898_v60 = vadd.f32 %v1897_v61, %v1016_v14  ;;  %v1053_v55 = vmul.f32 %v3232_v15, %v127_v8  ;;  %v1935_v29 = vadd.f32 %v1934_v18, %v1051_v49  ;;  %v130_v63 = vld [vmem:[%s7736_s0 + $0x360] sm:$0xff]  ;;  %v101_v8 = vld [vmem:[%s7736_s0 + $0x278] sm:$0xff] }
  0x5c   :  { %v2391_v57 = vadd.f32 %v2390_v30, %v3985_v35  ;;  %v1924_v3 = vadd.f32 %v1923_v17, %v4027_v19  ;;  %v4135_v24 = vmul.f32 %v3281_v39, %v96_v22  ;;  %v1054_v42 = vmul.f32 %v3234_v16, %v128_v6  ;;  %v100_v35 = vld [vmem:[%s7736_s0 + $0x270] sm:$0xff] }
  0x5d   :  { %v1899_v19 = vadd.f32 %v1898_v60, %v1017_v37  ;;  %v1936_v14 = vadd.f32 %v1935_v29, %v1052_v0  ;;  %v1488_v34 = vmul.f32 %v3201_v1, %v562_v54  ;;  %v1489_v49 = vmul.f32 %v3203_v2, %v563_v9  ;;  %v565_v37 = vld [vmem:[%s7736_s0 + $0x10f8] sm:$0xff]  ;;  %v566_v54 = vld [vmem:[%s7736_s0 + $0x1100] sm:$0xff] }
  0x5e   :  { %v2392_v48 = vadd.f32 %v2391_v57, %v3988_v11  ;;  %v1925_v47 = vadd.f32 %v1924_v3, %v4036_v59  ;;  %v4158_v33 = vmul.f32 %v3283_v40, %v97_v56  ;;  %v4161_v4 = vmul.f32 %v3285_v41, %v98_v10  ;;  %v131_v11 = vld [vmem:[%s7736_s0 + $0x368] sm:$0xff]  ;;  %v132_v59 = vld [vmem:[%s7736_s0 + $0x370] sm:$0xff]  ;;  %v133_v56 = vld [vmem:[%s7736_s0 + $0x378] sm:$0xff] }
  0x5f   :  { %v1900_v22 = vadd.f32 %v1899_v19, %v1018_v62  ;;  %v1055_v61 = vmul.f32 %v3245_v20, %v129_v31  ;;  %v1937_v6 = vadd.f32 %v1936_v14, %v1053_v55  ;;  %v1490_v0 = vmul.f32 %v3211_v5, %v564_v58  ;;  %v135_v10 = vld [vmem:[%s7736_s0 + $0x388] sm:$0xff] }
  0x60   :  { %2393 = vadd.xlane.f32.xlu1 %v2392_v48  ;;  %v1926_v18 = vadd.f32 %v1925_v47, %v4056_v50  ;;  %v4179_v30 = vmul.f32 %v3299_v46, %v99_v32  ;;  %v4182_v62 = vmul.f32 %v3309_v52, %v100_v35  ;;  %v1056_v17 = vmul.f32 %v3247_v21, %v130_v63  ;;  %v134_v50 = vld [vmem:[%s7736_s0 + $0x380] sm:$0xff]  ;;  %v567_v58 = vld [vmem:[%s7736_s0 + $0x1108] sm:$0xff]  ;;  %v568_v47 = vld [vmem:[%s7736_s0 + $0x1110] sm:$0xff] }
  0x61   :  { %v1901_v9 = vadd.f32 %v1900_v22, %v1019_v51  ;;  %v1938_v60 = vadd.f32 %v1937_v6, %v1054_v42  ;;  %v1491_v55 = vmul.f32 %v3216_v7, %v565_v37  ;;  %v2416_v29 = vadd.f32 %v1489_v49, %v1488_v34  ;;  %v136_v42 = vld [vmem:[%s7736_s0 + $0x390] sm:$0xff]  ;;  %v542_v63 = vld [vmem:[%s7736_s0 + $0x1040] sm:$0xff]  ;;  %v543_v14 = vld [vmem:[%s7736_s0 + $0x1048] sm:$0xff] }
  0x62   :  { %v1927_v57 = vadd.f32 %v1926_v18, %v4068_v43  ;;  %v4200_v51 = vmul.f32 %v3311_v53, %v101_v8  ;;  %v1057_v3 = vmul.f32 %v3253_v25, %v131_v11  ;;  %v1058_v31 = vmul.f32 %v3255_v26, %v132_v59  ;;  %v137_v8 = vld [vmem:[%s7736_s0 + $0x398] sm:$0xff] }
  0x63   :  { %v1902_v32 = vadd.f32 %v1901_v9, %v1020_v13  ;;  %v1939_v35 = vadd.f32 %v1938_v60, %v1055_v61  ;;  %v1492_v19 = vmul.f32 %v3226_v12, %v566_v54  ;;  %v2417_v43 = vadd.f32 %v2416_v29, %v1490_v0  ;;  %v544_v61 = vld [vmem:[%s7736_s0 + $0x1050] sm:$0xff]  ;;  %v569_v0 = vld [vmem:[%s7736_s0 + $0x1118] sm:$0xff]  ;;  %v139_v9 = vld [vmem:[%s7736_s0 + $0x3a8] sm:$0xff] }
  0x64   :  { %v1928_v34 = vadd.f32 %v1927_v57, %v4077_v44  ;;  %v1059_v13 = vmul.f32 %v3257_v27, %v133_v56  ;;  %v1060_v49 = vmul.f32 %v3259_v28, %v134_v50  ;;  %v4221_v48 = vmul.f32 %v3279_v38, %v135_v10  ;;  %v138_v44 = vld [vmem:[%s7736_s0 + $0x3a0] sm:$0xff]  ;;  %v545_v60 = vld [vmem:[%s7736_s0 + $0x1058] sm:$0xff] }
  0x65   :  { %v1903_v37 = vadd.f32 %v1902_v32, %v1021_v23  ;;  %v1940_v22 = vadd.f32 %v1939_v35, %v1056_v17  ;;  %v1493_v11 = vmul.f32 %v3232_v15, %v567_v58  ;;  %v2418_v59 = vadd.f32 %v2417_v43, %v1491_v55  ;;  %v570_v57 = vld [vmem:[%s7736_s0 + $0x1120] sm:$0xff]  ;;  %v141_v32 = vld [vmem:[%s7736_s0 + $0x3b8] sm:$0xff] }
  0x66   :  { %v1929_v6 = vadd.f32 %v1928_v34, %v4080_v45  ;;  %v4238_v23 = vmul.f32 %v3281_v39, %v136_v42  ;;  %v1468_v18 = vmul.f32 %v3201_v1, %v542_v63  ;;  %v1469_v17 = vmul.f32 %v3203_v2, %v543_v14  ;;  %v140_v45 = vld [vmem:[%s7736_s0 + $0x3b0] sm:$0xff]  ;;  %v546_v43 = vld [vmem:[%s7736_s0 + $0x1060] sm:$0xff] }
  0x67   :  { %v1904_v54 = vadd.f32 %v1903_v37, %v4135_v24  ;;  %v1941_v56 = vadd.f32 %v1940_v22, %v1057_v3  ;;  %v1494_v50 = vmul.f32 %v3234_v16, %v568_v47  ;;  %v2419_v10 = vadd.f32 %v2418_v59, %v1492_v19  ;;  %v547_v59 = vld [vmem:[%s7736_s0 + $0x1068] sm:$0xff] }
  0x68   :  { %v1930_v55 = vadd.f32 %v1929_v6, %v4098_v36  ;;  %v4258_v24 = vmul.f32 %v3283_v40, %v137_v8  ;;  %v4261_v29 = vmul.f32 %v3285_v41, %v138_v44  ;;  %v1470_v3 = vmul.f32 %v3211_v5, %v544_v61  ;;  %v571_v36 = vld [vmem:[%s7736_s0 + $0x1128] sm:$0xff]  ;;  %v573_v8 = vld [vmem:[%s7736_s0 + $0x1138] sm:$0xff]  ;;  %v574_v44 = vld [vmem:[%s7736_s0 + $0x1140] sm:$0xff] }
  0x69   :  { %v1905_v58 = vadd.f32 %v1904_v54, %v4158_v33  ;;  %v1942_v42 = vadd.f32 %v1941_v56, %v1058_v31  ;;  %v1495_v35 = vmul.f32 %v3245_v20, %v569_v0  ;;  %v2420_v19 = vadd.f32 %v2419_v10, %v1493_v11  ;;  %v572_v31 = vld [vmem:[%s7736_s0 + $0x1130] sm:$0xff]  ;;  %v582_v56 = vld [vmem:[%s7736_s0 + $0x1180] sm:$0xff] }
  0x6a   :  { %1931 = vadd.xlane.f32.xlu2 %v1930_v55  ;;  %v4279_v63 = vmul.f32 %v3299_v46, %v139_v9  ;;  %v4282_v33 = vmul.f32 %v3309_v52, %v140_v45  ;;  %v1471_v14 = vmul.f32 %v3216_v7, %v545_v60  ;;  %v2395_v34 = vadd.f32 %v1469_v17, %v1468_v18  ;;  %v548_v45 = vld [vmem:[%s7736_s0 + $0x1070] sm:$0xff] }
  0x6b   :  { %v1906_v47 = vadd.f32 %v1905_v58, %v4161_v4  ;;  %v1943_v37 = vadd.f32 %v1942_v42, %v1059_v13  ;;  %v1496_v22 = vmul.f32 %v3247_v21, %v570_v57  ;;  %v2421_v11 = vadd.f32 %v2420_v19, %v1494_v50  ;;  %v575_v4 = vld [vmem:[%s7736_s0 + $0x1148] sm:$0xff]  ;;  %v577_v58 = vld [vmem:[%s7736_s0 + $0x1158] sm:$0xff] }
  0x6c   :  { %v4300_v61 = vmul.f32 %v3311_v53, %v141_v32  ;;  %v1497_v13 = vmul.f32 %v3253_v25, %v571_v36  ;;  %v1472_v6 = vmul.f32 %v3226_v12, %v546_v43  ;;  %v2396_v0 = vadd.f32 %v2395_v34, %v1470_v3  ;;  %v583_v50 = vld [vmem:[%s7736_s0 + $0x1188] sm:$0xff]  ;;  %v549_v36 = vld [vmem:[%s7736_s0 + $0x1078] sm:$0xff] }
  0x6d   :  { %v1907_v18 = vadd.f32 %v1906_v47, %v4179_v30  ;;  %v1944_v17 = vadd.f32 %v1943_v37, %v1060_v49  ;;  %v1498_v54 = vmul.f32 %v3255_v26, %v572_v31  ;;  %v2422_v9 = vadd.f32 %v2421_v11, %v1495_v35  ;;  %v576_v30 = vld [vmem:[%s7736_s0 + $0x1150] sm:$0xff] }
  0x6e   :  { %v1499_v49 = vmul.f32 %v3257_v27, %v573_v8  ;;  %v1500_v10 = vmul.f32 %v3259_v28, %v574_v44  ;;  %v1473_v60 = vmul.f32 %v3232_v15, %v547_v59  ;;  %v2397_v55 = vadd.f32 %v2396_v0, %v1471_v14  ;;  %v584_v35 = vld [vmem:[%s7736_s0 + $0x1190] sm:$0xff]  ;;  %v550_v44 = vld [vmem:[%s7736_s0 + $0x1080] sm:$0xff] }
  0x6f   :  { %v1908_v57 = vadd.f32 %v1907_v18, %v4182_v62  ;;  %v1945_v3 = vadd.f32 %v1944_v17, %v4221_v48  ;;  %v1501_v32 = vmul.f32 %v3279_v38, %v575_v4  ;;  %v2423_v42 = vadd.f32 %v2422_v9, %v1496_v22  ;;  %v578_v62 = vld [vmem:[%s7736_s0 + $0x1160] sm:$0xff]  ;;  %v579_v48 = vld [vmem:[%s7736_s0 + $0x1168] sm:$0xff]  ;;  %v585_v22 = vld [vmem:[%s7736_s0 + $0x1198] sm:$0xff] }
  0x70   :  { %v1474_v19 = vmul.f32 %v3234_v16, %v548_v45  ;;  %v2398_v43 = vadd.f32 %v2397_v55, %v1472_v6  ;;  %v1508_v31 = vmul.f32 %v3201_v1, %v582_v56  ;;  %v1509_v14 = vmul.f32 %v3203_v2, %v583_v50  ;;  %v580_v11 = vld [vmem:[%s7736_s0 + $0x1170] sm:$0xff]  ;;  %v551_v9 = vld [vmem:[%s7736_s0 + $0x1088] sm:$0xff]  ;;  %v586_v45 = vld [vmem:[%s7736_s0 + $0x11a0] sm:$0xff] }
  0x71   :  { %v1909_v34 = vadd.f32 %v1908_v57, %v4200_v51  ;;  %v1946_v47 = vadd.f32 %v1945_v3, %v4238_v23  ;;  %v1502_v37 = vmul.f32 %v3281_v39, %v576_v30  ;;  %v2424_v8 = vadd.f32 %v2423_v42, %v1497_v13  ;;  %v581_v51 = vld [vmem:[%s7736_s0 + $0x1178] sm:$0xff]  ;;  %v552_v56 = vld [vmem:[%s7736_s0 + $0x1090] sm:$0xff]  ;;  %v554_v42 = vld [vmem:[%s7736_s0 + $0x10a0] sm:$0xff] }
  0x72   :  { %v4361_v23 = vmul.f32 %v3283_v40, %v577_v58  ;;  %v1475_v59 = vmul.f32 %v3245_v20, %v549_v36  ;;  %v2399_v4 = vadd.f32 %v2398_v43, %v1473_v60  ;;  %v1510_v13 = vmul.f32 %v3211_v5, %v584_v35  ;;  %v587_v36 = vld [vmem:[%s7736_s0 + $0x11a8] sm:$0xff] }
  0x73   :  { %1910 = vadd.xlane.f32.xlu0 %v1909_v34  ;;  %v1947_v6 = vadd.f32 %v1946_v47, %v4258_v24  ;;  %v4367_v0 = vmul.f32 %v3285_v41, %v578_v62  ;;  %v4370_v18 = vmul.f32 %v3299_v46, %v579_v48  ;;  %v2425_v17 = vadd.f32 %v2424_v8, %v1498_v54  ;;  %v553_v24 = vld [vmem:[%s7736_s0 + $0x1098] sm:$0xff]  ;;  %v555_v35 = vld [vmem:[%s7736_s0 + $0x10a8] sm:$0xff]  ;;  %v588_v48 = vld [vmem:[%s7736_s0 + $0x11b0] sm:$0xff] }
  0x74   :  { %v1476_v50 = vmul.f32 %v3247_v21, %v550_v44  ;;  %v2400_v30 = vadd.f32 %v2399_v4, %v1474_v19  ;;  %v1511_v54 = vmul.f32 %v3216_v7, %v585_v22  ;;  %v2437_v60 = vadd.f32 %v1509_v14, %v1508_v31  ;;  %v162_v47 = vld [vmem:[%s7736_s0 + $0x460] sm:$0xff]  ;;  %v163_v8 = vld [vmem:[%s7736_s0 + $0x468] sm:$0xff]  ;;  %v556_v44 = vld [vmem:[%s7736_s0 + $0x10b0] sm:$0xff] }
  0x75   :  { %v1948_v55 = vadd.f32 %v1947_v6, %v4261_v29  ;;  %v4388_v57 = vmul.f32 %v3309_v52, %v580_v11  ;;  %v4391_v3 = vmul.f32 %v3311_v53, %v581_v51  ;;  %v2426_v58 = vadd.f32 %v2425_v17, %v1499_v49  ;;  %v589_v6 = vld [vmem:[%s7736_s0 + $0x11b8] sm:$0xff] }
  0x76   :  { %v1477_v29 = vmul.f32 %v3253_v25, %v551_v9  ;;  %v2401_v62 = vadd.f32 %v2400_v30, %v1475_v59  ;;  %v1512_v49 = vmul.f32 %v3226_v12, %v586_v45  ;;  %v2438_v19 = vadd.f32 %v2437_v60, %v1510_v13  ;;  %v164_v9 = vld [vmem:[%s7736_s0 + $0x470] sm:$0xff]  ;;  %v558_v45 = vld [vmem:[%s7736_s0 + $0x10c0] sm:$0xff] }
  0x77   :  { %v1949_v43 = vadd.f32 %v1948_v55, %v4279_v63  ;;  %v2427_v31 = vadd.f32 %v2426_v58, %v1500_v10  ;;  %v1478_v14 = vmul.f32 %v3255_v26, %v552_v56  ;;  %v1479_v34 = vmul.f32 %v3257_v27, %v553_v24  ;;  %v557_v63 = vld [vmem:[%s7736_s0 + $0x10b8] sm:$0xff]  ;;  %v590_v56 = vld [vmem:[%s7736_s0 + $0x11c0] sm:$0xff] }
  0x78   :  { %v1480_v10 = vmul.f32 %v3259_v28, %v554_v42  ;;  %v2402_v22 = vadd.f32 %v2401_v62, %v1476_v50  ;;  %v1513_v11 = vmul.f32 %v3232_v15, %v587_v36  ;;  %v2439_v51 = vadd.f32 %v2438_v19, %v1511_v54  ;;  %v165_v42 = vld [vmem:[%s7736_s0 + $0x478] sm:$0xff]  ;;  %v560_v36 = vld [vmem:[%s7736_s0 + $0x10d0] sm:$0xff] }
  0x79   :  { %v1950_v59 = vadd.f32 %v1949_v43, %v4282_v33  ;;  %v2428_v4 = vadd.f32 %v2427_v31, %v1501_v32  ;;  %v1481_v13 = vmul.f32 %v3279_v38, %v555_v35  ;;  %v1514_v17 = vmul.f32 %v3234_v16, %v588_v48  ;;  %v559_v33 = vld [vmem:[%s7736_s0 + $0x10c8] sm:$0xff]  ;;  %v561_v35 = vld [vmem:[%s7736_s0 + $0x10d8] sm:$0xff] }
  0x7a   :  { %v2403_v32 = vadd.f32 %v2402_v22, %v1477_v29  ;;  %v2440_v24 = vadd.f32 %v2439_v51, %v1512_v49  ;;  %v1088_v50 = vmul.f32 %v3201_v1, %v162_v47  ;;  %v1089_v30 = vmul.f32 %v3203_v2, %v163_v8  ;;  %v592_v8 = vld [vmem:[%s7736_s0 + $0x11d0] sm:$0xff] }
  0x7b   :  { %v1951_v54 = vadd.f32 %v1950_v59, %v4300_v61  ;;  %v2429_v60 = vadd.f32 %v2428_v4, %v1502_v37  ;;  %v1482_v55 = vmul.f32 %v3281_v39, %v556_v44  ;;  %v4447_v58 = vmul.f32 %v3283_v40, %v557_v63  ;;  %v591_v61 = vld [vmem:[%s7736_s0 + $0x11c8] sm:$0xff]  ;;  %v594_v44 = vld [vmem:[%s7736_s0 + $0x11e0] sm:$0xff] }
  0x7c   :  { %v2404_v29 = vadd.f32 %v2403_v32, %v1478_v14  ;;  %v1515_v37 = vmul.f32 %v3245_v20, %v589_v6  ;;  %v2441_v62 = vadd.f32 %v2440_v24, %v1513_v11  ;;  %v1090_v48 = vmul.f32 %v3211_v5, %v164_v9  ;;  %v166_v14 = vld [vmem:[%s7736_s0 + $0x480] sm:$0xff]  ;;  %v167_v6 = vld [vmem:[%s7736_s0 + $0x488] sm:$0xff] }
  0x7d   :  { %1952 = vadd.xlane.f32.xlu1 %v1951_v54  ;;  %v2430_v49 = vadd.f32 %v2429_v60, %v4361_v23  ;;  %v4465_v19 = vmul.f32 %v3285_v41, %v558_v45  ;;  %v4468_v43 = vmul.f32 %v3299_v46, %v559_v33  ;;  %v1516_v31 = vmul.f32 %v3247_v21, %v590_v56  ;;  %v593_v23 = vld [vmem:[%s7736_s0 + $0x11d8] sm:$0xff]  ;;  %v142_v56 = vld [vmem:[%s7736_s0 + $0x3c0] sm:$0xff]  ;;  %v143_v54 = vld [vmem:[%s7736_s0 + $0x3c8] sm:$0xff] }
  0x7e   :  { %v2405_v47 = vadd.f32 %v2404_v29, %v1479_v34  ;;  %v2442_v63 = vadd.f32 %v2441_v62, %v1514_v17  ;;  %v1091_v22 = vmul.f32 %v3216_v7, %v165_v42  ;;  %v1975_v11 = vadd.f32 %v1089_v30, %v1088_v50  ;;  %v595_v17 = vld [vmem:[%s7736_s0 + $0x11e8] sm:$0xff]  ;;  %v596_v42 = vld [vmem:[%s7736_s0 + $0x11f0] sm:$0xff]  ;;  %v170_v62 = vld [vmem:[%s7736_s0 + $0x4a0] sm:$0xff] }
  0x7f   :  { %v2431_v51 = vadd.f32 %v2430_v49, %v4367_v0  ;;  %v4486_v34 = vmul.f32 %v3309_v52, %v560_v36  ;;  %v4489_v59 = vmul.f32 %v3311_v53, %v561_v35  ;;  %v1517_v4 = vmul.f32 %v3253_v25, %v591_v61  ;;  %v168_v0 = vld [vmem:[%s7736_s0 + $0x490] sm:$0xff]  ;;  %v597_v36 = vld [vmem:[%s7736_s0 + $0x11f8] sm:$0xff] }
  0x80   :  { %v2406_v9 = vadd.f32 %v2405_v47, %v1480_v10  ;;  %v2443_v45 = vadd.f32 %v2442_v63, %v1515_v37  ;;  %v1092_v33 = vmul.f32 %v3226_v12, %v166_v14  ;;  %v1976_v32 = vadd.f32 %v1975_v11, %v1090_v48  ;;  %v169_v35 = vld [vmem:[%s7736_s0 + $0x498] sm:$0xff]  ;;  %v144_v49 = vld [vmem:[%s7736_s0 + $0x3d0] sm:$0xff]  ;;  %v598_v47 = vld [vmem:[%s7736_s0 + $0x1200] sm:$0xff] }
  0x81   :  { %v2432_v24 = vadd.f32 %v2431_v51, %v4370_v18  ;;  %v1518_v10 = vmul.f32 %v3255_v26, %v592_v8  ;;  %v1519_v50 = vmul.f32 %v3257_v27, %v593_v23  ;;  %v1520_v30 = vmul.f32 %v3259_v28, %v594_v44  ;;  %v145_v44 = vld [vmem:[%s7736_s0 + $0x3d8] sm:$0xff]  ;;  %v171_v51 = vld [vmem:[%s7736_s0 + $0x4a8] sm:$0xff] }
  0x82   :  { %v2407_v60 = vadd.f32 %v2406_v9, %v1481_v13  ;;  %v2444_v18 = vadd.f32 %v2443_v45, %v1516_v31  ;;  %v1093_v29 = vmul.f32 %v3232_v15, %v167_v6  ;;  %v1977_v61 = vadd.f32 %v1976_v32, %v1091_v22  ;;  %v600_v9 = vld [vmem:[%s7736_s0 + $0x1210] sm:$0xff] }
  0x83   :  { %v2433_v37 = vadd.f32 %v2432_v24, %v4388_v57  ;;  %v1521_v13 = vmul.f32 %v3279_v38, %v595_v17  ;;  %v1094_v48 = vmul.f32 %v3234_v16, %v168_v0  ;;  %v1068_v31 = vmul.f32 %v3201_v1, %v142_v56  ;;  %v599_v57 = vld [vmem:[%s7736_s0 + $0x1208] sm:$0xff]  ;;  %v146_v0 = vld [vmem:[%s7736_s0 + $0x3e0] sm:$0xff]  ;;  %v172_v56 = vld [vmem:[%s7736_s0 + $0x4b0] sm:$0xff] }
  0x84   :  { %v2408_v14 = vadd.f32 %v2407_v60, %v1482_v55  ;;  %v2445_v8 = vadd.f32 %v2444_v18, %v1517_v4  ;;  %v1978_v23 = vadd.f32 %v1977_v61, %v1092_v33  ;;  %v1069_v63 = vmul.f32 %v3203_v2, %v143_v54 }
  0x85   :  { %v2434_v22 = vadd.f32 %v2433_v37, %v4391_v3  ;;  %v1522_v55 = vmul.f32 %v3281_v39, %v596_v42  ;;  %v4545_v11 = vmul.f32 %v3283_v40, %v597_v36  ;;  %v1095_v4 = vmul.f32 %v3245_v20, %v169_v35  ;;  %v601_v3 = vld [vmem:[%s7736_s0 + $0x1218] sm:$0xff]  ;;  %v174_v36 = vld [vmem:[%s7736_s0 + $0x4c0] sm:$0xff]  ;;  %v147_v35 = vld [vmem:[%s7736_s0 + $0x3e8] sm:$0xff] }
  0x86   :  { %v2409_v6 = vadd.f32 %v2408_v14, %v4447_v58  ;;  %v2446_v17 = vadd.f32 %v2445_v8, %v1518_v10  ;;  %v1979_v45 = vadd.f32 %v1978_v23, %v1093_v29  ;;  %v1070_v33 = vmul.f32 %v3211_v5, %v144_v49  ;;  %v173_v42 = vld [vmem:[%s7736_s0 + $0x4b8] sm:$0xff]  ;;  %v148_v37 = vld [vmem:[%s7736_s0 + $0x3f0] sm:$0xff]  ;;  %v183_v8 = vld [vmem:[%s7736_s0 + $0x508] sm:$0xff] }
  0x87   :  { %2435 = vadd.xlane.f32.xlu2 %v2434_v22  ;;  %v4563_v32 = vmul.f32 %v3285_v41, %v598_v47  ;;  %v4566_v58 = vmul.f32 %v3299_v46, %v599_v57  ;;  %v1096_v24 = vmul.f32 %v3247_v21, %v170_v62  ;;  %v1071_v10 = vmul.f32 %v3216_v7, %v145_v44  ;;  %v182_v57 = vld [vmem:[%s7736_s0 + $0x500] sm:$0xff]  ;;  %v176_v23 = vld [vmem:[%s7736_s0 + $0x4d0] sm:$0xff] }
  0x88   :  { %v2410_v54 = vadd.f32 %v2409_v6, %v4465_v19  ;;  %v2447_v60 = vadd.f32 %v2446_v17, %v1519_v50  ;;  %v1980_v18 = vadd.f32 %v1979_v45, %v1094_v48  ;;  %v1954_v29 = vadd.f32 %v1069_v63, %v1068_v31  ;;  %v175_v31 = vld [vmem:[%s7736_s0 + $0x4c8] sm:$0xff]  ;;  %v178_v6 = vld [vmem:[%s7736_s0 + $0x4e0] sm:$0xff]  ;;  %v184_v17 = vld [vmem:[%s7736_s0 + $0x510] sm:$0xff] }
  0x89   :  { %v4584_v61 = vmul.f32 %v3309_v52, %v600_v9  ;;  %v4587_v19 = vmul.f32 %v3311_v53, %v601_v3  ;;  %v1097_v50 = vmul.f32 %v3253_v25, %v171_v51  ;;  %v1072_v62 = vmul.f32 %v3226_v12, %v146_v0 }
  0x8a   :  { %v2411_v48 = vadd.f32 %v2410_v54, %v4468_v43  ;;  %v2448_v49 = vadd.f32 %v2447_v60, %v1520_v30  ;;  %v1981_v14 = vadd.f32 %v1980_v18, %v1095_v4  ;;  %v1955_v47 = vadd.f32 %v1954_v29, %v1070_v33  ;;  %v177_v4 = vld [vmem:[%s7736_s0 + $0x4d8] sm:$0xff]  ;;  %v180_v54 = vld [vmem:[%s7736_s0 + $0x4f0] sm:$0xff] }
  0x8b   :  { %v1098_v43 = vmul.f32 %v3255_v26, %v172_v56  ;;  %v1099_v30 = vmul.f32 %v3257_v27, %v173_v42  ;;  %v1100_v44 = vmul.f32 %v3259_v28, %v174_v36  ;;  %v1073_v63 = vmul.f32 %v3232_v15, %v147_v35  ;;  %v185_v36 = vld [vmem:[%s7736_s0 + $0x518] sm:$0xff] }
  0x8c   :  { %v2412_v22 = vadd.f32 %v2411_v48, %v4486_v34  ;;  %v2449_v51 = vadd.f32 %v2448_v49, %v1521_v13  ;;  %v1982_v9 = vadd.f32 %v1981_v14, %v1096_v24  ;;  %v1956_v3 = vadd.f32 %v1955_v47, %v1071_v10  ;;  %v149_v34 = vld [vmem:[%s7736_s0 + $0x3f8] sm:$0xff]  ;;  %v179_v10 = vld [vmem:[%s7736_s0 + $0x4e8] sm:$0xff]  ;;  %v186_v14 = vld [vmem:[%s7736_s0 + $0x520] sm:$0xff] }
  0x8d   :  { %v1101_v45 = vmul.f32 %v3279_v38, %v175_v31  ;;  %v1074_v13 = vmul.f32 %v3234_v16, %v148_v37  ;;  %v1108_v0 = vmul.f32 %v3201_v1, %v182_v57  ;;  %v1109_v33 = vmul.f32 %v3203_v2, %v183_v8  ;;  %v181_v37 = vld [vmem:[%s7736_s0 + $0x4f8] sm:$0xff]  ;;  %v151_v48 = vld [vmem:[%s7736_s0 + $0x408] sm:$0xff]  ;;  %v152_v57 = vld [vmem:[%s7736_s0 + $0x410] sm:$0xff] }
  0x8e   :  { %v2413_v56 = vadd.f32 %v2412_v22, %v4489_v59  ;;  %v2450_v24 = vadd.f32 %v2449_v51, %v1522_v55  ;;  %v1983_v60 = vadd.f32 %v1982_v9, %v1097_v50  ;;  %v1957_v42 = vadd.f32 %v1956_v3, %v1072_v62  ;;  %v150_v55 = vld [vmem:[%s7736_s0 + $0x400] sm:$0xff]  ;;  %v153_v22 = vld [vmem:[%s7736_s0 + $0x418] sm:$0xff]  ;;  %v187_v9 = vld [vmem:[%s7736_s0 + $0x528] sm:$0xff] }
  0x8f   :  { %v1102_v18 = vmul.f32 %v3281_v39, %v176_v23  ;;  %v4640_v35 = vmul.f32 %v3283_v40, %v177_v4  ;;  %v4643_v59 = vmul.f32 %v3285_v41, %v178_v6  ;;  %v1110_v29 = vmul.f32 %v3211_v5, %v184_v17  ;;  %v154_v51 = vld [vmem:[%s7736_s0 + $0x420] sm:$0xff] }
  0x90   :  { %2414 = vadd.xlane.f32.xlu0 %v2413_v56  ;;  %v2451_v50 = vadd.f32 %v2450_v24, %v4545_v11  ;;  %v1984_v62 = vadd.f32 %v1983_v60, %v1098_v43  ;;  %v1075_v49 = vmul.f32 %v3245_v20, %v149_v34  ;;  %v1958_v31 = vadd.f32 %v1957_v42, %v1073_v63  ;;  %v188_v24 = vld [vmem:[%s7736_s0 + $0x530] sm:$0xff] }
  0x91   :  { %v4661_v47 = vmul.f32 %v3299_v46, %v179_v10  ;;  %v4664_v11 = vmul.f32 %v3309_v52, %v180_v54  ;;  %v1111_v8 = vmul.f32 %v3216_v7, %v185_v36  ;;  %v1996_v23 = vadd.f32 %v1109_v33, %v1108_v0  ;;  %v622_v10 = vld [vmem:[%s7736_s0 + $0x12c0] sm:$0xff]  ;;  %v623_v54 = vld [vmem:[%s7736_s0 + $0x12c8] sm:$0xff] }
  0x92   :  { %v2452_v43 = vadd.f32 %v2451_v50, %v4563_v32  ;;  %v1985_v63 = vadd.f32 %v1984_v62, %v1099_v30  ;;  %v1076_v4 = vmul.f32 %v3247_v21, %v150_v55  ;;  %v1959_v6 = vadd.f32 %v1958_v31, %v1074_v13  ;;  %v155_v32 = vld [vmem:[%s7736_s0 + $0x428] sm:$0xff]  ;;  %v157_v50 = vld [vmem:[%s7736_s0 + $0x438] sm:$0xff] }
  0x93   :  { %v4682_v3 = vmul.f32 %v3311_v53, %v181_v37  ;;  %v1077_v30 = vmul.f32 %v3253_v25, %v151_v48  ;;  %v1112_v17 = vmul.f32 %v3226_v12, %v186_v14  ;;  %v1997_v34 = vadd.f32 %v1996_v23, %v1110_v29  ;;  %v189_v48 = vld [vmem:[%s7736_s0 + $0x538] sm:$0xff] }
  0x94   :  { %v2453_v0 = vadd.f32 %v2452_v43, %v4566_v58  ;;  %v1986_v33 = vadd.f32 %v1985_v63, %v1100_v44  ;;  %v1078_v13 = vmul.f32 %v3255_v26, %v152_v57  ;;  %v1960_v56 = vadd.f32 %v1959_v6, %v1075_v49  ;;  %v156_v58 = vld [vmem:[%s7736_s0 + $0x430] sm:$0xff] }
  0x95   :  { %v1079_v44 = vmul.f32 %v3257_v27, %v153_v22  ;;  %v1080_v60 = vmul.f32 %v3259_v28, %v154_v51  ;;  %v1113_v42 = vmul.f32 %v3232_v15, %v187_v9  ;;  %v1998_v36 = vadd.f32 %v1997_v34, %v1111_v8  ;;  %v624_v49 = vld [vmem:[%s7736_s0 + $0x12d0] sm:$0xff]  ;;  %v190_v51 = vld [vmem:[%s7736_s0 + $0x540] sm:$0xff] }
  0x96   :  { %v2454_v55 = vadd.f32 %v2453_v0, %v4584_v61  ;;  %v1987_v29 = vadd.f32 %v1986_v33, %v1101_v45  ;;  %v1081_v37 = vmul.f32 %v3279_v38, %v155_v32  ;;  %v1961_v62 = vadd.f32 %v1960_v56, %v1076_v4  ;;  %v158_v61 = vld [vmem:[%s7736_s0 + $0x440] sm:$0xff]  ;;  %v159_v45 = vld [vmem:[%s7736_s0 + $0x448] sm:$0xff]  ;;  %v625_v4 = vld [vmem:[%s7736_s0 + $0x12d8] sm:$0xff] }
  0x97   :  { %v1114_v31 = vmul.f32 %v3234_v16, %v188_v24  ;;  %v1999_v14 = vadd.f32 %v1998_v36, %v1112_v17  ;;  %v1548_v57 = vmul.f32 %v3201_v1, %v622_v10  ;;  %v1549_v8 = vmul.f32 %v3203_v2, %v623_v54  ;;  %v160_v6 = vld [vmem:[%s7736_s0 + $0x450] sm:$0xff]  ;;  %v191_v56 = vld [vmem:[%s7736_s0 + $0x548] sm:$0xff]  ;;  %v626_v24 = vld [vmem:[%s7736_s0 + $0x12e0] sm:$0xff] }
  0x98   :  { %v2455_v23 = vadd.f32 %v2454_v55, %v4587_v19  ;;  %v1988_v43 = vadd.f32 %v1987_v29, %v1102_v18  ;;  %v1082_v63 = vmul.f32 %v3281_v39, %v156_v58  ;;  %v1962_v22 = vadd.f32 %v1961_v62, %v1077_v30  ;;  %v161_v19 = vld [vmem:[%s7736_s0 + $0x458] sm:$0xff]  ;;  %v192_v10 = vld [vmem:[%s7736_s0 + $0x550] sm:$0xff]  ;;  %v194_v62 = vld [vmem:[%s7736_s0 + $0x560] sm:$0xff] }
  0x99   :  { %v4741_v18 = vmul.f32 %v3283_v40, %v157_v50  ;;  %v1115_v9 = vmul.f32 %v3245_v20, %v189_v48  ;;  %v2000_v32 = vadd.f32 %v1999_v14, %v1113_v42  ;;  %v1550_v30 = vmul.f32 %v3211_v5, %v624_v49  ;;  %v627_v48 = vld [vmem:[%s7736_s0 + $0x12e8] sm:$0xff] }
  0x9a   :  { %2456 = vadd.xlane.f32.xlu1 %v2455_v23  ;;  %v1989_v17 = vadd.f32 %v1988_v43, %v4640_v35  ;;  %v4747_v34 = vmul.f32 %v3285_v41, %v158_v61  ;;  %v4750_v0 = vmul.f32 %v3299_v46, %v159_v45  ;;  %v1963_v33 = vadd.f32 %v1962_v22, %v1078_v13  ;;  %v193_v35 = vld [vmem:[%s7736_s0 + $0x558] sm:$0xff]  ;;  %v195_v49 = vld [vmem:[%s7736_s0 + $0x568] sm:$0xff]  ;;  %v628_v45 = vld [vmem:[%s7736_s0 + $0x12f0] sm:$0xff] }
  0x9b   :  { %v1116_v54 = vmul.f32 %v3247_v21, %v190_v51  ;;  %v2001_v58 = vadd.f32 %v2000_v32, %v1114_v31  ;;  %v1551_v13 = vmul.f32 %v3216_v7, %v625_v4  ;;  %v2479_v42 = vadd.f32 %v1549_v8, %v1548_v57  ;;  %v602_v43 = vld [vmem:[%s7736_s0 + $0x1220] sm:$0xff]  ;;  %v603_v22 = vld [vmem:[%s7736_s0 + $0x1228] sm:$0xff]  ;;  %v196_v51 = vld [vmem:[%s7736_s0 + $0x570] sm:$0xff] }
  0x9c   :  { %v1990_v36 = vadd.f32 %v1989_v17, %v4643_v59  ;;  %v4768_v55 = vmul.f32 %v3309_v52, %v160_v6  ;;  %v4771_v29 = vmul.f32 %v3311_v53, %v161_v19  ;;  %v1964_v50 = vadd.f32 %v1963_v33, %v1079_v44  ;;  %v629_v17 = vld [vmem:[%s7736_s0 + $0x12f8] sm:$0xff] }
  0x9d   :  { %v1117_v59 = vmul.f32 %v3253_v25, %v191_v56  ;;  %v2002_v61 = vadd.f32 %v2001_v58, %v1115_v9  ;;  %v1552_v44 = vmul.f32 %v3226_v12, %v626_v24  ;;  %v2480_v31 = vadd.f32 %v2479_v42, %v1550_v30  ;;  %v604_v56 = vld [vmem:[%s7736_s0 + $0x1230] sm:$0xff]  ;;  %v198_v24 = vld [vmem:[%s7736_s0 + $0x580] sm:$0xff] }
  0x9e   :  { %v1991_v14 = vadd.f32 %v1990_v36, %v4661_v47  ;;  %v1965_v57 = vadd.f32 %v1964_v50, %v1080_v60  ;;  %v1118_v8 = vmul.f32 %v3255_v26, %v192_v10  ;;  %v1119_v23 = vmul.f32 %v3257_v27, %v193_v35  ;;  %v197_v47 = vld [vmem:[%s7736_s0 + $0x578] sm:$0xff]  ;;  %v630_v10 = vld [vmem:[%s7736_s0 + $0x1300] sm:$0xff] }
  0x9f   :  { %v1120_v60 = vmul.f32 %v3259_v28, %v194_v62  ;;  %v2003_v4 = vadd.f32 %v2002_v61, %v1116_v54  ;;  %v1553_v6 = vmul.f32 %v3232_v15, %v627_v48  ;;  %v2481_v19 = vadd.f32 %v2480_v31, %v1551_v13  ;;  %v605_v62 = vld [vmem:[%s7736_s0 + $0x1238] sm:$0xff]  ;;  %v200_v48 = vld [vmem:[%s7736_s0 + $0x590] sm:$0xff] }
  0xa0   :  { %v1992_v9 = vadd.f32 %v1991_v14, %v4664_v11  ;;  %v1966_v32 = vadd.f32 %v1965_v57, %v1081_v37  ;;  %v1121_v30 = vmul.f32 %v3279_v38, %v195_v49  ;;  %v1554_v33 = vmul.f32 %v3234_v16, %v628_v45  ;;  %v199_v11 = vld [vmem:[%s7736_s0 + $0x588] sm:$0xff]  ;;  %v201_v49 = vld [vmem:[%s7736_s0 + $0x598] sm:$0xff] }
  0xa1   :  { %v2004_v37 = vadd.f32 %v2003_v4, %v1117_v59  ;;  %v2482_v35 = vadd.f32 %v2481_v19, %v1552_v44  ;;  %v1528_v54 = vmul.f32 %v3201_v1, %v602_v43  ;;  %v1529_v58 = vmul.f32 %v3203_v2, %v603_v22  ;;  %v632_v22 = vld [vmem:[%s7736_s0 + $0x1310] sm:$0xff] }
  0xa2   :  { %v1993_v13 = vadd.f32 %v1992_v9, %v4682_v3  ;;  %v1967_v42 = vadd.f32 %v1966_v32, %v1082_v63  ;;  %v1122_v36 = vmul.f32 %v3281_v39, %v196_v51  ;;  %v4827_v50 = vmul.f32 %v3283_v40, %v197_v47  ;;  %v631_v3 = vld [vmem:[%s7736_s0 + $0x1308] sm:$0xff]  ;;  %v634_v51 = vld [vmem:[%s7736_s0 + $0x1320] sm:$0xff] }
  0xa3   :  { %v2005_v59 = vadd.f32 %v2004_v37, %v1118_v8  ;;  %v1555_v63 = vmul.f32 %v3245_v20, %v629_v17  ;;  %v2483_v61 = vadd.f32 %v2482_v35, %v1553_v6  ;;  %v1530_v45 = vmul.f32 %v3211_v5, %v604_v56  ;;  %v606_v8 = vld [vmem:[%s7736_s0 + $0x1240] sm:$0xff]  ;;  %v607_v17 = vld [vmem:[%s7736_s0 + $0x1248] sm:$0xff] }
  0xa4   :  { %1994 = vadd.xlane.f32.xlu2 %v1993_v13  ;;  %v1968_v44 = vadd.f32 %v1967_v42, %v4741_v18  ;;  %v4845_v31 = vmul.f32 %v3285_v41, %v198_v24  ;;  %v4848_v14 = vmul.f32 %v3299_v46, %v199_v11  ;;  %v1556_v57 = vmul.f32 %v3247_v21, %v630_v10  ;;  %v633_v18 = vld [vmem:[%s7736_s0 + $0x1318] sm:$0xff]  ;;  %v642_v10 = vld [vmem:[%s7736_s0 + $0x1360] sm:$0xff]  ;;  %v643_v13 = vld [vmem:[%s7736_s0 + $0x1368] sm:$0xff] }
  0xa5   :  { %v2006_v43 = vadd.f32 %v2005_v59, %v1119_v23  ;;  %v2484_v47 = vadd.f32 %v2483_v61, %v1554_v33  ;;  %v1531_v4 = vmul.f32 %v3216_v7, %v605_v62  ;;  %v2458_v6 = vadd.f32 %v1529_v58, %v1528_v54  ;;  %v635_v33 = vld [vmem:[%s7736_s0 + $0x1328] sm:$0xff]  ;;  %v636_v62 = vld [vmem:[%s7736_s0 + $0x1330] sm:$0xff]  ;;  %v610_v61 = vld [vmem:[%s7736_s0 + $0x1260] sm:$0xff] }
  0xa6   :  { %v1969_v19 = vadd.f32 %v1968_v44, %v4747_v34  ;;  %v4866_v23 = vmul.f32 %v3309_v52, %v200_v48  ;;  %v4869_v9 = vmul.f32 %v3311_v53, %v201_v49  ;;  %v1557_v32 = vmul.f32 %v3253_v25, %v631_v3  ;;  %v608_v34 = vld [vmem:[%s7736_s0 + $0x1250] sm:$0xff]  ;;  %v637_v48 = vld [vmem:[%s7736_s0 + $0x1338] sm:$0xff] }
  0xa7   :  { %v2007_v56 = vadd.f32 %v2006_v43, %v1120_v60  ;;  %v2485_v24 = vadd.f32 %v2484_v47, %v1555_v63  ;;  %v1532_v11 = vmul.f32 %v3226_v12, %v606_v8  ;;  %v2459_v37 = vadd.f32 %v2458_v6, %v1530_v45  ;;  %v609_v49 = vld [vmem:[%s7736_s0 + $0x1258] sm:$0xff]  ;;  %v644_v44 = vld [vmem:[%s7736_s0 + $0x1370] sm:$0xff]  ;;  %v638_v43 = vld [vmem:[%s7736_s0 + $0x1340] sm:$0xff] }
  0xa8   :  { %v1970_v35 = vadd.f32 %v1969_v19, %v4750_v0  ;;  %v1558_v60 = vmul.f32 %v3255_v26, %v632_v22  ;;  %v1559_v54 = vmul.f32 %v3257_v27, %v633_v18  ;;  %v1560_v58 = vmul.f32 %v3259_v28, %v634_v51  ;;  %v645_v51 = vld [vmem:[%s7736_s0 + $0x1378] sm:$0xff]  ;;  %v611_v19 = vld [vmem:[%s7736_s0 + $0x1268] sm:$0xff] }
  0xa9   :  { %v2008_v42 = vadd.f32 %v2007_v56, %v1121_v30  ;;  %v2486_v0 = vadd.f32 %v2485_v24, %v1556_v57  ;;  %v1533_v59 = vmul.f32 %v3232_v15, %v607_v17  ;;  %v2460_v3 = vadd.f32 %v2459_v37, %v1531_v4  ;;  %v640_v56 = vld [vmem:[%s7736_s0 + $0x1350] sm:$0xff] }
  0xaa   :  { %v1971_v63 = vadd.f32 %v1970_v35, %v4768_v55  ;;  %v1561_v30 = vmul.f32 %v3279_v38, %v635_v33  ;;  %v1534_v45 = vmul.f32 %v3234_v16, %v608_v34  ;;  %v1568_v57 = vmul.f32 %v3201_v1, %v642_v10  ;;  %v639_v55 = vld [vmem:[%s7736_s0 + $0x1348] sm:$0xff]  ;;  %v646_v34 = vld [vmem:[%s7736_s0 + $0x1380] sm:$0xff]  ;;  %v612_v10 = vld [vmem:[%s7736_s0 + $0x1270] sm:$0xff] }
  0xab   :  { %v2009_v8 = vadd.f32 %v2008_v42, %v1122_v36  ;;  %v2487_v22 = vadd.f32 %v2486_v0, %v1557_v32  ;;  %v2461_v18 = vadd.f32 %v2460_v3, %v1532_v11  ;;  %v1569_v47 = vmul.f32 %v3203_v2, %v643_v13 }
  0xac   :  { %v1972_v4 = vadd.f32 %v1971_v63, %v4771_v29  ;;  %v1562_v36 = vmul.f32 %v3281_v39, %v636_v62  ;;  %v4925_v6 = vmul.f32 %v3283_v40, %v637_v48  ;;  %v1535_v32 = vmul.f32 %v3245_v20, %v609_v49  ;;  %v641_v29 = vld [vmem:[%s7736_s0 + $0x1358] sm:$0xff]  ;;  %v614_v48 = vld [vmem:[%s7736_s0 + $0x1280] sm:$0xff]  ;;  %v647_v49 = vld [vmem:[%s7736_s0 + $0x1388] sm:$0xff] }
  0xad   :  { %v2010_v17 = vadd.f32 %v2009_v8, %v4827_v50  ;;  %v2488_v33 = vadd.f32 %v2487_v22, %v1558_v60  ;;  %v2462_v24 = vadd.f32 %v2461_v18, %v1533_v59  ;;  %v1570_v11 = vmul.f32 %v3211_v5, %v644_v44  ;;  %v613_v62 = vld [vmem:[%s7736_s0 + $0x1278] sm:$0xff]  ;;  %v223_v22 = vld [vmem:[%s7736_s0 + $0x648] sm:$0xff] }
  0xae   :  { %1973 = vadd.xlane.f32.xlu0 %v1972_v4  ;;  %v4943_v37 = vmul.f32 %v3285_v41, %v638_v43  ;;  %v4946_v50 = vmul.f32 %v3299_v46, %v639_v55  ;;  %v1536_v35 = vmul.f32 %v3247_v21, %v610_v61  ;;  %v1571_v60 = vmul.f32 %v3216_v7, %v645_v51  ;;  %v222_v61 = vld [vmem:[%s7736_s0 + $0x640] sm:$0xff]  ;;  %v648_v43 = vld [vmem:[%s7736_s0 + $0x1390] sm:$0xff] }
  0xaf   :  { %v2011_v13 = vadd.f32 %v2010_v17, %v4845_v31  ;;  %v2489_v42 = vadd.f32 %v2488_v33, %v1559_v54  ;;  %v2463_v0 = vadd.f32 %v2462_v24, %v1534_v45  ;;  %v2500_v59 = vadd.f32 %v1569_v47, %v1568_v57  ;;  %v615_v57 = vld [vmem:[%s7736_s0 + $0x1288] sm:$0xff]  ;;  %v224_v47 = vld [vmem:[%s7736_s0 + $0x650] sm:$0xff]  ;;  %v617_v17 = vld [vmem:[%s7736_s0 + $0x1298] sm:$0xff] }
  0xb0   :  { %v4964_v3 = vmul.f32 %v3309_v52, %v640_v56  ;;  %v4967_v31 = vmul.f32 %v3311_v53, %v641_v29  ;;  %v1537_v54 = vmul.f32 %v3253_v25, %v611_v19  ;;  %v1572_v63 = vmul.f32 %v3226_v12, %v646_v34  ;;  %v618_v56 = vld [vmem:[%s7736_s0 + $0x12a0] sm:$0xff] }
  0xb1   :  { %v2012_v45 = vadd.f32 %v2011_v13, %v4848_v14  ;;  %v2490_v44 = vadd.f32 %v2489_v42, %v1560_v58  ;;  %v2464_v8 = vadd.f32 %v2463_v0, %v1535_v32  ;;  %v2501_v55 = vadd.f32 %v2500_v59, %v1570_v11  ;;  %v616_v32 = vld [vmem:[%s7736_s0 + $0x1290] sm:$0xff] }
  0xb2   :  { %v1538_v18 = vmul.f32 %v3255_v26, %v612_v10  ;;  %v1539_v51 = vmul.f32 %v3257_v27, %v613_v62  ;;  %v1540_v14 = vmul.f32 %v3259_v28, %v614_v48  ;;  %v1573_v58 = vmul.f32 %v3232_v15, %v647_v49  ;;  %v225_v48 = vld [vmem:[%s7736_s0 + $0x658] sm:$0xff] }
  0xb3   :  { %v2013_v4 = vadd.f32 %v2012_v45, %v4866_v23  ;;  %v2491_v19 = vadd.f32 %v2490_v44, %v1561_v30  ;;  %v2465_v29 = vadd.f32 %v2464_v8, %v1536_v35  ;;  %v2502_v33 = vadd.f32 %v2501_v55, %v1571_v60  ;;  %v649_v23 = vld [vmem:[%s7736_s0 + $0x1398] sm:$0xff]  ;;  %v619_v35 = vld [vmem:[%s7736_s0 + $0x12a8] sm:$0xff]  ;;  %v620_v60 = vld [vmem:[%s7736_s0 + $0x12b0] sm:$0xff] }
  0xb4   :  { %v1541_v24 = vmul.f32 %v3279_v38, %v615_v57  ;;  %v1574_v30 = vmul.f32 %v3234_v16, %v648_v43  ;;  %v1148_v34 = vmul.f32 %v3201_v1, %v222_v61  ;;  %v1149_v11 = vmul.f32 %v3203_v2, %v223_v22  ;;  %v651_v45 = vld [vmem:[%s7736_s0 + $0x13a8] sm:$0xff]  ;;  %v226_v8 = vld [vmem:[%s7736_s0 + $0x660] sm:$0xff]  ;;  %v652_v55 = vld [vmem:[%s7736_s0 + $0x13b0] sm:$0xff] }
  0xb5   :  { %v2014_v10 = vadd.f32 %v2013_v4, %v4869_v9  ;;  %v2492_v13 = vadd.f32 %v2491_v19, %v1562_v36  ;;  %v2466_v42 = vadd.f32 %v2465_v29, %v1537_v54  ;;  %v2503_v62 = vadd.f32 %v2502_v33, %v1572_v63  ;;  %v650_v36 = vld [vmem:[%s7736_s0 + $0x13a0] sm:$0xff]  ;;  %v621_v63 = vld [vmem:[%s7736_s0 + $0x12b8] sm:$0xff] }
  0xb6   :  { %v1542_v0 = vmul.f32 %v3281_v39, %v616_v32  ;;  %v5020_v49 = vmul.f32 %v3283_v40, %v617_v17  ;;  %v5023_v9 = vmul.f32 %v3285_v41, %v618_v56  ;;  %v1150_v59 = vmul.f32 %v3211_v5, %v224_v47  ;;  %v653_v4 = vld [vmem:[%s7736_s0 + $0x13b8] sm:$0xff]  ;;  %v654_v19 = vld [vmem:[%s7736_s0 + $0x13c0] sm:$0xff]  ;;  %v227_v56 = vld [vmem:[%s7736_s0 + $0x668] sm:$0xff] }
  0xb7   :  { %2015 = vadd.xlane.f32.xlu1 %v2014_v10  ;;  %v2493_v54 = vadd.f32 %v2492_v13, %v4925_v6  ;;  %v2467_v61 = vadd.f32 %v2466_v42, %v1538_v18  ;;  %v1575_v44 = vmul.f32 %v3245_v20, %v649_v23  ;;  %v2504_v57 = vadd.f32 %v2503_v62, %v1573_v58  ;;  %v228_v13 = vld [vmem:[%s7736_s0 + $0x670] sm:$0xff] }
  0xb8   :  { %v5041_v43 = vmul.f32 %v3299_v46, %v619_v35  ;;  %v5044_v6 = vmul.f32 %v3309_v52, %v620_v60  ;;  %v1151_v22 = vmul.f32 %v3216_v7, %v225_v48  ;;  %v2038_v18 = vadd.f32 %v1149_v11, %v1148_v34  ;;  %v202_v35 = vld [vmem:[%s7736_s0 + $0x5a0] sm:$0xff]  ;;  %v203_v60 = vld [vmem:[%s7736_s0 + $0x5a8] sm:$0xff] }
  0xb9   :  { %v2494_v47 = vadd.f32 %v2493_v54, %v4943_v37  ;;  %v2468_v58 = vadd.f32 %v2467_v61, %v1539_v51  ;;  %v1576_v32 = vmul.f32 %v3247_v21, %v650_v36  ;;  %v2505_v17 = vadd.f32 %v2504_v57, %v1574_v30  ;;  %v655_v37 = vld [vmem:[%s7736_s0 + $0x13c8] sm:$0xff]  ;;  %v657_v54 = vld [vmem:[%s7736_s0 + $0x13d8] sm:$0xff] }
  0xba   :  { %v5062_v29 = vmul.f32 %v3311_v53, %v621_v63  ;;  %v1577_v51 = vmul.f32 %v3253_v25, %v651_v45  ;;  %v1152_v33 = vmul.f32 %v3226_v12, %v226_v8  ;;  %v2039_v23 = vadd.f32 %v2038_v18, %v1150_v59  ;;  %v229_v45 = vld [vmem:[%s7736_s0 + $0x678] sm:$0xff] }
  0xbb   :  { %v2495_v34 = vadd.f32 %v2494_v47, %v4946_v50  ;;  %v2469_v11 = vadd.f32 %v2468_v58, %v1540_v14  ;;  %v1578_v30 = vmul.f32 %v3255_v26, %v652_v55  ;;  %v2506_v10 = vadd.f32 %v2505_v17, %v1575_v44  ;;  %v656_v50 = vld [vmem:[%s7736_s0 + $0x13d0] sm:$0xff] }
  0xbc   :  { %v1579_v14 = vmul.f32 %v3257_v27, %v653_v4  ;;  %v1580_v42 = vmul.f32 %v3259_v28, %v654_v19  ;;  %v1153_v62 = vmul.f32 %v3232_v15, %v227_v56  ;;  %v2040_v48 = vadd.f32 %v2039_v23, %v1151_v22  ;;  %v204_v44 = vld [vmem:[%s7736_s0 + $0x5b0] sm:$0xff]  ;;  %v230_v19 = vld [vmem:[%s7736_s0 + $0x680] sm:$0xff] }
  0xbd   :  { %v2496_v36 = vadd.f32 %v2495_v34, %v4964_v3  ;;  %v2470_v59 = vadd.f32 %v2469_v11, %v1541_v24  ;;  %v1581_v63 = vmul.f32 %v3279_v38, %v655_v37  ;;  %v2507_v61 = vadd.f32 %v2506_v10, %v1576_v32  ;;  %v658_v3 = vld [vmem:[%s7736_s0 + $0x13e0] sm:$0xff]  ;;  %v659_v24 = vld [vmem:[%s7736_s0 + $0x13e8] sm:$0xff]  ;;  %v205_v32 = vld [vmem:[%s7736_s0 + $0x5b8] sm:$0xff] }
  0xbe   :  { %v1154_v57 = vmul.f32 %v3234_v16, %v228_v13  ;;  %v2041_v8 = vadd.f32 %v2040_v48, %v1152_v33  ;;  %v1128_v55 = vmul.f32 %v3201_v1, %v202_v35  ;;  %v1129_v22 = vmul.f32 %v3203_v2, %v203_v60  ;;  %v660_v17 = vld [vmem:[%s7736_s0 + $0x13f0] sm:$0xff]  ;;  %v231_v10 = vld [vmem:[%s7736_s0 + $0x688] sm:$0xff]  ;;  %v206_v13 = vld [vmem:[%s7736_s0 + $0x5c0] sm:$0xff] }
  0xbf   :  { %v2497_v18 = vadd.f32 %v2496_v36, %v4967_v31  ;;  %v2471_v47 = vadd.f32 %v2470_v59, %v1542_v0  ;;  %v1582_v58 = vmul.f32 %v3281_v39, %v656_v50  ;;  %v2508_v4 = vadd.f32 %v2507_v61, %v1577_v51  ;;  %v661_v31 = vld [vmem:[%s7736_s0 + $0x13f8] sm:$0xff]  ;;  %v232_v35 = vld [vmem:[%s7736_s0 + $0x690] sm:$0xff]  ;;  %v234_v61 = vld [vmem:[%s7736_s0 + $0x6a0] sm:$0xff] }
  0xc0   :  { %v5121_v0 = vmul.f32 %v3283_v40, %v657_v54  ;;  %v1155_v56 = vmul.f32 %v3245_v20, %v229_v45  ;;  %v2042_v37 = vadd.f32 %v2041_v8, %v1153_v62  ;;  %v1130_v51 = vmul.f32 %v3211_v5, %v204_v44  ;;  %v207_v45 = vld [vmem:[%s7736_s0 + $0x5c8] sm:$0xff] }
  0xc1   :  { %2498 = vadd.xlane.f32.xlu2 %v2497_v18  ;;  %v2472_v33 = vadd.f32 %v2471_v47, %v5020_v49  ;;  %v5127_v23 = vmul.f32 %v3285_v41, %v658_v3  ;;  %v5130_v34 = vmul.f32 %v3299_v46, %v659_v24  ;;  %v2509_v11 = vadd.f32 %v2508_v4, %v1578_v30  ;;  %v233_v49 = vld [vmem:[%s7736_s0 + $0x698] sm:$0xff]  ;;  %v235_v44 = vld [vmem:[%s7736_s0 + $0x6a8] sm:$0xff]  ;;  %v208_v24 = vld [vmem:[%s7736_s0 + $0x5d0] sm:$0xff] }
  0xc2   :  { %v1156_v60 = vmul.f32 %v3247_v21, %v230_v19  ;;  %v2043_v50 = vadd.f32 %v2042_v37, %v1154_v57  ;;  %v1131_v30 = vmul.f32 %v3216_v7, %v205_v32  ;;  %v2017_v62 = vadd.f32 %v1129_v22, %v1128_v55  ;;  %v242_v47 = vld [vmem:[%s7736_s0 + $0x6e0] sm:$0xff]  ;;  %v243_v4 = vld [vmem:[%s7736_s0 + $0x6e8] sm:$0xff]  ;;  %v236_v19 = vld [vmem:[%s7736_s0 + $0x6b0] sm:$0xff] }
  0xc3   :  { %v2473_v48 = vadd.f32 %v2472_v33, %v5023_v9  ;;  %v5148_v36 = vmul.f32 %v3309_v52, %v660_v17  ;;  %v5151_v59 = vmul.f32 %v3311_v53, %v661_v31  ;;  %v2510_v54 = vadd.f32 %v2509_v11, %v1579_v14  ;;  %v209_v33 = vld [vmem:[%s7736_s0 + $0x5d8] sm:$0xff] }
  0xc4   :  { %v1157_v9 = vmul.f32 %v3253_v25, %v231_v10  ;;  %v2044_v3 = vadd.f32 %v2043_v50, %v1155_v56  ;;  %v1132_v14 = vmul.f32 %v3226_v12, %v206_v13  ;;  %v2018_v57 = vadd.f32 %v2017_v62, %v1130_v51  ;;  %v244_v10 = vld [vmem:[%s7736_s0 + $0x6f0] sm:$0xff]  ;;  %v238_v13 = vld [vmem:[%s7736_s0 + $0x6c0] sm:$0xff] }
  0xc5   :  { %v2474_v8 = vadd.f32 %v2473_v48, %v5041_v43  ;;  %v2511_v55 = vadd.f32 %v2510_v54, %v1580_v42  ;;  %v1158_v22 = vmul.f32 %v3255_v26, %v232_v35  ;;  %v1159_v18 = vmul.f32 %v3257_v27, %v233_v49  ;;  %v237_v43 = vld [vmem:[%s7736_s0 + $0x6b8] sm:$0xff]  ;;  %v210_v35 = vld [vmem:[%s7736_s0 + $0x5e0] sm:$0xff] }
  0xc6   :  { %v1160_v42 = vmul.f32 %v3259_v28, %v234_v61  ;;  %v2045_v32 = vadd.f32 %v2044_v3, %v1156_v60  ;;  %v1133_v17 = vmul.f32 %v3232_v15, %v207_v45  ;;  %v2019_v31 = vadd.f32 %v2018_v57, %v1131_v30  ;;  %v245_v61 = vld [vmem:[%s7736_s0 + $0x6f8] sm:$0xff]  ;;  %v240_v45 = vld [vmem:[%s7736_s0 + $0x6d0] sm:$0xff] }
  0xc7   :  { %v2475_v56 = vadd.f32 %v2474_v8, %v5044_v6  ;;  %v2512_v37 = vadd.f32 %v2511_v55, %v1581_v63  ;;  %v1161_v51 = vmul.f32 %v3279_v38, %v235_v44  ;;  %v1134_v11 = vmul.f32 %v3234_v16, %v208_v24  ;;  %v239_v6 = vld [vmem:[%s7736_s0 + $0x6c8] sm:$0xff]  ;;  %v241_v44 = vld [vmem:[%s7736_s0 + $0x6d8] sm:$0xff] }
  0xc8   :  { %v2046_v63 = vadd.f32 %v2045_v32, %v1157_v9  ;;  %v2020_v49 = vadd.f32 %v2019_v31, %v1132_v14  ;;  %v1168_v60 = vmul.f32 %v3201_v1, %v242_v47  ;;  %v1169_v50 = vmul.f32 %v3203_v2, %v243_v4  ;;  %v212_v4 = vld [vmem:[%s7736_s0 + $0x5f0] sm:$0xff] }
  0xc9   :  { %v2476_v30 = vadd.f32 %v2475_v56, %v5062_v29  ;;  %v2513_v62 = vadd.f32 %v2512_v37, %v1582_v58  ;;  %v1162_v48 = vmul.f32 %v3281_v39, %v236_v19  ;;  %v5207_v54 = vmul.f32 %v3283_v40, %v237_v43  ;;  %v211_v29 = vld [vmem:[%s7736_s0 + $0x5e8] sm:$0xff]  ;;  %v214_v19 = vld [vmem:[%s7736_s0 + $0x600] sm:$0xff] }
  0xca   :  { %v2047_v9 = vadd.f32 %v2046_v63, %v1158_v22  ;;  %v1135_v58 = vmul.f32 %v3245_v20, %v209_v33  ;;  %v2021_v3 = vadd.f32 %v2020_v49, %v1133_v17  ;;  %v1170_v24 = vmul.f32 %v3211_v5, %v244_v10  ;;  %v246_v22 = vld [vmem:[%s7736_s0 + $0x700] sm:$0xff]  ;;  %v247_v33 = vld [vmem:[%s7736_s0 + $0x708] sm:$0xff] }
  0xcb   :  { %2477 = vadd.xlane.f32.xlu0 %v2476_v30  ;;  %v2514_v14 = vadd.f32 %v2513_v62, %v5121_v0  ;;  %v5225_v57 = vmul.f32 %v3285_v41, %v238_v13  ;;  %v5228_v8 = vmul.f32 %v3299_v46, %v239_v6  ;;  %v1136_v55 = vmul.f32 %v3247_v21, %v210_v35  ;;  %v213_v0 = vld [vmem:[%s7736_s0 + $0x5f8] sm:$0xff]  ;;  %v682_v35 = vld [vmem:[%s7736_s0 + $0x14a0] sm:$0xff]  ;;  %v683_v30 = vld [vmem:[%s7736_s0 + $0x14a8] sm:$0xff] }
  0xcc   :  { %v2048_v47 = vadd.f32 %v2047_v9, %v1159_v18  ;;  %v2022_v43 = vadd.f32 %v2021_v3, %v1134_v11  ;;  %v1171_v32 = vmul.f32 %v3216_v7, %v245_v61  ;;  %v2059_v17 = vadd.f32 %v1169_v50, %v1168_v60  ;;  %v215_v11 = vld [vmem:[%s7736_s0 + $0x608] sm:$0xff]  ;;  %v216_v61 = vld [vmem:[%s7736_s0 + $0x610] sm:$0xff] }
  0xcd   :  { %v2515_v31 = vadd.f32 %v2514_v14, %v5127_v23  ;;  %v5246_v18 = vmul.f32 %v3309_v52, %v240_v45  ;;  %v5249_v56 = vmul.f32 %v3311_v53, %v241_v44  ;;  %v1137_v37 = vmul.f32 %v3253_v25, %v211_v29  ;;  %v248_v23 = vld [vmem:[%s7736_s0 + $0x710] sm:$0xff]  ;;  %v217_v45 = vld [vmem:[%s7736_s0 + $0x618] sm:$0xff] }
  0xce   :  { %v2049_v10 = vadd.f32 %v2048_v47, %v1160_v42  ;;  %v2023_v13 = vadd.f32 %v2022_v43, %v1135_v58  ;;  %v1172_v6 = vmul.f32 %v3226_v12, %v246_v22  ;;  %v2060_v63 = vadd.f32 %v2059_v17, %v1170_v24  ;;  %v249_v44 = vld [vmem:[%s7736_s0 + $0x718] sm:$0xff]  ;;  %v684_v24 = vld [vmem:[%s7736_s0 + $0x14b0] sm:$0xff]  ;;  %v218_v47 = vld [vmem:[%s7736_s0 + $0x620] sm:$0xff] }
  0xcf   :  { %v2516_v49 = vadd.f32 %v2515_v31, %v5130_v34  ;;  %v1138_v42 = vmul.f32 %v3255_v26, %v212_v4  ;;  %v1139_v60 = vmul.f32 %v3257_v27, %v213_v0  ;;  %v1140_v50 = vmul.f32 %v3259_v28, %v214_v19  ;;  %v685_v14 = vld [vmem:[%s7736_s0 + $0x14b8] sm:$0xff]  ;;  %v250_v0 = vld [vmem:[%s7736_s0 + $0x720] sm:$0xff] }
  0xd0   :  { %v2050_v62 = vadd.f32 %v2049_v10, %v1161_v51  ;;  %v2024_v34 = vadd.f32 %v2023_v13, %v1136_v55  ;;  %v1173_v9 = vmul.f32 %v3232_v15, %v247_v33  ;;  %v2061_v29 = vadd.f32 %v2060_v63, %v1171_v32  ;;  %v220_v10 = vld [vmem:[%s7736_s0 + $0x630] sm:$0xff]  ;;  %v251_v13 = vld [vmem:[%s7736_s0 + $0x728] sm:$0xff] }
  0xd1   :  { %v2517_v58 = vadd.f32 %v2516_v49, %v5148_v36  ;;  %v1141_v51 = vmul.f32 %v3279_v38, %v215_v11  ;;  %v1174_v3 = vmul.f32 %v3234_v16, %v248_v23  ;;  %v1608_v55 = vmul.f32 %v3201_v1, %v682_v35  ;;  %v219_v36 = vld [vmem:[%s7736_s0 + $0x628] sm:$0xff] }
  0xd2   :  { %v2051_v22 = vadd.f32 %v2050_v62, %v1162_v48  ;;  %v2025_v4 = vadd.f32 %v2024_v34, %v1137_v37  ;;  %v2062_v19 = vadd.f32 %v2061_v29, %v1172_v6  ;;  %v1609_v43 = vmul.f32 %v3203_v2, %v683_v30  ;;  %v686_v37 = vld [vmem:[%s7736_s0 + $0x14c0] sm:$0xff]  ;;  %v687_v49 = vld [vmem:[%s7736_s0 + $0x14c8] sm:$0xff] }
  0xd3   :  { %v2518_v32 = vadd.f32 %v2517_v58, %v5151_v59  ;;  %v1142_v48 = vmul.f32 %v3281_v39, %v216_v61  ;;  %v5305_v17 = vmul.f32 %v3283_v40, %v217_v45  ;;  %v1175_v31 = vmul.f32 %v3245_v20, %v249_v44  ;;  %v221_v59 = vld [vmem:[%s7736_s0 + $0x638] sm:$0xff]  ;;  %v252_v61 = vld [vmem:[%s7736_s0 + $0x730] sm:$0xff]  ;;  %v254_v34 = vld [vmem:[%s7736_s0 + $0x740] sm:$0xff] }
  0xd4   :  { %v2052_v33 = vadd.f32 %v2051_v22, %v5207_v54  ;;  %v2026_v11 = vadd.f32 %v2025_v4, %v1138_v42  ;;  %v2063_v23 = vadd.f32 %v2062_v19, %v1173_v9  ;;  %v1610_v6 = vmul.f32 %v3211_v5, %v684_v24  ;;  %v253_v45 = vld [vmem:[%s7736_s0 + $0x738] sm:$0xff]  ;;  %v688_v58 = vld [vmem:[%s7736_s0 + $0x14d0] sm:$0xff]  ;;  %v663_v4 = vld [vmem:[%s7736_s0 + $0x1408] sm:$0xff] }
  0xd5   :  { %2519 = vadd.xlane.f32.xlu1 %v2518_v32  ;;  %v5323_v63 = vmul.f32 %v3285_v41, %v218_v47  ;;  %v5326_v54 = vmul.f32 %v3299_v46, %v219_v36  ;;  %v1176_v35 = vmul.f32 %v3247_v21, %v250_v0  ;;  %v1611_v42 = vmul.f32 %v3216_v7, %v685_v14  ;;  %v662_v36 = vld [vmem:[%s7736_s0 + $0x1400] sm:$0xff] }
  0xd6   :  { %v2053_v30 = vadd.f32 %v2052_v33, %v5225_v57  ;;  %v2027_v62 = vadd.f32 %v2026_v11, %v1139_v60  ;;  %v2064_v44 = vadd.f32 %v2063_v23, %v1174_v3  ;;  %v2542_v9 = vadd.f32 %v1609_v43, %v1608_v55  ;;  %v255_v3 = vld [vmem:[%s7736_s0 + $0x748] sm:$0xff]  ;;  %v664_v43 = vld [vmem:[%s7736_s0 + $0x1410] sm:$0xff]  ;;  %v257_v33 = vld [vmem:[%s7736_s0 + $0x758] sm:$0xff] }
  0xd7   :  { %v5344_v29 = vmul.f32 %v3309_v52, %v220_v10  ;;  %v5347_v57 = vmul.f32 %v3311_v53, %v221_v59  ;;  %v1177_v60 = vmul.f32 %v3253_v25, %v251_v13  ;;  %v1612_v24 = vmul.f32 %v3226_v12, %v686_v37  ;;  %v256_v37 = vld [vmem:[%s7736_s0 + $0x750] sm:$0xff]  ;;  %v258_v10 = vld [vmem:[%s7736_s0 + $0x760] sm:$0xff] }
  0xd8   :  { %v2054_v14 = vadd.f32 %v2053_v30, %v5228_v8  ;;  %v2028_v22 = vadd.f32 %v2027_v62, %v1140_v50  ;;  %v2065_v55 = vadd.f32 %v2064_v44, %v1175_v31  ;;  %v2543_v47 = vadd.f32 %v2542_v9, %v1610_v6 }
  0xd9   :  { %v1178_v0 = vmul.f32 %v3255_v26, %v252_v61  ;;  %v1179_v19 = vmul.f32 %v3257_v27, %v253_v45  ;;  %v1180_v8 = vmul.f32 %v3259_v28, %v254_v34  ;;  %v1613_v50 = vmul.f32 %v3232_v15, %v687_v49  ;;  %v665_v45 = vld [vmem:[%s7736_s0 + $0x1418] sm:$0xff] }
  0xda   :  { %v2055_v32 = vadd.f32 %v2054_v14, %v5246_v18  ;;  %v2029_v31 = vadd.f32 %v2028_v22, %v1141_v51  ;;  %v2066_v59 = vadd.f32 %v2065_v55, %v1176_v35  ;;  %v2544_v11 = vadd.f32 %v2543_v47, %v1611_v42  ;;  %v689_v18 = vld [vmem:[%s7736_s0 + $0x14d8] sm:$0xff]  ;;  %v259_v35 = vld [vmem:[%s7736_s0 + $0x768] sm:$0xff]  ;;  %v260_v42 = vld [vmem:[%s7736_s0 + $0x770] sm:$0xff] }
  0xdb   :  { %v1181_v13 = vmul.f32 %v3279_v38, %v255_v3  ;;  %v1614_v51 = vmul.f32 %v3234_v16, %v688_v58  ;;  %v1588_v23 = vmul.f32 %v3201_v1, %v662_v36  ;;  %v1589_v6 = vmul.f32 %v3203_v2, %v663_v4  ;;  %v261_v58 = vld [vmem:[%s7736_s0 + $0x778] sm:$0xff]  ;;  %v691_v14 = vld [vmem:[%s7736_s0 + $0x14e8] sm:$0xff]  ;;  %v666_v55 = vld [vmem:[%s7736_s0 + $0x1420] sm:$0xff] }
  0xdc   :  { %v2056_v49 = vadd.f32 %v2055_v32, %v5249_v56  ;;  %v2030_v30 = vadd.f32 %v2029_v31, %v1142_v48  ;;  %v2067_v62 = vadd.f32 %v2066_v59, %v1177_v60  ;;  %v2545_v61 = vadd.f32 %v2544_v11, %v1612_v24  ;;  %v690_v48 = vld [vmem:[%s7736_s0 + $0x14e0] sm:$0xff]  ;;  %v692_v36 = vld [vmem:[%s7736_s0 + $0x14f0] sm:$0xff]  ;;  %v693_v32 = vld [vmem:[%s7736_s0 + $0x14f8] sm:$0xff] }
  0xdd   :  { %v1182_v34 = vmul.f32 %v3281_v39, %v256_v37  ;;  %v5400_v44 = vmul.f32 %v3283_v40, %v257_v33  ;;  %v5403_v56 = vmul.f32 %v3285_v41, %v258_v10  ;;  %v1590_v9 = vmul.f32 %v3211_v5, %v664_v43  ;;  %v694_v31 = vld [vmem:[%s7736_s0 + $0x1500] sm:$0xff]  ;;  %v667_v10 = vld [vmem:[%s7736_s0 + $0x1428] sm:$0xff] }
  0xde   :  { %2057 = vadd.xlane.f32.xlu2 %v2056_v49  ;;  %v2031_v60 = vadd.f32 %v2030_v30, %v5305_v17  ;;  %v2068_v24 = vadd.f32 %v2067_v62, %v1178_v0  ;;  %v1615_v22 = vmul.f32 %v3245_v20, %v689_v18  ;;  %v2546_v3 = vadd.f32 %v2545_v61, %v1613_v50  ;;  %v668_v30 = vld [vmem:[%s7736_s0 + $0x1430] sm:$0xff] }
  0xdf   :  { %v5421_v47 = vmul.f32 %v3299_v46, %v259_v35  ;;  %v5424_v17 = vmul.f32 %v3309_v52, %v260_v42  ;;  %v1591_v4 = vmul.f32 %v3216_v7, %v665_v45  ;;  %v2521_v0 = vadd.f32 %v1589_v6, %v1588_v23  ;;  %v702_v35 = vld [vmem:[%s7736_s0 + $0x1540] sm:$0xff]  ;;  %v703_v42 = vld [vmem:[%s7736_s0 + $0x1548] sm:$0xff] }
  0xe0   :  { %v2032_v43 = vadd.f32 %v2031_v60, %v5323_v63  ;;  %v2069_v50 = vadd.f32 %v2068_v24, %v1179_v19  ;;  %v1616_v37 = vmul.f32 %v3247_v21, %v690_v48  ;;  %v2547_v33 = vadd.f32 %v2546_v3, %v1614_v51  ;;  %v695_v63 = vld [vmem:[%s7736_s0 + $0x1508] sm:$0xff]  ;;  %v697_v60 = vld [vmem:[%s7736_s0 + $0x1518] sm:$0xff] }
  0xe1   :  { %v5442_v59 = vmul.f32 %v3311_v53, %v261_v58  ;;  %v1617_v19 = vmul.f32 %v3253_v25, %v691_v14  ;;  %v1592_v11 = vmul.f32 %v3226_v12, %v666_v55  ;;  %v2522_v18 = vadd.f32 %v2521_v0, %v1590_v9  ;;  %v669_v14 = vld [vmem:[%s7736_s0 + $0x1438] sm:$0xff] }
  0xe2   :  { %v2033_v23 = vadd.f32 %v2032_v43, %v5326_v54  ;;  %v2070_v6 = vadd.f32 %v2069_v50, %v1180_v8  ;;  %v1618_v51 = vmul.f32 %v3255_v26, %v692_v36  ;;  %v2548_v49 = vadd.f32 %v2547_v33, %v1615_v22  ;;  %v696_v54 = vld [vmem:[%s7736_s0 + $0x1510] sm:$0xff] }
  0xe3   :  { %v1619_v8 = vmul.f32 %v3257_v27, %v693_v32  ;;  %v1620_v62 = vmul.f32 %v3259_v28, %v694_v31  ;;  %v1593_v61 = vmul.f32 %v3232_v15, %v667_v10  ;;  %v2523_v45 = vadd.f32 %v2522_v18, %v1591_v4  ;;  %v704_v22 = vld [vmem:[%s7736_s0 + $0x1550] sm:$0xff]  ;;  %v670_v31 = vld [vmem:[%s7736_s0 + $0x1440] sm:$0xff] }
  0xe4   :  { %v2034_v48 = vadd.f32 %v2033_v23, %v5344_v29  ;;  %v2071_v9 = vadd.f32 %v2070_v6, %v1181_v13  ;;  %v1621_v58 = vmul.f32 %v3279_v38, %v695_v63  ;;  %v2549_v24 = vadd.f32 %v2548_v49, %v1616_v37  ;;  %v698_v29 = vld [vmem:[%s7736_s0 + $0x1520] sm:$0xff]  ;;  %v699_v13 = vld [vmem:[%s7736_s0 + $0x1528] sm:$0xff]  ;;  %v705_v37 = vld [vmem:[%s7736_s0 + $0x1558] sm:$0xff] }
  0xe5   :  { %v1594_v3 = vmul.f32 %v3234_v16, %v668_v30  ;;  %v2524_v55 = vadd.f32 %v2523_v45, %v1592_v11  ;;  %v1628_v36 = vmul.f32 %v3201_v1, %v702_v35  ;;  %v1629_v4 = vmul.f32 %v3203_v2, %v703_v42  ;;  %v700_v33 = vld [vmem:[%s7736_s0 + $0x1530] sm:$0xff]  ;;  %v671_v49 = vld [vmem:[%s7736_s0 + $0x1448] sm:$0xff]  ;;  %v706_v30 = vld [vmem:[%s7736_s0 + $0x1560] sm:$0xff] }
  0xe6   :  { %v2035_v0 = vadd.f32 %v2034_v48, %v5347_v57  ;;  %v2072_v43 = vadd.f32 %v2071_v9, %v1182_v34  ;;  %v1622_v50 = vmul.f32 %v3281_v39, %v696_v54  ;;  %v2550_v32 = vadd.f32 %v2549_v24, %v1617_v19  ;;  %v701_v57 = vld [vmem:[%s7736_s0 + $0x1538] sm:$0xff]  ;;  %v672_v35 = vld [vmem:[%s7736_s0 + $0x1450] sm:$0xff]  ;;  %v674_v24 = vld [vmem:[%s7736_s0 + $0x1460] sm:$0xff] }
  0xe7   :  { %v5501_v34 = vmul.f32 %v3283_v40, %v697_v60  ;;  %v1595_v10 = vmul.f32 %v3245_v20, %v669_v14  ;;  %v2525_v63 = vadd.f32 %v2524_v55, %v1593_v61  ;;  %v1630_v19 = vmul.f32 %v3211_v5, %v704_v22  ;;  %v707_v14 = vld [vmem:[%s7736_s0 + $0x1568] sm:$0xff] }
  0xe8   :  { %2036 = vadd.xlane.f32.xlu0 %v2035_v0  ;;  %v2073_v11 = vadd.f32 %v2072_v43, %v5400_v44  ;;  %v5507_v18 = vmul.f32 %v3285_v41, %v698_v29  ;;  %v5510_v23 = vmul.f32 %v3299_v46, %v699_v13  ;;  %v2551_v6 = vadd.f32 %v2550_v32, %v1618_v51  ;;  %v673_v44 = vld [vmem:[%s7736_s0 + $0x1458] sm:$0xff]  ;;  %v675_v22 = vld [vmem:[%s7736_s0 + $0x1468] sm:$0xff]  ;;  %v708_v13 = vld [vmem:[%s7736_s0 + $0x1570] sm:$0xff] }
  0xe9   :  { %v1596_v42 = vmul.f32 %v3247_v21, %v670_v31  ;;  %v2526_v54 = vadd.f32 %v2525_v63, %v1594_v3  ;;  %v1631_v51 = vmul.f32 %v3216_v7, %v705_v37  ;;  %v2563_v61 = vadd.f32 %v1629_v4, %v1628_v36  ;;  %v282_v43 = vld [vmem:[%s7736_s0 + $0x820] sm:$0xff]  ;;  %v283_v32 = vld [vmem:[%s7736_s0 + $0x828] sm:$0xff]  ;;  %v676_v31 = vld [vmem:[%s7736_s0 + $0x1470] sm:$0xff] }
  0xea   :  { %v2074_v45 = vadd.f32 %v2073_v11, %v5403_v56  ;;  %v5528_v48 = vmul.f32 %v3309_v52, %v700_v33  ;;  %v5531_v9 = vmul.f32 %v3311_v53, %v701_v57  ;;  %v2552_v60 = vadd.f32 %v2551_v6, %v1619_v8  ;;  %v709_v11 = vld [vmem:[%s7736_s0 + $0x1578] sm:$0xff] }
  0xeb   :  { %v1597_v56 = vmul.f32 %v3253_v25, %v671_v49  ;;  %v2527_v29 = vadd.f32 %v2526_v54, %v1595_v10  ;;  %v1632_v8 = vmul.f32 %v3226_v12, %v706_v30  ;;  %v2564_v3 = vadd.f32 %v2563_v61, %v1630_v19  ;;  %v284_v49 = vld [vmem:[%s7736_s0 + $0x830] sm:$0xff]  ;;  %v678_v30 = vld [vmem:[%s7736_s0 + $0x1480] sm:$0xff] }
  0xec   :  { %v2075_v55 = vadd.f32 %v2074_v45, %v5421_v47  ;;  %v2553_v36 = vadd.f32 %v2552_v60, %v1620_v62  ;;  %v1598_v4 = vmul.f32 %v3255_v26, %v672_v35  ;;  %v1599_v0 = vmul.f32 %v3257_v27, %v673_v44  ;;  %v677_v47 = vld [vmem:[%s7736_s0 + $0x1478] sm:$0xff]  ;;  %v710_v35 = vld [vmem:[%s7736_s0 + $0x1580] sm:$0xff] }
  0xed   :  { %v1600_v62 = vmul.f32 %v3259_v28, %v674_v24  ;;  %v2528_v37 = vadd.f32 %v2527_v29, %v1596_v42  ;;  %v1633_v33 = vmul.f32 %v3232_v15, %v707_v14  ;;  %v2565_v57 = vadd.f32 %v2564_v3, %v1631_v51  ;;  %v285_v24 = vld [vmem:[%s7736_s0 + $0x838] sm:$0xff]  ;;  %v680_v14 = vld [vmem:[%s7736_s0 + $0x1490] sm:$0xff] }
  0xee   :  { %v2076_v10 = vadd.f32 %v2075_v55, %v5424_v17  ;;  %v2554_v63 = vadd.f32 %v2553_v36, %v1621_v58  ;;  %v1601_v19 = vmul.f32 %v3279_v38, %v675_v22  ;;  %v1634_v6 = vmul.f32 %v3234_v16, %v708_v13  ;;  %v679_v17 = vld [vmem:[%s7736_s0 + $0x1488] sm:$0xff]  ;;  %v681_v22 = vld [vmem:[%s7736_s0 + $0x1498] sm:$0xff] }
  0xef   :  { %v2529_v58 = vadd.f32 %v2528_v37, %v1597_v56  ;;  %v2566_v44 = vadd.f32 %v2565_v57, %v1632_v8  ;;  %v1208_v42 = vmul.f32 %v3201_v1, %v282_v43  ;;  %v1209_v54 = vmul.f32 %v3203_v2, %v283_v32  ;;  %v712_v32 = vld [vmem:[%s7736_s0 + $0x1590] sm:$0xff] }
  0xf0   :  { %v2077_v51 = vadd.f32 %v2076_v10, %v5442_v59  ;;  %v2555_v61 = vadd.f32 %v2554_v63, %v1622_v50  ;;  %v1602_v45 = vmul.f32 %v3281_v39, %v676_v31  ;;  %v5587_v60 = vmul.f32 %v3283_v40, %v677_v47  ;;  %v711_v59 = vld [vmem:[%s7736_s0 + $0x1588] sm:$0xff]  ;;  %v714_v31 = vld [vmem:[%s7736_s0 + $0x15a0] sm:$0xff] }
  0xf1   :  { %v2530_v56 = vadd.f32 %v2529_v58, %v1598_v4  ;;  %v1635_v50 = vmul.f32 %v3245_v20, %v709_v11  ;;  %v2567_v29 = vadd.f32 %v2566_v44, %v1633_v33  ;;  %v1210_v13 = vmul.f32 %v3211_v5, %v284_v49  ;;  %v286_v4 = vld [vmem:[%s7736_s0 + $0x840] sm:$0xff]  ;;  %v287_v11 = vld [vmem:[%s7736_s0 + $0x848] sm:$0xff] }
  0xf2   :  { %2078 = vadd.xlane.f32.xlu1 %v2077_v51  ;;  %v2556_v8 = vadd.f32 %v2555_v61, %v5501_v34  ;;  %v5605_v3 = vmul.f32 %v3285_v41, %v678_v30  ;;  %v5608_v55 = vmul.f32 %v3299_v46, %v679_v17  ;;  %v1636_v36 = vmul.f32 %v3247_v21, %v710_v35  ;;  %v713_v34 = vld [vmem:[%s7736_s0 + $0x1598] sm:$0xff]  ;;  %v262_v35 = vld [vmem:[%s7736_s0 + $0x780] sm:$0xff]  ;;  %v263_v51 = vld [vmem:[%s7736_s0 + $0x788] sm:$0xff] }
  0xf3   :  { %v2531_v43 = vadd.f32 %v2530_v56, %v1599_v0  ;;  %v2568_v47 = vadd.f32 %v2567_v29, %v1634_v6  ;;  %v1211_v37 = vmul.f32 %v3216_v7, %v285_v24  ;;  %v2101_v33 = vadd.f32 %v1209_v54, %v1208_v42  ;;  %v715_v6 = vld [vmem:[%s7736_s0 + $0x15a8] sm:$0xff]  ;;  %v716_v24 = vld [vmem:[%s7736_s0 + $0x15b0] sm:$0xff]  ;;  %v290_v29 = vld [vmem:[%s7736_s0 + $0x860] sm:$0xff] }
  0xf4   :  { %v2557_v57 = vadd.f32 %v2556_v8, %v5507_v18  ;;  %v5626_v0 = vmul.f32 %v3309_v52, %v680_v14  ;;  %v5629_v10 = vmul.f32 %v3311_v53, %v681_v22  ;;  %v1637_v63 = vmul.f32 %v3253_v25, %v711_v59  ;;  %v288_v18 = vld [vmem:[%s7736_s0 + $0x850] sm:$0xff]  ;;  %v717_v14 = vld [vmem:[%s7736_s0 + $0x15b8] sm:$0xff] }
  0xf5   :  { %v2532_v49 = vadd.f32 %v2531_v43, %v1600_v62  ;;  %v2569_v30 = vadd.f32 %v2568_v47, %v1635_v50  ;;  %v1212_v17 = vmul.f32 %v3226_v12, %v286_v4  ;;  %v2102_v58 = vadd.f32 %v2101_v33, %v1210_v13  ;;  %v289_v22 = vld [vmem:[%s7736_s0 + $0x858] sm:$0xff]  ;;  %v264_v8 = vld [vmem:[%s7736_s0 + $0x790] sm:$0xff]  ;;  %v718_v43 = vld [vmem:[%s7736_s0 + $0x15c0] sm:$0xff] }
  0xf6   :  { %v2558_v44 = vadd.f32 %v2557_v57, %v5510_v23  ;;  %v1638_v62 = vmul.f32 %v3255_v26, %v712_v32  ;;  %v1639_v42 = vmul.f32 %v3257_v27, %v713_v34  ;;  %v1640_v54 = vmul.f32 %v3259_v28, %v714_v31  ;;  %v265_v31 = vld [vmem:[%s7736_s0 + $0x798] sm:$0xff]  ;;  %v291_v57 = vld [vmem:[%s7736_s0 + $0x868] sm:$0xff] }
  0xf7   :  { %v2533_v61 = vadd.f32 %v2532_v49, %v1601_v19  ;;  %v2570_v23 = vadd.f32 %v2569_v30, %v1636_v36  ;;  %v1213_v56 = vmul.f32 %v3232_v15, %v287_v11  ;;  %v2103_v59 = vadd.f32 %v2102_v58, %v1211_v37  ;;  %v720_v49 = vld [vmem:[%s7736_s0 + $0x15d0] sm:$0xff] }
  0xf8   :  { %v2559_v50 = vadd.f32 %v2558_v44, %v5528_v48  ;;  %v1641_v19 = vmul.f32 %v3279_v38, %v715_v6  ;;  %v1214_v13 = vmul.f32 %v3234_v16, %v288_v18  ;;  %v1188_v36 = vmul.f32 %v3201_v1, %v262_v35  ;;  %v719_v48 = vld [vmem:[%s7736_s0 + $0x15c8] sm:$0xff]  ;;  %v266_v18 = vld [vmem:[%s7736_s0 + $0x7a0] sm:$0xff]  ;;  %v292_v35 = vld [vmem:[%s7736_s0 + $0x870] sm:$0xff] }
  0xf9   :  { %v2534_v4 = vadd.f32 %v2533_v61, %v1602_v45  ;;  %v2571_v32 = vadd.f32 %v2570_v23, %v1637_v63  ;;  %v2104_v34 = vadd.f32 %v2103_v59, %v1212_v17  ;;  %v1189_v47 = vmul.f32 %v3203_v2, %v263_v51 }
  0xfa   :  { %v2560_v37 = vadd.f32 %v2559_v50, %v5531_v9  ;;  %v1642_v45 = vmul.f32 %v3281_v39, %v716_v24  ;;  %v5685_v33 = vmul.f32 %v3283_v40, %v717_v14  ;;  %v1215_v63 = vmul.f32 %v3245_v20, %v289_v22  ;;  %v721_v9 = vld [vmem:[%s7736_s0 + $0x15d8] sm:$0xff]  ;;  %v294_v14 = vld [vmem:[%s7736_s0 + $0x880] sm:$0xff]  ;;  %v267_v22 = vld [vmem:[%s7736_s0 + $0x7a8] sm:$0xff] }
  0xfb   :  { %v2535_v11 = vadd.f32 %v2534_v4, %v5587_v60  ;;  %v2572_v6 = vadd.f32 %v2571_v32, %v1638_v62  ;;  %v2105_v30 = vadd.f32 %v2104_v34, %v1213_v56  ;;  %v1190_v17 = vmul.f32 %v3211_v5, %v264_v8  ;;  %v293_v24 = vld [vmem:[%s7736_s0 + $0x878] sm:$0xff]  ;;  %v268_v50 = vld [vmem:[%s7736_s0 + $0x7b0] sm:$0xff]  ;;  %v363_v32 = vld [vmem:[%s7736_s0 + $0xaa8] sm:$0xff] }
  0xfc   :  { %2561 = vadd.xlane.f32.xlu2 %v2560_v37  ;;  %v5703_v58 = vmul.f32 %v3285_v41, %v718_v43  ;;  %v5706_v60 = vmul.f32 %v3299_v46, %v719_v48  ;;  %v1216_v44 = vmul.f32 %v3247_v21, %v290_v29  ;;  %v1191_v62 = vmul.f32 %v3216_v7, %v265_v31  ;;  %v362_v48 = vld [vmem:[%s7736_s0 + $0xaa0] sm:$0xff]  ;;  %v296_v34 = vld [vmem:[%s7736_s0 + $0x890] sm:$0xff] }
  0xfd   :  { %v2536_v51 = vadd.f32 %v2535_v11, %v5605_v3  ;;  %v2573_v61 = vadd.f32 %v2572_v6, %v1639_v42  ;;  %v2106_v23 = vadd.f32 %v2105_v30, %v1214_v13  ;;  %v2080_v56 = vadd.f32 %v1189_v47, %v1188_v36  ;;  %v295_v36 = vld [vmem:[%s7736_s0 + $0x888] sm:$0xff]  ;;  %v298_v11 = vld [vmem:[%s7736_s0 + $0x8a0] sm:$0xff]  ;;  %v364_v6 = vld [vmem:[%s7736_s0 + $0xab0] sm:$0xff] }
  0xfe   :  { %v5724_v59 = vmul.f32 %v3309_v52, %v720_v49  ;;  %v5727_v3 = vmul.f32 %v3311_v53, %v721_v9  ;;  %v1217_v42 = vmul.f32 %v3253_v25, %v291_v57  ;;  %v1192_v29 = vmul.f32 %v3226_v12, %v266_v18 }
  0xff   :  { %v2537_v13 = vadd.f32 %v2536_v51, %v5608_v55  ;;  %v2574_v8 = vadd.f32 %v2573_v61, %v1640_v54  ;;  %v2107_v4 = vadd.f32 %v2106_v23, %v1215_v63  ;;  %v2081_v43 = vadd.f32 %v2080_v56, %v1190_v17  ;;  %v297_v63 = vld [vmem:[%s7736_s0 + $0x898] sm:$0xff]  ;;  %v300_v51 = vld [vmem:[%s7736_s0 + $0x8b0] sm:$0xff] }
 0x100   :  { %v1218_v55 = vmul.f32 %v3255_v26, %v292_v35  ;;  %v1219_v54 = vmul.f32 %v3257_v27, %v293_v24  ;;  %v1220_v31 = vmul.f32 %v3259_v28, %v294_v14  ;;  %v1193_v47 = vmul.f32 %v3232_v15, %v267_v22  ;;  %v365_v14 = vld [vmem:[%s7736_s0 + $0xab8] sm:$0xff] }
 0x101   :  { %v2538_v37 = vadd.f32 %v2537_v13, %v5626_v0  ;;  %v2575_v57 = vadd.f32 %v2574_v8, %v1641_v19  ;;  %v2108_v49 = vadd.f32 %v2107_v4, %v1216_v44  ;;  %v2082_v9 = vadd.f32 %v2081_v43, %v1191_v62  ;;  %v269_v0 = vld [vmem:[%s7736_s0 + $0x7b8] sm:$0xff]  ;;  %v299_v62 = vld [vmem:[%s7736_s0 + $0x8a8] sm:$0xff]  ;;  %v366_v4 = vld [vmem:[%s7736_s0 + $0xac0] sm:$0xff] }
 0x102   :  { %v1221_v30 = vmul.f32 %v3279_v38, %v295_v36  ;;  %v1194_v19 = vmul.f32 %v3234_v16, %v268_v50  ;;  %v1288_v18 = vmul.f32 %v3201_v1, %v362_v48  ;;  %v1289_v17 = vmul.f32 %v3203_v2, %v363_v32  ;;  %v301_v50 = vld [vmem:[%s7736_s0 + $0x8b8] sm:$0xff]  ;;  %v271_v13 = vld [vmem:[%s7736_s0 + $0x7c8] sm:$0xff]  ;;  %v272_v48 = vld [vmem:[%s7736_s0 + $0x7d0] sm:$0xff] }
 0x103   :  { %v2539_v35 = vadd.f32 %v2538_v37, %v5629_v10  ;;  %v2576_v44 = vadd.f32 %v2575_v57, %v1642_v45  ;;  %v2109_v61 = vadd.f32 %v2108_v49, %v1217_v42  ;;  %v2083_v24 = vadd.f32 %v2082_v9, %v1192_v29  ;;  %v270_v45 = vld [vmem:[%s7736_s0 + $0x7c0] sm:$0xff]  ;;  %v273_v37 = vld [vmem:[%s7736_s0 + $0x7d8] sm:$0xff]  ;;  %v367_v49 = vld [vmem:[%s7736_s0 + $0xac8] sm:$0xff] }
 0x104   :  { %v1222_v23 = vmul.f32 %v3281_v39, %v296_v34  ;;  %v5780_v22 = vmul.f32 %v3283_v40, %v297_v63  ;;  %v5783_v10 = vmul.f32 %v3285_v41, %v298_v11  ;;  %v1290_v56 = vmul.f32 %v3211_v5, %v364_v6  ;;  %v274_v57 = vld [vmem:[%s7736_s0 + $0x7e0] sm:$0xff] }
 0x105   :  { %2540 = vadd.xlane.f32.xlu0 %v2539_v35  ;;  %v2577_v42 = vadd.f32 %v2576_v44, %v5685_v33  ;;  %v2110_v29 = vadd.f32 %v2109_v61, %v1218_v55  ;;  %v1195_v8 = vmul.f32 %v3245_v20, %v269_v0  ;;  %v2084_v36 = vadd.f32 %v2083_v24, %v1193_v47  ;;  %v368_v44 = vld [vmem:[%s7736_s0 + $0xad0] sm:$0xff] }
 0x106   :  { %v5801_v43 = vmul.f32 %v3299_v46, %v299_v62  ;;  %v5804_v33 = vmul.f32 %v3309_v52, %v300_v51  ;;  %v1291_v32 = vmul.f32 %v3216_v7, %v365_v14  ;;  %v2185_v34 = vadd.f32 %v1289_v17, %v1288_v18  ;;  %v722_v62 = vld [vmem:[%s7736_s0 + $0x15e0] sm:$0xff]  ;;  %v723_v51 = vld [vmem:[%s7736_s0 + $0x15e8] sm:$0xff] }
 0x107   :  { %v2578_v55 = vadd.f32 %v2577_v42, %v5703_v58  ;;  %v2111_v47 = vadd.f32 %v2110_v29, %v1219_v54  ;;  %v1196_v63 = vmul.f32 %v3247_v21, %v270_v45  ;;  %v2085_v11 = vadd.f32 %v2084_v36, %v1194_v19  ;;  %v275_v58 = vld [vmem:[%s7736_s0 + $0x7e8] sm:$0xff]  ;;  %v277_v42 = vld [vmem:[%s7736_s0 + $0x7f8] sm:$0xff] }
 0x108   :  { %v5822_v9 = vmul.f32 %v3311_v53, %v301_v50  ;;  %v1197_v54 = vmul.f32 %v3253_v25, %v271_v13  ;;  %v1292_v6 = vmul.f32 %v3226_v12, %v366_v4  ;;  %v2186_v0 = vadd.f32 %v2185_v34, %v1290_v56  ;;  %v369_v13 = vld [vmem:[%s7736_s0 + $0xad8] sm:$0xff] }
 0x109   :  { %v2579_v18 = vadd.f32 %v2578_v55, %v5706_v60  ;;  %v2112_v17 = vadd.f32 %v2111_v47, %v1220_v31  ;;  %v1198_v19 = vmul.f32 %v3255_v26, %v272_v48  ;;  %v2086_v35 = vadd.f32 %v2085_v11, %v1195_v8  ;;  %v276_v60 = vld [vmem:[%s7736_s0 + $0x7f0] sm:$0xff] }
 0x10a   :  { %v1199_v31 = vmul.f32 %v3257_v27, %v273_v37  ;;  %v1200_v61 = vmul.f32 %v3259_v28, %v274_v57  ;;  %v1293_v24 = vmul.f32 %v3232_v15, %v367_v49  ;;  %v2187_v14 = vadd.f32 %v2186_v0, %v1291_v32  ;;  %v724_v8 = vld [vmem:[%s7736_s0 + $0x15f0] sm:$0xff]  ;;  %v370_v57 = vld [vmem:[%s7736_s0 + $0xae0] sm:$0xff] }
 0x10b   :  { %v2580_v45 = vadd.f32 %v2579_v18, %v5724_v59  ;;  %v2113_v56 = vadd.f32 %v2112_v17, %v1221_v30  ;;  %v1201_v50 = vmul.f32 %v3279_v38, %v275_v58  ;;  %v2087_v29 = vadd.f32 %v2086_v35, %v1196_v63  ;;  %v278_v59 = vld [vmem:[%s7736_s0 + $0x800] sm:$0xff]  ;;  %v279_v30 = vld [vmem:[%s7736_s0 + $0x808] sm:$0xff]  ;;  %v725_v63 = vld [vmem:[%s7736_s0 + $0x15f8] sm:$0xff] }
 0x10c   :  { %v1294_v36 = vmul.f32 %v3234_v16, %v368_v44  ;;  %v2188_v4 = vadd.f32 %v2187_v14, %v1292_v6  ;;  %v1648_v48 = vmul.f32 %v3201_v1, %v722_v62  ;;  %v1649_v32 = vmul.f32 %v3203_v2, %v723_v51  ;;  %v280_v11 = vld [vmem:[%s7736_s0 + $0x810] sm:$0xff]  ;;  %v371_v35 = vld [vmem:[%s7736_s0 + $0xae8] sm:$0xff]  ;;  %v726_v44 = vld [vmem:[%s7736_s0 + $0x1600] sm:$0xff] }
 0x10d   :  { %v2581_v34 = vadd.f32 %v2580_v45, %v5727_v3  ;;  %v2114_v55 = vadd.f32 %v2113_v56, %v1222_v23  ;;  %v1202_v47 = vmul.f32 %v3281_v39, %v276_v60  ;;  %v2088_v37 = vadd.f32 %v2087_v29, %v1197_v54  ;;  %v281_v3 = vld [vmem:[%s7736_s0 + $0x818] sm:$0xff]  ;;  %v372_v62 = vld [vmem:[%s7736_s0 + $0xaf0] sm:$0xff]  ;;  %v374_v29 = vld [vmem:[%s7736_s0 + $0xb00] sm:$0xff] }
 0x10e   :  { %v5881_v23 = vmul.f32 %v3283_v40, %v277_v42  ;;  %v1295_v49 = vmul.f32 %v3245_v20, %v369_v13  ;;  %v2189_v58 = vadd.f32 %v2188_v4, %v1293_v24  ;;  %v1650_v54 = vmul.f32 %v3211_v5, %v724_v8  ;;  %v727_v13 = vld [vmem:[%s7736_s0 + $0x1608] sm:$0xff] }
 0x10f   :  { %2582 = vadd.xlane.f32.xlu1 %v2581_v34  ;;  %v2115_v6 = vadd.f32 %v2114_v55, %v5780_v22  ;;  %v5887_v0 = vmul.f32 %v3285_v41, %v278_v59  ;;  %v5890_v18 = vmul.f32 %v3299_v46, %v279_v30  ;;  %v2089_v17 = vadd.f32 %v2088_v37, %v1198_v19  ;;  %v373_v22 = vld [vmem:[%s7736_s0 + $0xaf8] sm:$0xff]  ;;  %v375_v8 = vld [vmem:[%s7736_s0 + $0xb08] sm:$0xff]  ;;  %v728_v30 = vld [vmem:[%s7736_s0 + $0x1610] sm:$0xff] }
 0x110   :  { %v1296_v51 = vmul.f32 %v3247_v21, %v370_v57  ;;  %v2190_v60 = vadd.f32 %v2189_v58, %v1294_v36  ;;  %v1651_v19 = vmul.f32 %v3216_v7, %v725_v63  ;;  %v2584_v24 = vadd.f32 %v1649_v32, %v1648_v48  ;;  %v342_v55 = vld [vmem:[%s7736_s0 + $0xa00] sm:$0xff]  ;;  %v343_v37 = vld [vmem:[%s7736_s0 + $0xa08] sm:$0xff]  ;;  %v376_v57 = vld [vmem:[%s7736_s0 + $0xb10] sm:$0xff] }
 0x111   :  { %v2116_v14 = vadd.f32 %v2115_v6, %v5783_v10  ;;  %v5908_v45 = vmul.f32 %v3309_v52, %v280_v11  ;;  %v5911_v56 = vmul.f32 %v3311_v53, %v281_v3  ;;  %v2090_v42 = vadd.f32 %v2089_v17, %v1199_v31  ;;  %v729_v6 = vld [vmem:[%s7736_s0 + $0x1618] sm:$0xff] }
 0x112   :  { %v1297_v10 = vmul.f32 %v3253_v25, %v371_v35  ;;  %v2191_v59 = vadd.f32 %v2190_v60, %v1295_v49  ;;  %v1652_v31 = vmul.f32 %v3226_v12, %v726_v44  ;;  %v2585_v36 = vadd.f32 %v2584_v24, %v1650_v54  ;;  %v344_v35 = vld [vmem:[%s7736_s0 + $0xa10] sm:$0xff]  ;;  %v378_v44 = vld [vmem:[%s7736_s0 + $0xb20] sm:$0xff] }
 0x113   :  { %v2117_v4 = vadd.f32 %v2116_v14, %v5801_v43  ;;  %v2091_v48 = vadd.f32 %v2090_v42, %v1200_v61  ;;  %v1298_v32 = vmul.f32 %v3255_v26, %v372_v62  ;;  %v1299_v34 = vmul.f32 %v3257_v27, %v373_v22  ;;  %v377_v43 = vld [vmem:[%s7736_s0 + $0xb18] sm:$0xff]  ;;  %v730_v62 = vld [vmem:[%s7736_s0 + $0x1620] sm:$0xff] }
 0x114   :  { %v1300_v61 = vmul.f32 %v3259_v28, %v374_v29  ;;  %v2192_v63 = vadd.f32 %v2191_v59, %v1296_v51  ;;  %v1653_v11 = vmul.f32 %v3232_v15, %v727_v13  ;;  %v2586_v3 = vadd.f32 %v2585_v36, %v1651_v19  ;;  %v345_v29 = vld [vmem:[%s7736_s0 + $0xa18] sm:$0xff]  ;;  %v380_v13 = vld [vmem:[%s7736_s0 + $0xb30] sm:$0xff] }
 0x115   :  { %v2118_v49 = vadd.f32 %v2117_v4, %v5804_v33  ;;  %v2092_v58 = vadd.f32 %v2091_v48, %v1201_v50  ;;  %v1301_v54 = vmul.f32 %v3279_v38, %v375_v8  ;;  %v1654_v17 = vmul.f32 %v3234_v16, %v728_v30  ;;  %v379_v33 = vld [vmem:[%s7736_s0 + $0xb28] sm:$0xff]  ;;  %v381_v8 = vld [vmem:[%s7736_s0 + $0xb38] sm:$0xff] }
 0x116   :  { %v2193_v50 = vadd.f32 %v2192_v63, %v1297_v10  ;;  %v2587_v22 = vadd.f32 %v2586_v3, %v1652_v31  ;;  %v1268_v51 = vmul.f32 %v3201_v1, %v342_v55  ;;  %v1269_v60 = vmul.f32 %v3203_v2, %v343_v37  ;;  %v732_v37 = vld [vmem:[%s7736_s0 + $0x1630] sm:$0xff] }
 0x117   :  { %v2119_v19 = vadd.f32 %v2118_v49, %v5822_v9  ;;  %v2093_v24 = vadd.f32 %v2092_v58, %v1202_v47  ;;  %v1302_v14 = vmul.f32 %v3281_v39, %v376_v57  ;;  %v5967_v42 = vmul.f32 %v3283_v40, %v377_v43  ;;  %v731_v9 = vld [vmem:[%s7736_s0 + $0x1628] sm:$0xff]  ;;  %v734_v57 = vld [vmem:[%s7736_s0 + $0x1640] sm:$0xff] }
 0x118   :  { %v2194_v10 = vadd.f32 %v2193_v50, %v1298_v32  ;;  %v1655_v47 = vmul.f32 %v3245_v20, %v729_v6  ;;  %v2588_v59 = vadd.f32 %v2587_v22, %v1653_v11  ;;  %v1270_v30 = vmul.f32 %v3211_v5, %v344_v35  ;;  %v346_v32 = vld [vmem:[%s7736_s0 + $0xa20] sm:$0xff]  ;;  %v347_v6 = vld [vmem:[%s7736_s0 + $0xa28] sm:$0xff] }
 0x119   :  { %2120 = vadd.xlane.f32.xlu2 %v2119_v19  ;;  %v2094_v31 = vadd.f32 %v2093_v24, %v5881_v23  ;;  %v5985_v36 = vmul.f32 %v3285_v41, %v378_v44  ;;  %v5988_v4 = vmul.f32 %v3299_v46, %v379_v33  ;;  %v1656_v48 = vmul.f32 %v3247_v21, %v730_v62  ;;  %v733_v23 = vld [vmem:[%s7736_s0 + $0x1638] sm:$0xff]  ;;  %v802_v62 = vld [vmem:[%s7736_s0 + $0x1860] sm:$0xff]  ;;  %v803_v19 = vld [vmem:[%s7736_s0 + $0x1868] sm:$0xff] }
 0x11a   :  { %v2195_v55 = vadd.f32 %v2194_v10, %v1299_v34  ;;  %v2589_v43 = vadd.f32 %v2588_v59, %v1654_v17  ;;  %v1271_v63 = vmul.f32 %v3216_v7, %v345_v29  ;;  %v2164_v11 = vadd.f32 %v1269_v60, %v1268_v51  ;;  %v735_v17 = vld [vmem:[%s7736_s0 + $0x1648] sm:$0xff]  ;;  %v736_v29 = vld [vmem:[%s7736_s0 + $0x1650] sm:$0xff]  ;;  %v350_v59 = vld [vmem:[%s7736_s0 + $0xa40] sm:$0xff] }
 0x11b   :  { %v2095_v3 = vadd.f32 %v2094_v31, %v5887_v0  ;;  %v6006_v34 = vmul.f32 %v3309_v52, %v380_v13  ;;  %v6009_v49 = vmul.f32 %v3311_v53, %v381_v8  ;;  %v1657_v58 = vmul.f32 %v3253_v25, %v731_v9  ;;  %v348_v0 = vld [vmem:[%s7736_s0 + $0xa30] sm:$0xff]  ;;  %v737_v13 = vld [vmem:[%s7736_s0 + $0x1658] sm:$0xff] }
 0x11c   :  { %v2196_v35 = vadd.f32 %v2195_v55, %v1300_v61  ;;  %v2590_v44 = vadd.f32 %v2589_v43, %v1655_v47  ;;  %v1272_v33 = vmul.f32 %v3226_v12, %v346_v32  ;;  %v2165_v50 = vadd.f32 %v2164_v11, %v1270_v30  ;;  %v349_v8 = vld [vmem:[%s7736_s0 + $0xa38] sm:$0xff]  ;;  %v804_v31 = vld [vmem:[%s7736_s0 + $0x1870] sm:$0xff]  ;;  %v738_v55 = vld [vmem:[%s7736_s0 + $0x1660] sm:$0xff] }
 0x11d   :  { %v2096_v22 = vadd.f32 %v2095_v3, %v5890_v18  ;;  %v1658_v61 = vmul.f32 %v3255_v26, %v732_v37  ;;  %v1659_v51 = vmul.f32 %v3257_v27, %v733_v23  ;;  %v1660_v60 = vmul.f32 %v3259_v28, %v734_v57  ;;  %v805_v57 = vld [vmem:[%s7736_s0 + $0x1878] sm:$0xff]  ;;  %v351_v3 = vld [vmem:[%s7736_s0 + $0xa48] sm:$0xff] }
 0x11e   :  { %v2197_v24 = vadd.f32 %v2196_v35, %v1301_v54  ;;  %v2591_v18 = vadd.f32 %v2590_v44, %v1656_v48  ;;  %v1273_v10 = vmul.f32 %v3232_v15, %v347_v6  ;;  %v2166_v9 = vadd.f32 %v2165_v50, %v1271_v63  ;;  %v740_v35 = vld [vmem:[%s7736_s0 + $0x1670] sm:$0xff] }
 0x11f   :  { %v2097_v47 = vadd.f32 %v2096_v22, %v5908_v45  ;;  %v1661_v54 = vmul.f32 %v3279_v38, %v735_v17  ;;  %v1274_v30 = vmul.f32 %v3234_v16, %v348_v0  ;;  %v1728_v48 = vmul.f32 %v3201_v1, %v802_v62  ;;  %v739_v45 = vld [vmem:[%s7736_s0 + $0x1668] sm:$0xff]  ;;  %v806_v0 = vld [vmem:[%s7736_s0 + $0x1880] sm:$0xff]  ;;  %v352_v62 = vld [vmem:[%s7736_s0 + $0xa50] sm:$0xff] }
 0x120   :  { %v2198_v32 = vadd.f32 %v2197_v24, %v1302_v14  ;;  %v2592_v37 = vadd.f32 %v2591_v18, %v1657_v58  ;;  %v2167_v23 = vadd.f32 %v2166_v9, %v1272_v33  ;;  %v1729_v43 = vmul.f32 %v3203_v2, %v803_v19 }
 0x121   :  { %v2098_v63 = vadd.f32 %v2097_v47, %v5911_v56  ;;  %v1662_v14 = vmul.f32 %v3281_v39, %v736_v29  ;;  %v6065_v11 = vmul.f32 %v3283_v40, %v737_v13  ;;  %v1275_v58 = vmul.f32 %v3245_v20, %v349_v8  ;;  %v741_v56 = vld [vmem:[%s7736_s0 + $0x1678] sm:$0xff]  ;;  %v354_v13 = vld [vmem:[%s7736_s0 + $0xa60] sm:$0xff]  ;;  %v807_v8 = vld [vmem:[%s7736_s0 + $0x1888] sm:$0xff] }
 0x122   :  { %v2199_v6 = vadd.f32 %v2198_v32, %v5967_v42  ;;  %v2593_v17 = vadd.f32 %v2592_v37, %v1658_v61  ;;  %v2168_v44 = vadd.f32 %v2167_v23, %v1273_v10  ;;  %v1730_v33 = vmul.f32 %v3211_v5, %v804_v31  ;;  %v353_v29 = vld [vmem:[%s7736_s0 + $0xa58] sm:$0xff]  ;;  %v303_v37 = vld [vmem:[%s7736_s0 + $0x8c8] sm:$0xff] }
 0x123   :  { %2099 = vadd.xlane.f32.xlu0 %v2098_v63  ;;  %v6083_v50 = vmul.f32 %v3285_v41, %v738_v55  ;;  %v6086_v42 = vmul.f32 %v3299_v46, %v739_v45  ;;  %v1276_v22 = vmul.f32 %v3247_v21, %v350_v59  ;;  %v1731_v61 = vmul.f32 %v3216_v7, %v805_v57  ;;  %v302_v59 = vld [vmem:[%s7736_s0 + $0x8c0] sm:$0xff]  ;;  %v808_v55 = vld [vmem:[%s7736_s0 + $0x1890] sm:$0xff] }
 0x124   :  { %v2200_v19 = vadd.f32 %v2199_v6, %v5985_v36  ;;  %v2594_v24 = vadd.f32 %v2593_v17, %v1659_v51  ;;  %v2169_v18 = vadd.f32 %v2168_v44, %v1274_v30  ;;  %v2668_v10 = vadd.f32 %v1729_v43, %v1728_v48  ;;  %v355_v48 = vld [vmem:[%s7736_s0 + $0xa68] sm:$0xff]  ;;  %v304_v43 = vld [vmem:[%s7736_s0 + $0x8d0] sm:$0xff]  ;;  %v357_v6 = vld [vmem:[%s7736_s0 + $0xa78] sm:$0xff] }
 0x125   :  { %v6104_v9 = vmul.f32 %v3309_v52, %v740_v35  ;;  %v6107_v36 = vmul.f32 %v3311_v53, %v741_v56  ;;  %v1277_v51 = vmul.f32 %v3253_v25, %v351_v3  ;;  %v1732_v47 = vmul.f32 %v3226_v12, %v806_v0  ;;  %v358_v35 = vld [vmem:[%s7736_s0 + $0xa80] sm:$0xff] }
 0x126   :  { %v2201_v30 = vadd.f32 %v2200_v19, %v5988_v4  ;;  %v2595_v31 = vadd.f32 %v2594_v24, %v1660_v60  ;;  %v2170_v32 = vadd.f32 %v2169_v18, %v1275_v58  ;;  %v2669_v45 = vadd.f32 %v2668_v10, %v1730_v33  ;;  %v356_v58 = vld [vmem:[%s7736_s0 + $0xa70] sm:$0xff] }
 0x127   :  { %v1278_v23 = vmul.f32 %v3255_v26, %v352_v62  ;;  %v1279_v57 = vmul.f32 %v3257_v27, %v353_v29  ;;  %v1280_v4 = vmul.f32 %v3259_v28, %v354_v13  ;;  %v1733_v60 = vmul.f32 %v3232_v15, %v807_v8  ;;  %v305_v13 = vld [vmem:[%s7736_s0 + $0x8d8] sm:$0xff] }
 0x128   :  { %v2202_v63 = vadd.f32 %v2201_v30, %v6006_v34  ;;  %v2596_v3 = vadd.f32 %v2595_v31, %v1661_v54  ;;  %v2171_v56 = vadd.f32 %v2170_v32, %v1276_v22  ;;  %v2670_v17 = vadd.f32 %v2669_v45, %v1731_v61  ;;  %v809_v34 = vld [vmem:[%s7736_s0 + $0x1898] sm:$0xff]  ;;  %v359_v22 = vld [vmem:[%s7736_s0 + $0xa88] sm:$0xff]  ;;  %v360_v61 = vld [vmem:[%s7736_s0 + $0xa90] sm:$0xff] }
 0x129   :  { %v1281_v44 = vmul.f32 %v3279_v38, %v355_v48  ;;  %v1734_v54 = vmul.f32 %v3234_v16, %v808_v55  ;;  %v1228_v0 = vmul.f32 %v3201_v1, %v302_v59  ;;  %v1229_v33 = vmul.f32 %v3203_v2, %v303_v37  ;;  %v811_v30 = vld [vmem:[%s7736_s0 + $0x18a8] sm:$0xff]  ;;  %v306_v32 = vld [vmem:[%s7736_s0 + $0x8e0] sm:$0xff]  ;;  %v812_v45 = vld [vmem:[%s7736_s0 + $0x18b0] sm:$0xff] }
 0x12a   :  { %v2203_v62 = vadd.f32 %v2202_v63, %v6009_v49  ;;  %v2597_v19 = vadd.f32 %v2596_v3, %v1662_v14  ;;  %v2172_v24 = vadd.f32 %v2171_v56, %v1277_v51  ;;  %v2671_v29 = vadd.f32 %v2670_v17, %v1732_v47  ;;  %v810_v14 = vld [vmem:[%s7736_s0 + $0x18a0] sm:$0xff]  ;;  %v361_v47 = vld [vmem:[%s7736_s0 + $0xa98] sm:$0xff] }
 0x12b   :  { %v1282_v18 = vmul.f32 %v3281_v39, %v356_v58  ;;  %v6160_v8 = vmul.f32 %v3283_v40, %v357_v6  ;;  %v6163_v49 = vmul.f32 %v3285_v41, %v358_v35  ;;  %v1230_v10 = vmul.f32 %v3211_v5, %v304_v43  ;;  %v813_v63 = vld [vmem:[%s7736_s0 + $0x18b8] sm:$0xff]  ;;  %v814_v3 = vld [vmem:[%s7736_s0 + $0x18c0] sm:$0xff]  ;;  %v307_v35 = vld [vmem:[%s7736_s0 + $0x8e8] sm:$0xff] }
 0x12c   :  { %2204 = vadd.xlane.f32.xlu1 %v2203_v62  ;;  %v2598_v51 = vadd.f32 %v2597_v19, %v6065_v11  ;;  %v2173_v59 = vadd.f32 %v2172_v24, %v1278_v23  ;;  %v1735_v31 = vmul.f32 %v3245_v20, %v809_v34  ;;  %v2672_v48 = vadd.f32 %v2671_v29, %v1733_v60  ;;  %v308_v19 = vld [vmem:[%s7736_s0 + $0x8f0] sm:$0xff] }
 0x12d   :  { %v6181_v55 = vmul.f32 %v3299_v46, %v359_v22  ;;  %v6184_v11 = vmul.f32 %v3309_v52, %v360_v61  ;;  %v1231_v37 = vmul.f32 %v3216_v7, %v305_v13  ;;  %v2122_v23 = vadd.f32 %v1229_v33, %v1228_v0  ;;  %v782_v22 = vld [vmem:[%s7736_s0 + $0x17c0] sm:$0xff]  ;;  %v783_v61 = vld [vmem:[%s7736_s0 + $0x17c8] sm:$0xff] }
 0x12e   :  { %v2599_v43 = vadd.f32 %v2598_v51, %v6083_v50  ;;  %v2174_v60 = vadd.f32 %v2173_v59, %v1279_v57  ;;  %v1736_v58 = vmul.f32 %v3247_v21, %v810_v14  ;;  %v2673_v6 = vadd.f32 %v2672_v48, %v1734_v54  ;;  %v815_v50 = vld [vmem:[%s7736_s0 + $0x18c8] sm:$0xff]  ;;  %v817_v51 = vld [vmem:[%s7736_s0 + $0x18d8] sm:$0xff] }
 0x12f   :  { %v6202_v56 = vmul.f32 %v3311_v53, %v361_v47  ;;  %v1737_v57 = vmul.f32 %v3253_v25, %v811_v30  ;;  %v1232_v17 = vmul.f32 %v3226_v12, %v306_v32  ;;  %v2123_v34 = vadd.f32 %v2122_v23, %v1230_v10  ;;  %v309_v30 = vld [vmem:[%s7736_s0 + $0x8f8] sm:$0xff] }
 0x130   :  { %v2600_v0 = vadd.f32 %v2599_v43, %v6086_v42  ;;  %v2175_v33 = vadd.f32 %v2174_v60, %v1280_v4  ;;  %v1738_v54 = vmul.f32 %v3255_v26, %v812_v45  ;;  %v2674_v62 = vadd.f32 %v2673_v6, %v1735_v31  ;;  %v816_v42 = vld [vmem:[%s7736_s0 + $0x18d0] sm:$0xff] }
 0x131   :  { %v1739_v4 = vmul.f32 %v3257_v27, %v813_v63  ;;  %v1740_v24 = vmul.f32 %v3259_v28, %v814_v3  ;;  %v1233_v29 = vmul.f32 %v3232_v15, %v307_v35  ;;  %v2124_v13 = vadd.f32 %v2123_v34, %v1231_v37  ;;  %v784_v31 = vld [vmem:[%s7736_s0 + $0x17d0] sm:$0xff]  ;;  %v310_v3 = vld [vmem:[%s7736_s0 + $0x900] sm:$0xff] }
 0x132   :  { %v2601_v14 = vadd.f32 %v2600_v0, %v6104_v9  ;;  %v2176_v10 = vadd.f32 %v2175_v33, %v1281_v44  ;;  %v1741_v47 = vmul.f32 %v3279_v38, %v815_v50  ;;  %v2675_v59 = vadd.f32 %v2674_v62, %v1736_v58  ;;  %v818_v9 = vld [vmem:[%s7736_s0 + $0x18e0] sm:$0xff]  ;;  %v819_v44 = vld [vmem:[%s7736_s0 + $0x18e8] sm:$0xff]  ;;  %v785_v58 = vld [vmem:[%s7736_s0 + $0x17d8] sm:$0xff] }
 0x133   :  { %v1234_v48 = vmul.f32 %v3234_v16, %v308_v19  ;;  %v2125_v32 = vadd.f32 %v2124_v13, %v1232_v17  ;;  %v1708_v45 = vmul.f32 %v3201_v1, %v782_v22  ;;  %v1709_v37 = vmul.f32 %v3203_v2, %v783_v61  ;;  %v820_v6 = vld [vmem:[%s7736_s0 + $0x18f0] sm:$0xff]  ;;  %v311_v62 = vld [vmem:[%s7736_s0 + $0x908] sm:$0xff]  ;;  %v786_v19 = vld [vmem:[%s7736_s0 + $0x17e0] sm:$0xff] }
 0x134   :  { %v2602_v23 = vadd.f32 %v2601_v14, %v6107_v36  ;;  %v2177_v43 = vadd.f32 %v2176_v10, %v1282_v18  ;;  %v1742_v60 = vmul.f32 %v3281_v39, %v816_v42  ;;  %v2676_v63 = vadd.f32 %v2675_v59, %v1737_v57  ;;  %v821_v36 = vld [vmem:[%s7736_s0 + $0x18f8] sm:$0xff]  ;;  %v312_v22 = vld [vmem:[%s7736_s0 + $0x910] sm:$0xff]  ;;  %v314_v59 = vld [vmem:[%s7736_s0 + $0x920] sm:$0xff] }
 0x135   :  { %v6261_v18 = vmul.f32 %v3283_v40, %v817_v51  ;;  %v1235_v35 = vmul.f32 %v3245_v20, %v309_v30  ;;  %v2126_v50 = vadd.f32 %v2125_v32, %v1233_v29  ;;  %v1710_v57 = vmul.f32 %v3211_v5, %v784_v31  ;;  %v787_v30 = vld [vmem:[%s7736_s0 + $0x17e8] sm:$0xff] }
 0x136   :  { %2603 = vadd.xlane.f32.xlu2 %v2602_v23  ;;  %v2178_v17 = vadd.f32 %v2177_v43, %v6160_v8  ;;  %v6267_v34 = vmul.f32 %v3285_v41, %v818_v9  ;;  %v6270_v0 = vmul.f32 %v3299_v46, %v819_v44  ;;  %v2677_v33 = vadd.f32 %v2676_v63, %v1738_v54  ;;  %v313_v8 = vld [vmem:[%s7736_s0 + $0x918] sm:$0xff]  ;;  %v315_v31 = vld [vmem:[%s7736_s0 + $0x928] sm:$0xff]  ;;  %v788_v44 = vld [vmem:[%s7736_s0 + $0x17f0] sm:$0xff] }
 0x137   :  { %v1236_v61 = vmul.f32 %v3247_v21, %v310_v3  ;;  %v2127_v42 = vadd.f32 %v2126_v50, %v1234_v48  ;;  %v1711_v54 = vmul.f32 %v3216_v7, %v785_v58  ;;  %v2647_v29 = vadd.f32 %v1709_v37, %v1708_v45  ;;  %v742_v43 = vld [vmem:[%s7736_s0 + $0x1680] sm:$0xff]  ;;  %v743_v63 = vld [vmem:[%s7736_s0 + $0x1688] sm:$0xff]  ;;  %v316_v3 = vld [vmem:[%s7736_s0 + $0x930] sm:$0xff] }
 0x138   :  { %v2179_v13 = vadd.f32 %v2178_v17, %v6163_v49  ;;  %v6288_v14 = vmul.f32 %v3309_v52, %v820_v6  ;;  %v6291_v10 = vmul.f32 %v3311_v53, %v821_v36  ;;  %v2678_v51 = vadd.f32 %v2677_v33, %v1739_v4  ;;  %v789_v17 = vld [vmem:[%s7736_s0 + $0x17f8] sm:$0xff] }
 0x139   :  { %v1237_v49 = vmul.f32 %v3253_v25, %v311_v62  ;;  %v2128_v9 = vadd.f32 %v2127_v42, %v1235_v35  ;;  %v1712_v4 = vmul.f32 %v3226_v12, %v786_v19  ;;  %v2648_v48 = vadd.f32 %v2647_v29, %v1710_v57  ;;  %v744_v62 = vld [vmem:[%s7736_s0 + $0x1690] sm:$0xff]  ;;  %v318_v19 = vld [vmem:[%s7736_s0 + $0x940] sm:$0xff] }
 0x13a   :  { %v2180_v32 = vadd.f32 %v2179_v13, %v6181_v55  ;;  %v2679_v45 = vadd.f32 %v2678_v51, %v1740_v24  ;;  %v1238_v37 = vmul.f32 %v3255_v26, %v312_v22  ;;  %v1239_v23 = vmul.f32 %v3257_v27, %v313_v8  ;;  %v317_v55 = vld [vmem:[%s7736_s0 + $0x938] sm:$0xff]  ;;  %v790_v22 = vld [vmem:[%s7736_s0 + $0x1800] sm:$0xff] }
 0x13b   :  { %v1240_v24 = vmul.f32 %v3259_v28, %v314_v59  ;;  %v2129_v58 = vadd.f32 %v2128_v9, %v1236_v61  ;;  %v1713_v6 = vmul.f32 %v3232_v15, %v787_v30  ;;  %v2649_v36 = vadd.f32 %v2648_v48, %v1711_v54  ;;  %v745_v59 = vld [vmem:[%s7736_s0 + $0x1698] sm:$0xff]  ;;  %v320_v30 = vld [vmem:[%s7736_s0 + $0x950] sm:$0xff] }
 0x13c   :  { %v2181_v35 = vadd.f32 %v2180_v32, %v6184_v11  ;;  %v2680_v50 = vadd.f32 %v2679_v45, %v1741_v47  ;;  %v1241_v57 = vmul.f32 %v3279_v38, %v315_v31  ;;  %v1714_v33 = vmul.f32 %v3234_v16, %v788_v44  ;;  %v319_v11 = vld [vmem:[%s7736_s0 + $0x948] sm:$0xff]  ;;  %v321_v31 = vld [vmem:[%s7736_s0 + $0x958] sm:$0xff] }
 0x13d   :  { %v2130_v47 = vadd.f32 %v2129_v58, %v1237_v49  ;;  %v2650_v8 = vadd.f32 %v2649_v36, %v1712_v4  ;;  %v1668_v61 = vmul.f32 %v3201_v1, %v742_v43  ;;  %v1669_v42 = vmul.f32 %v3203_v2, %v743_v63  ;;  %v792_v63 = vld [vmem:[%s7736_s0 + $0x1810] sm:$0xff] }
 0x13e   :  { %v2182_v54 = vadd.f32 %v2181_v35, %v6202_v56  ;;  %v2681_v29 = vadd.f32 %v2680_v50, %v1742_v60  ;;  %v1242_v13 = vmul.f32 %v3281_v39, %v316_v3  ;;  %v6347_v51 = vmul.f32 %v3283_v40, %v317_v55  ;;  %v791_v56 = vld [vmem:[%s7736_s0 + $0x1808] sm:$0xff]  ;;  %v794_v3 = vld [vmem:[%s7736_s0 + $0x1820] sm:$0xff] }
 0x13f   :  { %v2131_v49 = vadd.f32 %v2130_v47, %v1238_v37  ;;  %v1715_v60 = vmul.f32 %v3245_v20, %v789_v17  ;;  %v2651_v9 = vadd.f32 %v2650_v8, %v1713_v6  ;;  %v1670_v44 = vmul.f32 %v3211_v5, %v744_v62  ;;  %v746_v37 = vld [vmem:[%s7736_s0 + $0x16a0] sm:$0xff]  ;;  %v747_v17 = vld [vmem:[%s7736_s0 + $0x16a8] sm:$0xff] }
 0x140   :  { %2183 = vadd.xlane.f32.xlu0 %v2182_v54  ;;  %v2682_v4 = vadd.f32 %v2681_v29, %v6261_v18  ;;  %v6365_v48 = vmul.f32 %v3285_v41, %v318_v19  ;;  %v6368_v32 = vmul.f32 %v3299_v46, %v319_v11  ;;  %v1716_v45 = vmul.f32 %v3247_v21, %v790_v22  ;;  %v793_v18 = vld [vmem:[%s7736_s0 + $0x1818] sm:$0xff]  ;;  %v822_v22 = vld [vmem:[%s7736_s0 + $0x1900] sm:$0xff]  ;;  %v823_v54 = vld [vmem:[%s7736_s0 + $0x1908] sm:$0xff] }
 0x141   :  { %v2132_v43 = vadd.f32 %v2131_v49, %v1239_v23  ;;  %v2652_v55 = vadd.f32 %v2651_v9, %v1714_v33  ;;  %v1671_v58 = vmul.f32 %v3216_v7, %v745_v59  ;;  %v2605_v6 = vadd.f32 %v1669_v42, %v1668_v61  ;;  %v795_v33 = vld [vmem:[%s7736_s0 + $0x1828] sm:$0xff]  ;;  %v796_v59 = vld [vmem:[%s7736_s0 + $0x1830] sm:$0xff] }
 0x142   :  { %v2683_v36 = vadd.f32 %v2682_v4, %v6267_v34  ;;  %v6386_v23 = vmul.f32 %v3309_v52, %v320_v30  ;;  %v6389_v35 = vmul.f32 %v3311_v53, %v321_v31  ;;  %v1717_v50 = vmul.f32 %v3253_v25, %v791_v56  ;;  %v748_v34 = vld [vmem:[%s7736_s0 + $0x16b0] sm:$0xff]  ;;  %v797_v30 = vld [vmem:[%s7736_s0 + $0x1838] sm:$0xff] }
 0x143   :  { %v2133_v62 = vadd.f32 %v2132_v43, %v1240_v24  ;;  %v2653_v19 = vadd.f32 %v2652_v55, %v1715_v60  ;;  %v1672_v11 = vmul.f32 %v3226_v12, %v746_v37  ;;  %v2606_v47 = vadd.f32 %v2605_v6, %v1670_v44  ;;  %v749_v31 = vld [vmem:[%s7736_s0 + $0x16b8] sm:$0xff]  ;;  %v824_v44 = vld [vmem:[%s7736_s0 + $0x1910] sm:$0xff]  ;;  %v798_v43 = vld [vmem:[%s7736_s0 + $0x1840] sm:$0xff] }
 0x144   :  { %v2684_v8 = vadd.f32 %v2683_v36, %v6270_v0  ;;  %v1718_v24 = vmul.f32 %v3255_v26, %v792_v63  ;;  %v1719_v61 = vmul.f32 %v3257_v27, %v793_v18  ;;  %v1720_v42 = vmul.f32 %v3259_v28, %v794_v3  ;;  %v825_v4 = vld [vmem:[%s7736_s0 + $0x1918] sm:$0xff]  ;;  %v750_v18 = vld [vmem:[%s7736_s0 + $0x16c0] sm:$0xff] }
 0x145   :  { %v2134_v29 = vadd.f32 %v2133_v62, %v1241_v57  ;;  %v2654_v0 = vadd.f32 %v2653_v19, %v1716_v45  ;;  %v1673_v49 = vmul.f32 %v3232_v15, %v747_v17  ;;  %v2607_v56 = vadd.f32 %v2606_v47, %v1671_v58  ;;  %v800_v62 = vld [vmem:[%s7736_s0 + $0x1850] sm:$0xff]  ;;  %v751_v19 = vld [vmem:[%s7736_s0 + $0x16c8] sm:$0xff] }
 0x146   :  { %v2685_v60 = vadd.f32 %v2684_v8, %v6288_v14  ;;  %v1721_v57 = vmul.f32 %v3279_v38, %v795_v33  ;;  %v1674_v9 = vmul.f32 %v3234_v16, %v748_v34  ;;  %v1748_v45 = vmul.f32 %v3201_v1, %v822_v22  ;;  %v799_v14 = vld [vmem:[%s7736_s0 + $0x1848] sm:$0xff] }
 0x147   :  { %v2135_v37 = vadd.f32 %v2134_v29, %v1242_v13  ;;  %v2655_v63 = vadd.f32 %v2654_v0, %v1717_v50  ;;  %v2608_v3 = vadd.f32 %v2607_v56, %v1672_v11  ;;  %v1749_v55 = vmul.f32 %v3203_v2, %v823_v54  ;;  %v826_v50 = vld [vmem:[%s7736_s0 + $0x1920] sm:$0xff]  ;;  %v827_v8 = vld [vmem:[%s7736_s0 + $0x1928] sm:$0xff] }
 0x148   :  { %v2686_v58 = vadd.f32 %v2685_v60, %v6291_v10  ;;  %v1722_v13 = vmul.f32 %v3281_v39, %v796_v59  ;;  %v6445_v6 = vmul.f32 %v3283_v40, %v797_v30  ;;  %v1675_v36 = vmul.f32 %v3245_v20, %v749_v31  ;;  %v801_v10 = vld [vmem:[%s7736_s0 + $0x1858] sm:$0xff]  ;;  %v752_v59 = vld [vmem:[%s7736_s0 + $0x16d0] sm:$0xff]  ;;  %v754_v0 = vld [vmem:[%s7736_s0 + $0x16e0] sm:$0xff] }
 0x149   :  { %v2136_v17 = vadd.f32 %v2135_v37, %v6347_v51  ;;  %v2656_v33 = vadd.f32 %v2655_v63, %v1718_v24  ;;  %v2609_v34 = vadd.f32 %v2608_v3, %v1673_v49  ;;  %v1750_v11 = vmul.f32 %v3211_v5, %v824_v44  ;;  %v753_v30 = vld [vmem:[%s7736_s0 + $0x16d8] sm:$0xff]  ;;  %v828_v60 = vld [vmem:[%s7736_s0 + $0x1930] sm:$0xff]  ;;  %v383_v63 = vld [vmem:[%s7736_s0 + $0xb48] sm:$0xff] }
 0x14a   :  { %2687 = vadd.xlane.f32.xlu1 %v2686_v58  ;;  %v6463_v47 = vmul.f32 %v3285_v41, %v798_v43  ;;  %v6466_v51 = vmul.f32 %v3299_v46, %v799_v14  ;;  %v1676_v22 = vmul.f32 %v3247_v21, %v750_v18  ;;  %v1751_v24 = vmul.f32 %v3216_v7, %v825_v4  ;;  %v382_v14 = vld [vmem:[%s7736_s0 + $0xb40] sm:$0xff] }
 0x14b   :  { %v2137_v54 = vadd.f32 %v2136_v17, %v6365_v48  ;;  %v2657_v29 = vadd.f32 %v2656_v33, %v1719_v61  ;;  %v2610_v31 = vadd.f32 %v2609_v34, %v1674_v9  ;;  %v2689_v49 = vadd.f32 %v1749_v55, %v1748_v45  ;;  %v755_v9 = vld [vmem:[%s7736_s0 + $0x16e8] sm:$0xff]  ;;  %v384_v55 = vld [vmem:[%s7736_s0 + $0xb50] sm:$0xff]  ;;  %v757_v17 = vld [vmem:[%s7736_s0 + $0x16f8] sm:$0xff] }
 0x14c   :  { %v6484_v56 = vmul.f32 %v3309_v52, %v800_v62  ;;  %v6487_v48 = vmul.f32 %v3311_v53, %v801_v10  ;;  %v1677_v61 = vmul.f32 %v3253_v25, %v751_v19  ;;  %v1752_v44 = vmul.f32 %v3226_v12, %v826_v50  ;;  %v756_v50 = vld [vmem:[%s7736_s0 + $0x16f0] sm:$0xff]  ;;  %v758_v62 = vld [vmem:[%s7736_s0 + $0x1700] sm:$0xff] }
 0x14d   :  { %v2138_v4 = vadd.f32 %v2137_v54, %v6368_v32  ;;  %v2658_v37 = vadd.f32 %v2657_v29, %v1720_v42  ;;  %v2611_v45 = vadd.f32 %v2610_v31, %v1675_v36  ;;  %v2690_v43 = vadd.f32 %v2689_v49, %v1750_v11 }
 0x14e   :  { %v1678_v18 = vmul.f32 %v3255_v26, %v752_v59  ;;  %v1679_v3 = vmul.f32 %v3257_v27, %v753_v30  ;;  %v1680_v32 = vmul.f32 %v3259_v28, %v754_v0  ;;  %v1753_v42 = vmul.f32 %v3232_v15, %v827_v8  ;;  %v385_v30 = vld [vmem:[%s7736_s0 + $0xb58] sm:$0xff] }
 0x14f   :  { %v2139_v58 = vadd.f32 %v2138_v4, %v6386_v23  ;;  %v2659_v36 = vadd.f32 %v2658_v37, %v1721_v57  ;;  %v2612_v10 = vadd.f32 %v2611_v45, %v1676_v22  ;;  %v2691_v33 = vadd.f32 %v2690_v43, %v1751_v24  ;;  %v829_v23 = vld [vmem:[%s7736_s0 + $0x1938] sm:$0xff]  ;;  %v759_v22 = vld [vmem:[%s7736_s0 + $0x1708] sm:$0xff]  ;;  %v760_v24 = vld [vmem:[%s7736_s0 + $0x1710] sm:$0xff] }
 0x150   :  { %v1681_v19 = vmul.f32 %v3279_v38, %v755_v9  ;;  %v1754_v57 = vmul.f32 %v3234_v16, %v828_v60  ;;  %v1308_v34 = vmul.f32 %v3201_v1, %v382_v14  ;;  %v1309_v11 = vmul.f32 %v3203_v2, %v383_v63  ;;  %v761_v60 = vld [vmem:[%s7736_s0 + $0x1718] sm:$0xff]  ;;  %v831_v4 = vld [vmem:[%s7736_s0 + $0x1948] sm:$0xff]  ;;  %v386_v45 = vld [vmem:[%s7736_s0 + $0xb60] sm:$0xff] }
 0x151   :  { %v2140_v8 = vadd.f32 %v2139_v58, %v6389_v35  ;;  %v2660_v54 = vadd.f32 %v2659_v36, %v1722_v13  ;;  %v2613_v29 = vadd.f32 %v2612_v10, %v1677_v61  ;;  %v2692_v59 = vadd.f32 %v2691_v33, %v1752_v44  ;;  %v830_v13 = vld [vmem:[%s7736_s0 + $0x1940] sm:$0xff]  ;;  %v832_v14 = vld [vmem:[%s7736_s0 + $0x1950] sm:$0xff]  ;;  %v833_v58 = vld [vmem:[%s7736_s0 + $0x1958] sm:$0xff] }
 0x152   :  { %v1682_v0 = vmul.f32 %v3281_v39, %v756_v50  ;;  %v6540_v31 = vmul.f32 %v3283_v40, %v757_v17  ;;  %v6543_v35 = vmul.f32 %v3285_v41, %v758_v62  ;;  %v1310_v49 = vmul.f32 %v3211_v5, %v384_v55  ;;  %v834_v36 = vld [vmem:[%s7736_s0 + $0x1960] sm:$0xff]  ;;  %v387_v62 = vld [vmem:[%s7736_s0 + $0xb68] sm:$0xff] }
 0x153   :  { %2141 = vadd.xlane.f32.xlu2 %v2140_v8  ;;  %v2661_v61 = vadd.f32 %v2660_v54, %v6445_v6  ;;  %v2614_v44 = vadd.f32 %v2613_v29, %v1678_v18  ;;  %v1755_v37 = vmul.f32 %v3245_v20, %v829_v23  ;;  %v2693_v9 = vadd.f32 %v2692_v59, %v1753_v42  ;;  %v388_v54 = vld [vmem:[%s7736_s0 + $0xb70] sm:$0xff] }
 0x154   :  { %v6561_v43 = vmul.f32 %v3299_v46, %v759_v22  ;;  %v6564_v6 = vmul.f32 %v3309_v52, %v760_v24  ;;  %v1311_v63 = vmul.f32 %v3216_v7, %v385_v30  ;;  %v2206_v18 = vadd.f32 %v1309_v11, %v1308_v34  ;;  %v402_v22 = vld [vmem:[%s7736_s0 + $0xbe0] sm:$0xff]  ;;  %v403_v24 = vld [vmem:[%s7736_s0 + $0xbe8] sm:$0xff] }
 0x155   :  { %v2662_v55 = vadd.f32 %v2661_v61, %v6463_v47  ;;  %v2615_v42 = vadd.f32 %v2614_v44, %v1679_v3  ;;  %v1756_v50 = vmul.f32 %v3247_v21, %v830_v13  ;;  %v2694_v17 = vadd.f32 %v2693_v9, %v1754_v57  ;;  %v835_v47 = vld [vmem:[%s7736_s0 + $0x1968] sm:$0xff]  ;;  %v837_v61 = vld [vmem:[%s7736_s0 + $0x1978] sm:$0xff] }
 0x156   :  { %v6582_v10 = vmul.f32 %v3311_v53, %v761_v60  ;;  %v1757_v3 = vmul.f32 %v3253_v25, %v831_v4  ;;  %v1312_v33 = vmul.f32 %v3226_v12, %v386_v45  ;;  %v2207_v23 = vadd.f32 %v2206_v18, %v1310_v49  ;;  %v389_v4 = vld [vmem:[%s7736_s0 + $0xb78] sm:$0xff] }
 0x157   :  { %v2663_v34 = vadd.f32 %v2662_v55, %v6466_v51  ;;  %v2616_v11 = vadd.f32 %v2615_v42, %v1680_v32  ;;  %v1758_v57 = vmul.f32 %v3255_v26, %v832_v14  ;;  %v2695_v8 = vadd.f32 %v2694_v17, %v1755_v37  ;;  %v836_v51 = vld [vmem:[%s7736_s0 + $0x1970] sm:$0xff] }
 0x158   :  { %v1759_v32 = vmul.f32 %v3257_v27, %v833_v58  ;;  %v1760_v29 = vmul.f32 %v3259_v28, %v834_v36  ;;  %v1313_v59 = vmul.f32 %v3232_v15, %v387_v62  ;;  %v2208_v30 = vadd.f32 %v2207_v23, %v1311_v63  ;;  %v404_v37 = vld [vmem:[%s7736_s0 + $0xbf0] sm:$0xff]  ;;  %v390_v36 = vld [vmem:[%s7736_s0 + $0xb80] sm:$0xff] }
 0x159   :  { %v2664_v13 = vadd.f32 %v2663_v34, %v6484_v56  ;;  %v2617_v49 = vadd.f32 %v2616_v11, %v1681_v19  ;;  %v1761_v60 = vmul.f32 %v3279_v38, %v835_v47  ;;  %v2696_v44 = vadd.f32 %v2695_v8, %v1756_v50  ;;  %v838_v56 = vld [vmem:[%s7736_s0 + $0x1980] sm:$0xff]  ;;  %v839_v19 = vld [vmem:[%s7736_s0 + $0x1988] sm:$0xff]  ;;  %v405_v50 = vld [vmem:[%s7736_s0 + $0xbf8] sm:$0xff] }
 0x15a   :  { %v1314_v9 = vmul.f32 %v3234_v16, %v388_v54  ;;  %v2209_v45 = vadd.f32 %v2208_v30, %v1312_v33  ;;  %v1328_v14 = vmul.f32 %v3201_v1, %v402_v22  ;;  %v1329_v63 = vmul.f32 %v3203_v2, %v403_v24  ;;  %v840_v17 = vld [vmem:[%s7736_s0 + $0x1990] sm:$0xff]  ;;  %v391_v8 = vld [vmem:[%s7736_s0 + $0xb88] sm:$0xff]  ;;  %v406_v54 = vld [vmem:[%s7736_s0 + $0xc00] sm:$0xff] }
 0x15b   :  { %v2665_v18 = vadd.f32 %v2664_v13, %v6487_v48  ;;  %v2618_v55 = vadd.f32 %v2617_v49, %v1682_v0  ;;  %v1762_v42 = vmul.f32 %v3281_v39, %v836_v51  ;;  %v2697_v58 = vadd.f32 %v2696_v44, %v1757_v3  ;;  %v841_v48 = vld [vmem:[%s7736_s0 + $0x1998] sm:$0xff]  ;;  %v392_v22 = vld [vmem:[%s7736_s0 + $0xb90] sm:$0xff]  ;;  %v394_v44 = vld [vmem:[%s7736_s0 + $0xba0] sm:$0xff] }
 0x15c   :  { %v6641_v0 = vmul.f32 %v3283_v40, %v837_v61  ;;  %v1315_v62 = vmul.f32 %v3245_v20, %v389_v4  ;;  %v2210_v47 = vadd.f32 %v2209_v45, %v1313_v59  ;;  %v1330_v3 = vmul.f32 %v3211_v5, %v404_v37  ;;  %v407_v4 = vld [vmem:[%s7736_s0 + $0xc08] sm:$0xff] }
 0x15d   :  { %2666 = vadd.xlane.f32.xlu0 %v2665_v18  ;;  %v2619_v33 = vadd.f32 %v2618_v55, %v6540_v31  ;;  %v6647_v23 = vmul.f32 %v3285_v41, %v838_v56  ;;  %v6650_v34 = vmul.f32 %v3299_v46, %v839_v19  ;;  %v2698_v11 = vadd.f32 %v2697_v58, %v1758_v57  ;;  %v393_v31 = vld [vmem:[%s7736_s0 + $0xb98] sm:$0xff]  ;;  %v395_v37 = vld [vmem:[%s7736_s0 + $0xba8] sm:$0xff]  ;;  %v408_v19 = vld [vmem:[%s7736_s0 + $0xc10] sm:$0xff] }
 0x15e   :  { %v1316_v24 = vmul.f32 %v3247_v21, %v390_v36  ;;  %v2211_v51 = vadd.f32 %v2210_v47, %v1314_v9  ;;  %v1331_v57 = vmul.f32 %v3216_v7, %v405_v50  ;;  %v2227_v59 = vadd.f32 %v1329_v63, %v1328_v14  ;;  %v762_v55 = vld [vmem:[%s7736_s0 + $0x1720] sm:$0xff]  ;;  %v763_v58 = vld [vmem:[%s7736_s0 + $0x1728] sm:$0xff]  ;;  %v396_v36 = vld [vmem:[%s7736_s0 + $0xbb0] sm:$0xff] }
 0x15f   :  { %v2620_v30 = vadd.f32 %v2619_v33, %v6543_v35  ;;  %v6668_v13 = vmul.f32 %v3309_v52, %v840_v17  ;;  %v6671_v49 = vmul.f32 %v3311_v53, %v841_v48  ;;  %v2699_v61 = vadd.f32 %v2698_v11, %v1759_v32  ;;  %v409_v33 = vld [vmem:[%s7736_s0 + $0xc18] sm:$0xff] }
 0x160   :  { %v1317_v35 = vmul.f32 %v3253_v25, %v391_v8  ;;  %v2212_v56 = vadd.f32 %v2211_v51, %v1315_v62  ;;  %v1332_v32 = vmul.f32 %v3226_v12, %v406_v54  ;;  %v2228_v9 = vadd.f32 %v2227_v59, %v1330_v3  ;;  %v764_v8 = vld [vmem:[%s7736_s0 + $0x1730] sm:$0xff]  ;;  %v398_v54 = vld [vmem:[%s7736_s0 + $0xbc0] sm:$0xff] }
 0x161   :  { %v2621_v45 = vadd.f32 %v2620_v30, %v6561_v43  ;;  %v2700_v14 = vadd.f32 %v2699_v61, %v1760_v29  ;;  %v1318_v63 = vmul.f32 %v3255_v26, %v392_v22  ;;  %v1319_v18 = vmul.f32 %v3257_v27, %v393_v31  ;;  %v397_v43 = vld [vmem:[%s7736_s0 + $0xbb8] sm:$0xff]  ;;  %v410_v22 = vld [vmem:[%s7736_s0 + $0xc20] sm:$0xff] }
 0x162   :  { %v1320_v29 = vmul.f32 %v3259_v28, %v394_v44  ;;  %v2213_v50 = vadd.f32 %v2212_v56, %v1316_v24  ;;  %v1333_v17 = vmul.f32 %v3232_v15, %v407_v4  ;;  %v2229_v48 = vadd.f32 %v2228_v9, %v1331_v57  ;;  %v765_v44 = vld [vmem:[%s7736_s0 + $0x1738] sm:$0xff]  ;;  %v400_v4 = vld [vmem:[%s7736_s0 + $0xbd0] sm:$0xff] }
 0x163   :  { %v2622_v62 = vadd.f32 %v2621_v45, %v6564_v6  ;;  %v2701_v47 = vadd.f32 %v2700_v14, %v1761_v60  ;;  %v1321_v3 = vmul.f32 %v3279_v38, %v395_v37  ;;  %v1334_v11 = vmul.f32 %v3234_v16, %v408_v19  ;;  %v399_v6 = vld [vmem:[%s7736_s0 + $0xbc8] sm:$0xff]  ;;  %v401_v37 = vld [vmem:[%s7736_s0 + $0xbd8] sm:$0xff] }
 0x164   :  { %v2214_v60 = vadd.f32 %v2213_v50, %v1317_v35  ;;  %v2230_v31 = vadd.f32 %v2229_v48, %v1332_v32  ;;  %v1688_v24 = vmul.f32 %v3201_v1, %v762_v55  ;;  %v1689_v51 = vmul.f32 %v3203_v2, %v763_v58  ;;  %v412_v58 = vld [vmem:[%s7736_s0 + $0xc30] sm:$0xff] }
 0x165   :  { %v2623_v57 = vadd.f32 %v2622_v62, %v6582_v10  ;;  %v2702_v59 = vadd.f32 %v2701_v47, %v1762_v42  ;;  %v1322_v30 = vmul.f32 %v3281_v39, %v396_v36  ;;  %v6727_v61 = vmul.f32 %v3283_v40, %v397_v43  ;;  %v411_v10 = vld [vmem:[%s7736_s0 + $0xc28] sm:$0xff]  ;;  %v414_v36 = vld [vmem:[%s7736_s0 + $0xc40] sm:$0xff] }
 0x166   :  { %v2215_v35 = vadd.f32 %v2214_v60, %v1318_v63  ;;  %v1335_v42 = vmul.f32 %v3245_v20, %v409_v33  ;;  %v2231_v56 = vadd.f32 %v2230_v31, %v1333_v17  ;;  %v1690_v19 = vmul.f32 %v3211_v5, %v764_v8  ;;  %v766_v63 = vld [vmem:[%s7736_s0 + $0x1740] sm:$0xff]  ;;  %v767_v33 = vld [vmem:[%s7736_s0 + $0x1748] sm:$0xff] }
 0x167   :  { %2624 = vadd.xlane.f32.xlu1 %v2623_v57  ;;  %v2703_v32 = vadd.f32 %v2702_v59, %v6641_v0  ;;  %v6745_v9 = vmul.f32 %v3285_v41, %v398_v54  ;;  %v6748_v45 = vmul.f32 %v3299_v46, %v399_v6  ;;  %v1336_v14 = vmul.f32 %v3247_v21, %v410_v22  ;;  %v413_v0 = vld [vmem:[%s7736_s0 + $0xc38] sm:$0xff]  ;;  %v322_v22 = vld [vmem:[%s7736_s0 + $0x960] sm:$0xff]  ;;  %v323_v57 = vld [vmem:[%s7736_s0 + $0x968] sm:$0xff] }
 0x168   :  { %v2216_v55 = vadd.f32 %v2215_v35, %v1319_v18  ;;  %v2232_v43 = vadd.f32 %v2231_v56, %v1334_v11  ;;  %v1691_v50 = vmul.f32 %v3216_v7, %v765_v44  ;;  %v2626_v17 = vadd.f32 %v1689_v51, %v1688_v24  ;;  %v415_v11 = vld [vmem:[%s7736_s0 + $0xc48] sm:$0xff]  ;;  %v416_v44 = vld [vmem:[%s7736_s0 + $0xc50] sm:$0xff]  ;;  %v770_v56 = vld [vmem:[%s7736_s0 + $0x1760] sm:$0xff] }
 0x169   :  { %v2704_v48 = vadd.f32 %v2703_v32, %v6647_v23  ;;  %v6766_v18 = vmul.f32 %v3309_v52, %v400_v4  ;;  %v6769_v62 = vmul.f32 %v3311_v53, %v401_v37  ;;  %v1337_v47 = vmul.f32 %v3253_v25, %v411_v10  ;;  %v768_v23 = vld [vmem:[%s7736_s0 + $0x1750] sm:$0xff]  ;;  %v417_v4 = vld [vmem:[%s7736_s0 + $0xc58] sm:$0xff] }
 0x16a   :  { %v2217_v8 = vadd.f32 %v2216_v55, %v1320_v29  ;;  %v2233_v54 = vadd.f32 %v2232_v43, %v1335_v42  ;;  %v1692_v6 = vmul.f32 %v3226_v12, %v766_v63  ;;  %v2627_v60 = vadd.f32 %v2626_v17, %v1690_v19  ;;  %v769_v37 = vld [vmem:[%s7736_s0 + $0x1758] sm:$0xff]  ;;  %v324_v32 = vld [vmem:[%s7736_s0 + $0x970] sm:$0xff]  ;;  %v418_v55 = vld [vmem:[%s7736_s0 + $0xc60] sm:$0xff] }
 0x16b   :  { %v2705_v31 = vadd.f32 %v2704_v48, %v6650_v34  ;;  %v1338_v29 = vmul.f32 %v3255_v26, %v412_v58  ;;  %v1339_v24 = vmul.f32 %v3257_v27, %v413_v0  ;;  %v1340_v51 = vmul.f32 %v3259_v28, %v414_v36  ;;  %v325_v36 = vld [vmem:[%s7736_s0 + $0x978] sm:$0xff]  ;;  %v771_v48 = vld [vmem:[%s7736_s0 + $0x1768] sm:$0xff] }
 0x16c   :  { %v2218_v59 = vadd.f32 %v2217_v8, %v1321_v3  ;;  %v2234_v34 = vadd.f32 %v2233_v54, %v1336_v14  ;;  %v1693_v35 = vmul.f32 %v3232_v15, %v767_v33  ;;  %v2628_v10 = vadd.f32 %v2627_v60, %v1691_v50  ;;  %v420_v8 = vld [vmem:[%s7736_s0 + $0xc70] sm:$0xff] }
 0x16d   :  { %v2706_v42 = vadd.f32 %v2705_v31, %v6668_v13  ;;  %v1341_v3 = vmul.f32 %v3279_v38, %v415_v11  ;;  %v1694_v19 = vmul.f32 %v3234_v16, %v768_v23  ;;  %v1248_v14 = vmul.f32 %v3201_v1, %v322_v22  ;;  %v419_v13 = vld [vmem:[%s7736_s0 + $0xc68] sm:$0xff]  ;;  %v326_v23 = vld [vmem:[%s7736_s0 + $0x980] sm:$0xff]  ;;  %v772_v22 = vld [vmem:[%s7736_s0 + $0x1770] sm:$0xff] }
 0x16e   :  { %v2219_v63 = vadd.f32 %v2218_v59, %v1322_v30  ;;  %v2235_v58 = vadd.f32 %v2234_v34, %v1337_v47  ;;  %v2629_v0 = vadd.f32 %v2628_v10, %v1692_v6  ;;  %v1249_v43 = vmul.f32 %v3203_v2, %v323_v57 }
 0x16f   :  { %v2707_v50 = vadd.f32 %v2706_v42, %v6671_v49  ;;  %v1342_v30 = vmul.f32 %v3281_v39, %v416_v44  ;;  %v6825_v17 = vmul.f32 %v3283_v40, %v417_v4  ;;  %v1695_v47 = vmul.f32 %v3245_v20, %v769_v37  ;;  %v421_v49 = vld [vmem:[%s7736_s0 + $0xc78] sm:$0xff]  ;;  %v774_v4 = vld [vmem:[%s7736_s0 + $0x1780] sm:$0xff]  ;;  %v327_v37 = vld [vmem:[%s7736_s0 + $0x988] sm:$0xff] }
 0x170   :  { %v2220_v33 = vadd.f32 %v2219_v63, %v6727_v61  ;;  %v2236_v11 = vadd.f32 %v2235_v58, %v1338_v29  ;;  %v2630_v54 = vadd.f32 %v2629_v0, %v1693_v35  ;;  %v1250_v6 = vmul.f32 %v3211_v5, %v324_v32  ;;  %v773_v44 = vld [vmem:[%s7736_s0 + $0x1778] sm:$0xff]  ;;  %v328_v42 = vld [vmem:[%s7736_s0 + $0x990] sm:$0xff]  ;;  %v423_v58 = vld [vmem:[%s7736_s0 + $0xc88] sm:$0xff] }
 0x171   :  { %2708 = vadd.xlane.f32.xlu2 %v2707_v50  ;;  %v6843_v60 = vmul.f32 %v3285_v41, %v418_v55  ;;  %v6846_v61 = vmul.f32 %v3299_v46, %v419_v13  ;;  %v1696_v31 = vmul.f32 %v3247_v21, %v770_v56  ;;  %v1251_v29 = vmul.f32 %v3216_v7, %v325_v36  ;;  %v422_v13 = vld [vmem:[%s7736_s0 + $0xc80] sm:$0xff]  ;;  %v776_v0 = vld [vmem:[%s7736_s0 + $0x1790] sm:$0xff] }
 0x172   :  { %v2221_v57 = vadd.f32 %v2220_v33, %v6745_v9  ;;  %v2237_v59 = vadd.f32 %v2236_v11, %v1339_v24  ;;  %v2631_v34 = vadd.f32 %v2630_v54, %v1694_v19  ;;  %v2143_v35 = vadd.f32 %v1249_v43, %v1248_v14  ;;  %v775_v14 = vld [vmem:[%s7736_s0 + $0x1788] sm:$0xff]  ;;  %v778_v33 = vld [vmem:[%s7736_s0 + $0x17a0] sm:$0xff]  ;;  %v424_v11 = vld [vmem:[%s7736_s0 + $0xc90] sm:$0xff] }
 0x173   :  { %v6864_v10 = vmul.f32 %v3309_v52, %v420_v8  ;;  %v6867_v9 = vmul.f32 %v3311_v53, %v421_v49  ;;  %v1697_v24 = vmul.f32 %v3253_v25, %v771_v48  ;;  %v1252_v56 = vmul.f32 %v3226_v12, %v326_v23 }
 0x174   :  { %v2222_v19 = vadd.f32 %v2221_v57, %v6748_v45  ;;  %v2238_v32 = vadd.f32 %v2237_v59, %v1340_v51  ;;  %v2632_v63 = vadd.f32 %v2631_v34, %v1695_v47  ;;  %v2144_v55 = vadd.f32 %v2143_v35, %v1250_v6  ;;  %v777_v47 = vld [vmem:[%s7736_s0 + $0x1798] sm:$0xff]  ;;  %v780_v57 = vld [vmem:[%s7736_s0 + $0x17b0] sm:$0xff] }
 0x175   :  { %v1698_v45 = vmul.f32 %v3255_v26, %v772_v22  ;;  %v1699_v51 = vmul.f32 %v3257_v27, %v773_v44  ;;  %v1700_v36 = vmul.f32 %v3259_v28, %v774_v4  ;;  %v1253_v43 = vmul.f32 %v3232_v15, %v327_v37  ;;  %v425_v4 = vld [vmem:[%s7736_s0 + $0xc98] sm:$0xff] }
 0x176   :  { %v2223_v50 = vadd.f32 %v2222_v19, %v6766_v18  ;;  %v2239_v48 = vadd.f32 %v2238_v32, %v1341_v3  ;;  %v2633_v8 = vadd.f32 %v2632_v63, %v1696_v31  ;;  %v2145_v49 = vadd.f32 %v2144_v55, %v1251_v29  ;;  %v329_v18 = vld [vmem:[%s7736_s0 + $0x998] sm:$0xff]  ;;  %v779_v29 = vld [vmem:[%s7736_s0 + $0x17a8] sm:$0xff]  ;;  %v426_v63 = vld [vmem:[%s7736_s0 + $0xca0] sm:$0xff] }
 0x177   :  { %v1701_v54 = vmul.f32 %v3279_v38, %v775_v14  ;;  %v1254_v3 = vmul.f32 %v3234_v16, %v328_v42  ;;  %v1348_v23 = vmul.f32 %v3201_v1, %v422_v13  ;;  %v1349_v6 = vmul.f32 %v3203_v2, %v423_v58  ;;  %v781_v42 = vld [vmem:[%s7736_s0 + $0x17b8] sm:$0xff]  ;;  %v331_v19 = vld [vmem:[%s7736_s0 + $0x9a8] sm:$0xff]  ;;  %v332_v13 = vld [vmem:[%s7736_s0 + $0x9b0] sm:$0xff] }
 0x178   :  { %v2224_v22 = vadd.f32 %v2223_v50, %v6769_v62  ;;  %v2240_v31 = vadd.f32 %v2239_v48, %v1342_v30  ;;  %v2634_v59 = vadd.f32 %v2633_v8, %v1697_v24  ;;  %v2146_v44 = vadd.f32 %v2145_v49, %v1252_v56  ;;  %v330_v30 = vld [vmem:[%s7736_s0 + $0x9a0] sm:$0xff]  ;;  %v333_v50 = vld [vmem:[%s7736_s0 + $0x9b8] sm:$0xff]  ;;  %v427_v8 = vld [vmem:[%s7736_s0 + $0xca8] sm:$0xff] }
 0x179   :  { %v1702_v34 = vmul.f32 %v3281_v39, %v776_v0  ;;  %v6920_v37 = vmul.f32 %v3283_v40, %v777_v47  ;;  %v6923_v62 = vmul.f32 %v3285_v41, %v778_v33  ;;  %v1350_v35 = vmul.f32 %v3211_v5, %v424_v11  ;;  %v334_v48 = vld [vmem:[%s7736_s0 + $0x9c0] sm:$0xff] }
 0x17a   :  { %2225 = vadd.xlane.f32.xlu0 %v2224_v22  ;;  %v2241_v24 = vadd.f32 %v2240_v31, %v6825_v17  ;;  %v2635_v56 = vadd.f32 %v2634_v59, %v1698_v45  ;;  %v1255_v32 = vmul.f32 %v3245_v20, %v329_v18  ;;  %v2147_v14 = vadd.f32 %v2146_v44, %v1253_v43  ;;  %v428_v31 = vld [vmem:[%s7736_s0 + $0xcb0] sm:$0xff] }
 0x17b   :  { %v6941_v55 = vmul.f32 %v3299_v46, %v779_v29  ;;  %v6944_v17 = vmul.f32 %v3309_v52, %v780_v57  ;;  %v1351_v58 = vmul.f32 %v3216_v7, %v425_v4  ;;  %v2248_v0 = vadd.f32 %v1349_v6, %v1348_v23  ;;  %v842_v29 = vld [vmem:[%s7736_s0 + $0x19a0] sm:$0xff]  ;;  %v843_v57 = vld [vmem:[%s7736_s0 + $0x19a8] sm:$0xff] }
 0x17c   :  { %v2242_v45 = vadd.f32 %v2241_v24, %v6843_v60  ;;  %v2636_v43 = vadd.f32 %v2635_v56, %v1699_v51  ;;  %v1256_v47 = vmul.f32 %v3247_v21, %v330_v30  ;;  %v2148_v33 = vadd.f32 %v2147_v14, %v1254_v3  ;;  %v335_v60 = vld [vmem:[%s7736_s0 + $0x9c8] sm:$0xff]  ;;  %v337_v24 = vld [vmem:[%s7736_s0 + $0x9d8] sm:$0xff] }
 0x17d   :  { %v6962_v49 = vmul.f32 %v3311_v53, %v781_v42  ;;  %v1257_v51 = vmul.f32 %v3253_v25, %v331_v19  ;;  %v1352_v11 = vmul.f32 %v3226_v12, %v426_v63  ;;  %v2249_v18 = vadd.f32 %v2248_v0, %v1350_v35  ;;  %v429_v19 = vld [vmem:[%s7736_s0 + $0xcb8] sm:$0xff] }
 0x17e   :  { %v2243_v23 = vadd.f32 %v2242_v45, %v6846_v61  ;;  %v2637_v6 = vadd.f32 %v2636_v43, %v1700_v36  ;;  %v1258_v3 = vmul.f32 %v3255_v26, %v332_v13  ;;  %v2149_v22 = vadd.f32 %v2148_v33, %v1255_v32  ;;  %v336_v61 = vld [vmem:[%s7736_s0 + $0x9d0] sm:$0xff] }
 0x17f   :  { %v1259_v36 = vmul.f32 %v3257_v27, %v333_v50  ;;  %v1260_v59 = vmul.f32 %v3259_v28, %v334_v48  ;;  %v1353_v44 = vmul.f32 %v3232_v15, %v427_v8  ;;  %v2250_v4 = vadd.f32 %v2249_v18, %v1351_v58  ;;  %v844_v32 = vld [vmem:[%s7736_s0 + $0x19b0] sm:$0xff]  ;;  %v430_v48 = vld [vmem:[%s7736_s0 + $0xcc0] sm:$0xff] }
 0x180   :  { %v2244_v30 = vadd.f32 %v2243_v23, %v6864_v10  ;;  %v2638_v35 = vadd.f32 %v2637_v6, %v1701_v54  ;;  %v1261_v42 = vmul.f32 %v3279_v38, %v335_v60  ;;  %v2150_v56 = vadd.f32 %v2149_v22, %v1256_v47  ;;  %v338_v10 = vld [vmem:[%s7736_s0 + $0x9e0] sm:$0xff]  ;;  %v339_v54 = vld [vmem:[%s7736_s0 + $0x9e8] sm:$0xff]  ;;  %v845_v47 = vld [vmem:[%s7736_s0 + $0x19b8] sm:$0xff] }
 0x181   :  { %v1354_v14 = vmul.f32 %v3234_v16, %v428_v31  ;;  %v2251_v63 = vadd.f32 %v2250_v4, %v1352_v11  ;;  %v1768_v13 = vmul.f32 %v3201_v1, %v842_v29  ;;  %v1769_v58 = vmul.f32 %v3203_v2, %v843_v57  ;;  %v340_v33 = vld [vmem:[%s7736_s0 + $0x9f0] sm:$0xff]  ;;  %v431_v22 = vld [vmem:[%s7736_s0 + $0xcc8] sm:$0xff]  ;;  %v846_v31 = vld [vmem:[%s7736_s0 + $0x19c0] sm:$0xff] }
 0x182   :  { %v2245_v0 = vadd.f32 %v2244_v30, %v6867_v9  ;;  %v2639_v45 = vadd.f32 %v2638_v35, %v1702_v34  ;;  %v1262_v43 = vmul.f32 %v3281_v39, %v336_v61  ;;  %v2151_v50 = vadd.f32 %v2150_v56, %v1257_v51  ;;  %v341_v9 = vld [vmem:[%s7736_s0 + $0x9f8] sm:$0xff]  ;;  %v432_v29 = vld [vmem:[%s7736_s0 + $0xcd0] sm:$0xff]  ;;  %v434_v56 = vld [vmem:[%s7736_s0 + $0xce0] sm:$0xff] }
 0x183   :  { %v7021_v34 = vmul.f32 %v3283_v40, %v337_v24  ;;  %v1355_v8 = vmul.f32 %v3245_v20, %v429_v19  ;;  %v2252_v60 = vadd.f32 %v2251_v63, %v1353_v44  ;;  %v1770_v51 = vmul.f32 %v3211_v5, %v844_v32  ;;  %v847_v19 = vld [vmem:[%s7736_s0 + $0x19c8] sm:$0xff] }
 0x184   :  { %2246 = vadd.xlane.f32.xlu1 %v2245_v0  ;;  %v2640_v11 = vadd.f32 %v2639_v45, %v6920_v37  ;;  %v7027_v18 = vmul.f32 %v3285_v41, %v338_v10  ;;  %v7030_v23 = vmul.f32 %v3299_v46, %v339_v54  ;;  %v2152_v6 = vadd.f32 %v2151_v50, %v1258_v3  ;;  %v433_v37 = vld [vmem:[%s7736_s0 + $0xcd8] sm:$0xff]  ;;  %v435_v32 = vld [vmem:[%s7736_s0 + $0xce8] sm:$0xff]  ;;  %v848_v54 = vld [vmem:[%s7736_s0 + $0x19d0] sm:$0xff] }
 0x185   :  { %v1356_v57 = vmul.f32 %v3247_v21, %v430_v48  ;;  %v2253_v61 = vadd.f32 %v2252_v60, %v1354_v14  ;;  %v1771_v3 = vmul.f32 %v3216_v7, %v845_v47  ;;  %v2710_v44 = vadd.f32 %v1769_v58, %v1768_v13  ;;  %v862_v45 = vld [vmem:[%s7736_s0 + $0x1a40] sm:$0xff]  ;;  %v863_v50 = vld [vmem:[%s7736_s0 + $0x1a48] sm:$0xff]  ;;  %v436_v48 = vld [vmem:[%s7736_s0 + $0xcf0] sm:$0xff] }
 0x186   :  { %v2641_v4 = vadd.f32 %v2640_v11, %v6923_v62  ;;  %v7048_v30 = vmul.f32 %v3309_v52, %v340_v33  ;;  %v7051_v35 = vmul.f32 %v3311_v53, %v341_v9  ;;  %v2153_v24 = vadd.f32 %v2152_v6, %v1259_v36  ;;  %v849_v11 = vld [vmem:[%s7736_s0 + $0x19d8] sm:$0xff] }
 0x187   :  { %v1357_v62 = vmul.f32 %v3253_v25, %v431_v22  ;;  %v2254_v10 = vadd.f32 %v2253_v61, %v1355_v8  ;;  %v1772_v36 = vmul.f32 %v3226_v12, %v846_v31  ;;  %v2711_v14 = vadd.f32 %v2710_v44, %v1770_v51  ;;  %v864_v22 = vld [vmem:[%s7736_s0 + $0x1a50] sm:$0xff]  ;;  %v438_v31 = vld [vmem:[%s7736_s0 + $0xd00] sm:$0xff] }
 0x188   :  { %v2642_v63 = vadd.f32 %v2641_v4, %v6941_v55  ;;  %v2154_v13 = vadd.f32 %v2153_v24, %v1260_v59  ;;  %v1358_v58 = vmul.f32 %v3255_v26, %v432_v29  ;;  %v1359_v0 = vmul.f32 %v3257_v27, %v433_v37  ;;  %v437_v55 = vld [vmem:[%s7736_s0 + $0xcf8] sm:$0xff]  ;;  %v850_v29 = vld [vmem:[%s7736_s0 + $0x19e0] sm:$0xff] }
 0x189   :  { %v1360_v59 = vmul.f32 %v3259_v28, %v434_v56  ;;  %v2255_v47 = vadd.f32 %v2254_v10, %v1356_v57  ;;  %v1773_v33 = vmul.f32 %v3232_v15, %v847_v19  ;;  %v2712_v9 = vadd.f32 %v2711_v14, %v1771_v3  ;;  %v865_v56 = vld [vmem:[%s7736_s0 + $0x1a58] sm:$0xff]  ;;  %v440_v19 = vld [vmem:[%s7736_s0 + $0xd10] sm:$0xff] }
 0x18a   :  { %v2643_v8 = vadd.f32 %v2642_v63, %v6944_v17  ;;  %v2155_v60 = vadd.f32 %v2154_v13, %v1261_v42  ;;  %v1361_v51 = vmul.f32 %v3279_v38, %v435_v32  ;;  %v1774_v6 = vmul.f32 %v3234_v16, %v848_v54  ;;  %v439_v17 = vld [vmem:[%s7736_s0 + $0xd08] sm:$0xff]  ;;  %v441_v32 = vld [vmem:[%s7736_s0 + $0xd18] sm:$0xff] }
 0x18b   :  { %v2256_v42 = vadd.f32 %v2255_v47, %v1357_v62  ;;  %v2713_v37 = vadd.f32 %v2712_v9, %v1772_v36  ;;  %v1788_v57 = vmul.f32 %v3201_v1, %v862_v45  ;;  %v1789_v61 = vmul.f32 %v3203_v2, %v863_v50  ;;  %v852_v50 = vld [vmem:[%s7736_s0 + $0x19f0] sm:$0xff] }
 0x18c   :  { %v2644_v3 = vadd.f32 %v2643_v8, %v6962_v49  ;;  %v2156_v44 = vadd.f32 %v2155_v60, %v1262_v43  ;;  %v1362_v4 = vmul.f32 %v3281_v39, %v436_v48  ;;  %v7107_v24 = vmul.f32 %v3283_v40, %v437_v55  ;;  %v851_v49 = vld [vmem:[%s7736_s0 + $0x19e8] sm:$0xff]  ;;  %v854_v48 = vld [vmem:[%s7736_s0 + $0x1a00] sm:$0xff] }
 0x18d   :  { %v2257_v62 = vadd.f32 %v2256_v42, %v1358_v58  ;;  %v1775_v43 = vmul.f32 %v3245_v20, %v849_v11  ;;  %v2714_v10 = vadd.f32 %v2713_v37, %v1773_v33  ;;  %v1790_v54 = vmul.f32 %v3211_v5, %v864_v22  ;;  %v866_v58 = vld [vmem:[%s7736_s0 + $0x1a60] sm:$0xff]  ;;  %v867_v11 = vld [vmem:[%s7736_s0 + $0x1a68] sm:$0xff] }
 0x18e   :  { %2645 = vadd.xlane.f32.xlu2 %v2644_v3  ;;  %v2157_v36 = vadd.f32 %v2156_v44, %v7021_v34  ;;  %v1364_v14 = vmul.f32 %v3285_v41, %v438_v31  ;;  %v7126_v63 = vmul.f32 %v3299_v46, %v439_v17  ;;  %v1776_v13 = vmul.f32 %v3247_v21, %v850_v29  ;;  %v853_v34 = vld [vmem:[%s7736_s0 + $0x19f8] sm:$0xff]  ;;  %v868_v3 = vld [vmem:[%s7736_s0 + $0x1a70] sm:$0xff] }
 0x18f   :  { %v2258_v45 = vadd.f32 %v2257_v62, %v1359_v0  ;;  %v2715_v55 = vadd.f32 %v2714_v10, %v1774_v6  ;;  %v1791_v47 = vmul.f32 %v3216_v7, %v865_v56  ;;  %v2731_v33 = vadd.f32 %v1789_v61, %v1788_v57  ;;  %v855_v6 = vld [vmem:[%s7736_s0 + $0x1a08] sm:$0xff]  ;;  %v857_v31 = vld [vmem:[%s7736_s0 + $0x1a18] sm:$0xff]  ;;  %v882_v62 = vld [vmem:[%s7736_s0 + $0x1ae0] sm:$0x7] }
 0x190   :  { %v2158_v9 = vadd.f32 %v2157_v36, %v7027_v18  ;;  %v7144_v0 = vmul.f32 %v3309_v52, %v440_v19  ;;  %v7147_v8 = vmul.f32 %v3311_v53, %v441_v32  ;;  %v1777_v60 = vmul.f32 %v3253_v25, %v851_v49  ;;  %v856_v18 = vld [vmem:[%s7736_s0 + $0x1a10] sm:$0xff]  ;;  %v869_v36 = vld [vmem:[%s7736_s0 + $0x1a78] sm:$0xff] }
 0x191   :  { %v2259_v22 = vadd.f32 %v2258_v45, %v1360_v59  ;;  %v2716_v17 = vadd.f32 %v2715_v55, %v1775_v43  ;;  %v1792_v42 = vmul.f32 %v3226_v12, %v866_v58  ;;  %v2732_v29 = vadd.f32 %v2731_v33, %v1790_v54  ;;  %v884_v49 = vld [vmem:[%s7736_s0 + $0x1af0] sm:$0x7]  ;;  %v885_v55 = vld [vmem:[%s7736_s0 + $0x1af8] sm:$0x7] }
 0x192   :  { %v2159_v37 = vadd.f32 %v2158_v9, %v7030_v23  ;;  %v1778_v59 = vmul.f32 %v3255_v26, %v852_v50  ;;  %v1779_v57 = vmul.f32 %v3257_v27, %v853_v34  ;;  %v1780_v61 = vmul.f32 %v3259_v28, %v854_v48  ;;  %v883_v23 = vld [vmem:[%s7736_s0 + $0x1ae8] sm:$0x7] }
 0x193   :  { %v2260_v44 = vadd.f32 %v2259_v22, %v1361_v51  ;;  %v2717_v56 = vadd.f32 %v2716_v17, %v1776_v13  ;;  %v1793_v19 = vmul.f32 %v3232_v15, %v867_v11  ;;  %v2733_v32 = vadd.f32 %v2732_v29, %v1791_v47  ;;  %v870_v13 = vld [vmem:[%s7736_s0 + $0x1a80] sm:$0xff]  ;;  %v871_v50 = vld [vmem:[%s7736_s0 + $0x1a88] sm:$0xff] }
 0x194   :  { %v2160_v43 = vadd.f32 %v2159_v37, %v7048_v30  ;;  %v1781_v51 = vmul.f32 %v3279_v38, %v855_v6  ;;  %v1782_v10 = vmul.f32 %v3281_v39, %v856_v18  ;;  %v7184_v54 = vmul.f32 %v3283_v40, %v857_v31  ;;  %v858_v30 = vld [vmem:[%s7736_s0 + $0x1a20] sm:$0xff] }
 0x195   :  { %v2261_v58 = vadd.f32 %v2260_v44, %v1362_v4  ;;  %v2718_v45 = vadd.f32 %v2717_v56, %v1777_v60  ;;  %v1794_v34 = vmul.f32 %v3234_v16, %v868_v3  ;;  %v2734_v48 = vadd.f32 %v2733_v32, %v1792_v42  ;;  %v886_v18 = vld [vmem:[%s7736_s0 + $0x1b00] sm:$0x7]  ;;  %v887_v44 = vld [vmem:[%s7736_s0 + $0x1b08] sm:$0x7] }
 0x196   :  { %v2161_v47 = vadd.f32 %v2160_v43, %v7051_v35  ;;  %v1808_v4 = vmul.f32 %v3201_v1, %v882_v62  ;;  %v1809_v33 = vmul.f32 %v3203_v2, %v883_v23  ;;  %v1810_v9 = vmul.f32 %v3211_v5, %v884_v49  ;;  %v860_v62 = vld [vmem:[%s7736_s0 + $0x1a30] sm:$0xff]  ;;  %v873_v49 = vld [vmem:[%s7736_s0 + $0x1a98] sm:$0xff] }
 0x197   :  { %v2262_v60 = vadd.f32 %v2261_v58, %v7107_v24  ;;  %v2719_v11 = vadd.f32 %v2718_v45, %v1778_v59  ;;  %v1795_v22 = vmul.f32 %v3245_v20, %v869_v36  ;;  %v2735_v6 = vadd.f32 %v2734_v48, %v1793_v19  ;;  %v859_v24 = vld [vmem:[%s7736_s0 + $0x1a28] sm:$0xff]  ;;  %v872_v59 = vld [vmem:[%s7736_s0 + $0x1a90] sm:$0xff]  ;;  %v874_v48 = vld [vmem:[%s7736_s0 + $0x1aa0] sm:$0xff] }
 0x198   :  { %2162 = vadd.xlane.f32.xlu0 %v2161_v47  ;;  %v7212_v31 = vmul.f32 %v3285_v41, %v858_v30  ;;  %v1796_v35 = vmul.f32 %v3247_v21, %v870_v13  ;;  %v1797_v17 = vmul.f32 %v3253_v25, %v871_v50  ;;  %v1811_v42 = vmul.f32 %v3216_v7, %v885_v55  ;;  %v888_v36 = vld [vmem:[%s7736_s0 + $0x1b10] sm:$0x7]  ;;  %v861_v50 = vld [vmem:[%s7736_s0 + $0x1a38] sm:$0xff] }
 0x199   :  { %v2263_v29 = vadd.f32 %v2262_v60, %v1364_v14  ;;  %v2720_v37 = vadd.f32 %v2719_v11, %v1779_v57  ;;  %v2736_v3 = vadd.f32 %v2735_v6, %v1794_v34  ;;  %vm2269_vm0 = vcmask 1042432   ;;  %v889_v47 = vld [vmem:[%s7736_s0 + $0x1b18] sm:$0x7]  ;;  %v876_v6 = vld [vmem:[%s7736_s0 + $0x1ab0] sm:$0xff] }
 0x19a   :  { %v1812_v56 = vmul.f32 %v3226_v12, %v886_v18  ;;  %v2752_v19 = vsel %vm2269_vm0, %v1808_v4, 0.0  ;;  %v2753_v14 = vsel %vm2269_vm0, %v1809_v33, 0.0  ;;  %v2755_v32 = vsel %vm2269_vm0, %v1810_v9, 0.0  ;;  %v877_v18 = vld [vmem:[%s7736_s0 + $0x1ab8] sm:$0xff] }
 0x19b   :  { %v2264_v57 = vadd.f32 %v2263_v29, %v7126_v63  ;;  %v2721_v23 = vadd.f32 %v2720_v37, %v1780_v61  ;;  %v2737_v43 = vadd.f32 %v2736_v3, %v1795_v22  ;;  %v2754_v13 = vadd.f32 %v2753_v14, %v2752_v19  ;;  %v879_v3 = vld [vmem:[%s7736_s0 + $0x1ac8] sm:$0xff] }
 0x19c   :  { %v1785_v58 = vmul.f32 %v3299_v46, %v859_v24  ;;  %v1798_v30 = vmul.f32 %v3255_v26, %v872_v59  ;;  %v1813_v63 = vmul.f32 %v3232_v15, %v887_v44  ;;  %v2757_v45 = vsel %vm2269_vm0, %v1811_v42, 0.0  ;;  %v890_v42 = vld [vmem:[%s7736_s0 + $0x1b20] sm:$0x7]  ;;  %v880_v44 = vld [vmem:[%s7736_s0 + $0x1ad0] sm:$0xff]  ;;  %v891_v14 = vld [vmem:[%s7736_s0 + $0x1b28] sm:$0x7] }
 0x19d   :  { %v2265_v61 = vadd.f32 %v2264_v57, %v7144_v0  ;;  %v2722_v34 = vadd.f32 %v2721_v23, %v1781_v51  ;;  %v2738_v55 = vadd.f32 %v2737_v43, %v1796_v35  ;;  %v2756_v4 = vadd.f32 %v2755_v32, %v2754_v13  ;;  %v875_v0 = vld [vmem:[%s7736_s0 + $0x1aa8] sm:$0xff] }
 0x19e   :  { %v1786_v33 = vmul.f32 %v3309_v52, %v860_v62  ;;  %v1799_v9 = vmul.f32 %v3257_v27, %v873_v49  ;;  %v1814_v51 = vmul.f32 %v3234_v16, %v888_v36  ;;  %v2759_v60 = vsel %vm2269_vm0, %v1812_v56, 0.0 }
 0x19f   :  { %v2266_v11 = vadd.f32 %v2265_v61, %v7147_v8  ;;  %v2723_v22 = vadd.f32 %v2722_v34, %v1782_v10  ;;  %v2739_v35 = vadd.f32 %v2738_v55, %v1797_v17  ;;  %v2758_v29 = vadd.f32 %v2757_v45, %v2756_v4  ;;  %v878_v8 = vld [vmem:[%s7736_s0 + $0x1ac0] sm:$0xff]  ;;  %v443_v61 = vld [vmem:[%s7736_s0 + $0xd28] sm:$0x7]  ;;  %v444_v55 = vld [vmem:[%s7736_s0 + $0xd30] sm:$0x7] }
 0x1a0   :  { %v1787_v24 = vmul.f32 %v3311_v53, %v861_v50  ;;  %v1800_v10 = vmul.f32 %v3259_v28, %v874_v48  ;;  %v1815_v37 = vmul.f32 %v3245_v20, %v889_v47  ;;  %v2761_v59 = vsel %vm2269_vm0, %v1813_v63, 0.0  ;;  %v442_v45 = vld [vmem:[%s7736_s0 + $0xd20] sm:$0x7] }
 0x1a1   :  { %2267 = vadd.xlane.f32.xlu1 %v2266_v11  ;;  %v2724_v17 = vadd.f32 %v2723_v22, %v7184_v54  ;;  %v1801_v56 = vmul.f32 %v3279_v38, %v875_v0  ;;  %v2740_v19 = vadd.f32 %v2739_v35, %v1798_v30  ;;  %v2760_v32 = vadd.f32 %v2759_v60, %v2758_v29  ;;  %v881_v54 = vld [vmem:[%s7736_s0 + $0x1ad8] sm:$0xff]  ;;  %v892_v30 = vld [vmem:[%s7736_s0 + $0x1b30] sm:$0x7]  ;;  %v895_v60 = vld [vmem:[%s7736_s0 + $0x1b48] sm:$0x7] }
 0x1a2   :  { %v1802_v57 = vmul.f32 %v3281_v39, %v876_v6  ;;  %v1803_v62 = vmul.f32 %v3283_v40, %v877_v18  ;;  %v1816_v23 = vmul.f32 %v3247_v21, %v890_v42  ;;  %v2763_v49 = vsel %vm2269_vm0, %v1814_v51, 0.0  ;;  %v894_v51 = vld [vmem:[%s7736_s0 + $0x1b40] sm:$0x7]  ;;  %v445_v6 = vld [vmem:[%s7736_s0 + $0xd38] sm:$0x7] }
 0x1a3   :  { %v2725_v43 = vadd.f32 %v2724_v17, %v7212_v31  ;;  %v1804_v36 = vmul.f32 %v3285_v41, %v878_v8  ;;  %v2741_v13 = vadd.f32 %v2740_v19, %v1799_v9  ;;  %v2762_v63 = vadd.f32 %v2761_v59, %v2760_v32  ;;  %v893_v9 = vld [vmem:[%s7736_s0 + $0x1b38] sm:$0x7]  ;;  %v896_v8 = vld [vmem:[%s7736_s0 + $0x1b50] sm:$0x7]  ;;  %v898_v19 = vld [vmem:[%s7736_s0 + $0x1b60] sm:$0x7] }
 0x1a4   :  { %v1805_v50 = vmul.f32 %v3299_v46, %v879_v3  ;;  %v7309_v31 = vmul.f32 %v3309_v52, %v880_v44  ;;  %v1817_v34 = vmul.f32 %v3253_v25, %v891_v14  ;;  %v2765_v48 = vsel %vm2269_vm0, %v1815_v37, 0.0  ;;  %v446_v37 = vld [vmem:[%s7736_s0 + $0xd40] sm:$0x7] }
 0x1a5   :  { %v2726_v47 = vadd.f32 %v2725_v43, %v1785_v58  ;;  %v7317_v4 = vmul.f32 %v3311_v53, %v881_v54  ;;  %v2742_v0 = vadd.f32 %v2741_v13, %v1800_v10  ;;  %v2764_v11 = vadd.f32 %v2763_v49, %v2762_v63  ;;  %v899_v43 = vld [vmem:[%s7736_s0 + $0x1b68] sm:$0x7] }
 0x1a6   :  { %v1818_v22 = vmul.f32 %v3255_v26, %v892_v30  ;;  %v2767_v58 = vsel %vm2269_vm0, %v1816_v23, 0.0  ;;  %v1368_v18 = vmul.f32 %v3201_v1, %v442_v45  ;;  %v1369_v35 = vmul.f32 %v3203_v2, %v443_v61 }
 0x1a7   :  { %v2727_v42 = vadd.f32 %v2726_v47, %v1786_v33  ;;  %v2743_v29 = vadd.f32 %v2742_v0, %v1801_v56  ;;  %v2766_v10 = vadd.f32 %v2765_v48, %v2764_v11  ;;  %v1370_v59 = vmul.f32 %v3211_v5, %v444_v55  ;;  %v897_v56 = vld [vmem:[%s7736_s0 + $0x1b58] sm:$0x7] }
 0x1a8   :  { %v1819_v17 = vmul.f32 %v3257_v27, %v893_v9  ;;  %v1820_v3 = vmul.f32 %v3259_v28, %v894_v51  ;;  %v1821_v1 = vmul.f32 %v3279_v38, %v895_v60  ;;  %v2769_v2 = vsel %vm2269_vm0, %v1817_v34, 0.0  ;;  %v901_v55 = vld [vmem:[%s7736_s0 + $0x1b78] sm:$0x7] }
 0x1a9   :  { %v2728_v33 = vadd.f32 %v2727_v42, %v1787_v24  ;;  %v2744_v44 = vadd.f32 %v2743_v29, %v1802_v57  ;;  %v2768_v14 = vadd.f32 %v2767_v58, %v2766_v10  ;;  %v1371_v5 = vmul.f32 %v3216_v7, %v445_v6  ;;  %v447_v24 = vld [vmem:[%s7736_s0 + $0xd48] sm:$0x7]  ;;  %v900_v7 = vld [vmem:[%s7736_s0 + $0x1b70] sm:$0x7] }
 0x1aa   :  { %v1822_v32 = vmul.f32 %v3281_v39, %v896_v8  ;;  %v2771_v54 = vsel %vm2269_vm0, %v1818_v22, 0.0  ;;  %v1372_v57 = vmul.f32 %v3226_v12, %v446_v37  ;;  %v2270_v23 = vsel %vm2269_vm0, %v1368_v18, 0.0  ;;  %v449_v22 = vld [vmem:[%s7736_s0 + $0xd58] sm:$0x7]  ;;  %v450_v18 = vld [vmem:[%s7736_s0 + $0xd60] sm:$0x7] }
 0x1ab   :  { %2729 = vadd.xlane.f32.xlu0 %v2728_v33  ;;  %v2745_v49 = vadd.f32 %v2744_v44, %v1803_v62  ;;  %v2770_v13 = vadd.f32 %v2769_v2, %v2768_v14  ;;  %v2271_v30 = vsel %vm2269_vm0, %v1369_v35, 0.0  ;;  %v2273_v63 = vsel %vm2269_vm0, %v1370_v59, 0.0  ;;  %v448_v62 = vld [vmem:[%s7736_s0 + $0xd50] sm:$0x7]  ;;  %v2331_v44 = vpop.xlane.xlu1 %2330 }
 0x1ac   :  { %v1823_v45 = vmul.f32 %v3283_v40, %v897_v56  ;;  %v1824_v12 = vmul.f32 %v3285_v41, %v898_v19  ;;  %v2773_v61 = vsel %vm2269_vm0, %v1819_v17, 0.0  ;;  %v2272_v34 = vadd.f32 %v2271_v30, %v2270_v23  ;;  %v1890_v56 = vpop.xlane.xlu2 %1889 }
 0x1ad   :  { %v2746_v48 = vadd.f32 %v2745_v49, %v1804_v36  ;;  %v2772_v47 = vadd.f32 %v2771_v54, %v2770_v13  ;;  %v1373_v0 = vmul.f32 %v3232_v15, %v447_v24  ;;  %v2275_v9 = vsel %vm2269_vm0, %v1371_v5, 0.0  ;;  %v454_v5 = vld [vmem:[%s7736_s0 + $0xd80] sm:$0x7]  ;;  %v1848_v54 = vpop.xlane.xlu0 %1847 }
 0x1ae   :  { %v1825_v51 = vmul.f32 %v3299_v46, %v899_v43  ;;  %v1826_v60 = vmul.f32 %v3309_v52, %v900_v7  ;;  %v2775_v11 = vsel %vm2269_vm0, %v1820_v3, 0.0  ;;  %v2274_v36 = vadd.f32 %v2273_v63, %v2272_v34  ;;  %v456_v7 = vld [vmem:[%s7736_s0 + $0xd90] sm:$0x7] }
 0x1af   :  { %v2747_v58 = vadd.f32 %v2746_v48, %v1805_v50  ;;  %v2774_v6 = vadd.f32 %v2773_v61, %v2772_v47  ;;  %v1374_v15 = vmul.f32 %v3234_v16, %v448_v62  ;;  %v2277_v35 = vsel %vm2269_vm0, %v1372_v57, 0.0  ;;  %v451_v50 = vld [vmem:[%s7736_s0 + $0xd68] sm:$0x7] }
 0x1b0   :  { %v1827_v42 = vmul.f32 %v3311_v53, %v901_v55  ;;  %v2777_v29 = vsel %vm2269_vm0, %v1821_v1, 0.0  ;;  %v2779_v8 = vsel %vm2269_vm0, %v1822_v32, 0.0  ;;  %v2276_v10 = vadd.f32 %v2275_v9, %v2274_v36  ;;  %v452_v1 = vld [vmem:[%s7736_s0 + $0xd70] sm:$0x7]  ;;  %v455_v57 = vld [vmem:[%s7736_s0 + $0xd88] sm:$0x7] }
 0x1b1   :  { %v2748_v37 = vadd.f32 %v2747_v58, %v7309_v31  ;;  %v2776_v59 = vadd.f32 %v2775_v11, %v2774_v6  ;;  %v1375_v17 = vmul.f32 %v3245_v20, %v449_v22  ;;  %v2279_v16 = vsel %vm2269_vm0, %v1373_v0, 0.0  ;;  %v453_v20 = vld [vmem:[%s7736_s0 + $0xd78] sm:$0x7] }
 0x1b2   :  { %v2781_v3 = vsel %vm2269_vm0, %v1823_v45, 0.0  ;;  %v2783_v2 = vsel %vm2269_vm0, %v1824_v12, 0.0  ;;  %v1376_v33 = vmul.f32 %v3247_v21, %v450_v18  ;;  %v2278_v31 = vadd.f32 %v2277_v35, %v2276_v10 }
 0x1b3   :  { %v2749_v19 = vadd.f32 %v2748_v37, %v7317_v4  ;;  %v2778_v14 = vadd.f32 %v2777_v29, %v2776_v59  ;;  %v2281_v32 = vsel %vm2269_vm0, %v1374_v15, 0.0  ;;  %v7416_v21 = vstv %s7738_s2  ;;  %v2352_v58 = vpop.xlane.xlu1 %2351  ;;  %s3126_s2 = sshll.u32 %s3167_s8, 4  ;;  %s3127_s2 = int_to_ptr.vmem [resolvable:$true] %s3126_s2 }
 0x1b4   :  { %v2785_v24 = vsel %vm2269_vm0, %v1825_v51, 0.0  ;;  %v2787_v4 = vsel %vm2269_vm0, %v1826_v60, 0.0  ;;  %v1377_v23 = vmul.f32 %v3253_v25, %v451_v50  ;;  %v2280_v49 = vadd.f32 %v2279_v16, %v2278_v31  ;;  %v458_v31 = vld [vmem:[%s7736_s0 + $0xda0] sm:$0x7] }
 0x1b5   :  { %2750 = vadd.xlane.f32.xlu2 %v2749_v19  ;;  %v2780_v43 = vadd.f32 %v2779_v8, %v2778_v14  ;;  %v1378_v13 = vmul.f32 %v3255_v26, %v452_v1  ;;  %v2283_v30 = vsel %vm2269_vm0, %v1375_v17, 0.0  ;;  %v2953_v63 = vlaneseq }
 0x1b6   :  { %v1379_v45 = vmul.f32 %v3257_v27, %v453_v20  ;;  %v1380_v12 = vmul.f32 %v3259_v28, %v454_v5  ;;  %v2282_v61 = vadd.f32 %v2281_v32, %v2280_v49  ;;  %v2817_v62 = vadd.f32 %v7416_v21, %v2331_v44 }
 0x1b7   :  { %v2782_v25 = vadd.f32 %v2781_v3, %v2780_v43  ;;  %v2789_v34 = vsel %vm2269_vm0, %v1827_v42, 0.0  ;;  %v1381_v48 = vmul.f32 %v3279_v38, %v455_v57  ;;  %v2285_v55 = vsel %vm2269_vm0, %v1376_v33, 0.0  ;;  %v1869_v42 = vpop.xlane.xlu0 %1868  ;;  %v457_v3 = vld [vmem:[%s7736_s0 + $0xd98] sm:$0x7]  ;;  %v459_v57 = vld [vmem:[%s7736_s0 + $0xda8] sm:$0x7] }
 0x1b8   :  { %v1382_v47 = vmul.f32 %v3281_v39, %v456_v7  ;;  %v2284_v26 = vadd.f32 %v2283_v30, %v2282_v61  ;;  %v2797_v0 = vadd.f32 %v7416_v21, %v1890_v56  ;;  %v2795_v9 = vadd.f32 %v7416_v21, %v1848_v54  ;;  %v2373_v39 = vpop.xlane.xlu2 %2372 }
 0x1b9   :  { %v2784_v27 = vadd.f32 %v2783_v2, %v2782_v25  ;;  %v2287_v28 = vsel %vm2269_vm0, %v1377_v23, 0.0  ;;  %v2289_v51 = vsel %vm2269_vm0, %v1378_v13, 0.0  ;;  %v7440_v60 = vand.u32 127, %v2953_v63 }
 0x1ba   :  { %v2286_v11 = vadd.f32 %v2285_v55, %v2284_v26  ;;  %v2291_v22 = vsel %vm2269_vm0, %v1379_v45, 0.0  ;;  %v2293_v38 = vsel %vm2269_vm0, %v1380_v12, 0.0  ;;  %v2861_v36 = vmax.f32 %v2817_v62, 0.0  ;;  %v461_v26 = vld [vmem:[%s7736_s0 + $0xdb8] sm:$0x7] }
 0x1bb   :  { %v2786_v6 = vadd.f32 %v2785_v24, %v2784_v27  ;;  %v7445_v18 = vadd.s32 4294967288, %v7440_v60  ;;  %v2818_v15 = vadd.f32 %v7416_v21, %v2352_v58  ;;  %v2819_v35 = vadd.f32 %v7416_v21, %v2373_v39  ;;  %v7476_v13 = vpop.xlane.xlu1 %2393 }
 0x1bc   :  { %v2288_v29 = vadd.f32 %v2287_v28, %v2286_v11  ;;  %v2841_v8 = vmax.f32 %v2797_v0, 0.0  ;;  %v2839_v10 = vmax.f32 %v2795_v9, 0.0  ;;  %v2796_v37 = vadd.f32 %v7416_v21, %v1869_v42 }
 0x1bd   :  { %v2788_v59 = vadd.f32 %v2787_v4, %v2786_v6  ;;  %v7451_v50 = vadd.s32 4294967280, %v7440_v60  ;;  %v2862_v17 = vmax.f32 %v2818_v15, 0.0  ;;  %v2863_v16 = vmax.f32 %v2819_v35, 0.0 }
 0x1be   :  { %v2290_v2 = vadd.f32 %v2289_v51, %v2288_v29  ;;  %vm2958_vm1 = vcmask 130112   ;;  %vm2962_vm2 = vcmask 195712   ;;  %v2840_v1 = vmax.f32 %v2796_v37, 0.0 }
 0x1bf   :  { %v2790_v33 = vadd.f32 %v2789_v34, %v2788_v59  ;;  %v3027_v44 = vperm.slane %v2861_v36, %v7440_v60  ;;  %v3028_v56 = vperm.slane %v2862_v17, %v7445_v18  ;;  %v3030_v19 = vperm.slane %v2863_v16, %v7451_v50  ;;  %v1911_v61 = vpop.xlane.xlu0 %1910 }
 0x1c0   :  { %v2292_v14 = vadd.f32 %v2291_v22, %v2290_v2  ;;  %v2955_v20 = vperm.slane %v2839_v10, %v7440_v60  ;;  %v2957_v5 = vperm.slane %v2840_v1, %v7445_v18  ;;  %v1383_v32 = vmul.f32 %v3283_v40, %v457_v3  ;;  %v1932_v40 = vpop.xlane.xlu2 %1931 }
 0x1c1   :  { %2791 = vadd.xlane.f32.xlu1 %v2790_v33  ;;  %v2295_v54 = vsel %vm2269_vm0, %v1381_v48, 0.0  ;;  %v2961_v24 = vperm.slane %v2841_v8, %v7451_v50  ;;  %v3029_v4 = vsel %vm2958_vm1, %v3028_v56, %v3027_v44  ;;  %v1384_v23 = vmul.f32 %v3285_v41, %v458_v31  ;;  %v460_v41 = vld [vmem:[%s7736_s0 + $0xdb0] sm:$0x7]  ;;  %v2898_v33 = vld [vmem:[%s7739_s3 + $0x78] sm:$0xff]  ;;  %v2896_v56 = vld [vmem:[%s7739_s3 + $0x68] sm:$0xff] }
 0x1c2   :  { %v2294_v49 = vadd.f32 %v2293_v38, %v2292_v14  ;;  %v7473_v43 = vsel %vm2962_vm2, %v3030_v19, %v3029_v4  ;;  %v2959_v7 = vsel %vm2958_vm1, %v2957_v5, %v2955_v20  ;;  %v2297_v30 = vsel %vm2269_vm0, %v1382_v47, 0.0  ;;  %v2897_v31 = vld [vmem:[%s7739_s3 + $0x70] sm:$0xff]  ;;  %3079 = vmatpush.msra.mxu0 %v2898_v33  ;;  %v2895_v19 = vld [vmem:[%s7739_s3 + $0x60] sm:$0xff]  ;;  %v2894_v5 = vld [vmem:[%s7739_s3 + $0x58] sm:$0xff] }
 0x1c3   :  { %v7480_v63 = vadd.s32 4294967264, %v7440_v60  ;;  %v2799_v45 = vadd.f32 %v7416_v21, %v1932_v40  ;;  %v2963_v12 = vsel %vm2962_vm2, %v2961_v24, %v2959_v7  ;;  %v7488_v25 = vadd.s32 4294967272, %v7440_v60  ;;  %v1953_v39 = vpop.xlane.xlu1 %1952  ;;  %v2892_v24 = vld [vmem:[%s7739_s3 + $0x48] sm:$0xff]  ;;  %v2891_v4 = vld [vmem:[%s7739_s3 + $0x40] sm:$0xff]  ;;  %v2889_v7 = vld [vmem:[%s7739_s3 + $0x30] sm:$0xff] }
 0x1c4   :  { %v2296_v62 = vadd.f32 %v2295_v54, %v2294_v49  ;;  %v2798_v34 = vadd.f32 %v7416_v21, %v1911_v61  ;;  %v1385_v48 = vmul.f32 %v3299_v46, %v459_v57  ;;  %v2299_v55 = vsel %vm2269_vm0, %v1383_v32, 0.0  ;;  %3080 = vmatpush.msra.mxu0 %v2897_v31  ;;  %v2893_v32 = vld [vmem:[%s7739_s3 + $0x50] sm:$0xff]  ;;  %v2890_v49 = vld [vmem:[%s7739_s3 + $0x38] sm:$0xff] }
 0x1c5   :  { %v2843_v47 = vmax.f32 %v2799_v45, 0.0  ;;  %v1386_v27 = vmul.f32 %v3309_v52, %v460_v41  ;;  %v2301_v28 = vsel %vm2269_vm0, %v1384_v23, 0.0  ;;  %vm2966_vm3 = vcmask 261312   ;;  %v2887_v45 = vld [vmem:[%s7739_s3 + $0x20] sm:$0xff]  ;;  %v2886_v41 = vld [vmem:[%s7739_s3 + $0x18] sm:$0xff] }
 0x1c6   :  { %v2298_v0 = vadd.f32 %v2297_v30, %v2296_v62  ;;  %v2842_v9 = vmax.f32 %v2798_v34, 0.0  ;;  %vm2970_vm4 = vcmask 326912   ;;  %v1387_v46 = vmul.f32 %v3311_v53, %v461_v26  ;;  %3081 = vmatpush.msra.mxu0 %v2896_v56  ;;  %v2888_v30 = vld [vmem:[%s7739_s3 + $0x28] sm:$0xff] }
 0x1c7   :  { %v2969_v51 = vperm.slane %v2843_v47, %v7480_v63  ;;  %v2303_v38 = vsel %vm2269_vm0, %v1385_v48, 0.0  ;;  %v2305_v52 = vsel %vm2269_vm0, %v1386_v27, 0.0  ;;  %v2415_v35 = vpop.xlane.xlu0 %2414  ;;  %v2800_v62 = vadd.f32 %v7416_v21, %v1953_v39 }
 0x1c8   :  { %v2300_v11 = vadd.f32 %v2299_v55, %v2298_v0  ;;  %v2965_v22 = vperm.slane %v2842_v9, %v7488_v25  ;;  %v2436_v6 = vpop.xlane.xlu2 %2435  ;;  %v2307_v29 = vsel %vm2269_vm0, %v1387_v46, 0.0  ;;  %3082 = vmatpush.msra.mxu0 %v2895_v19  ;;  %v2821_v61 = vadd.f32 %v7416_v21, %v2415_v35  ;;  %v2885_v55 = vld [vmem:[%s7739_s3 + $0x10] sm:$0xff]  ;;  %v2884_v0 = vld [vmem:[%s7739_s3 + $0x8] sm:$0xff] }
 0x1c9   :  { %v2822_v26 = vadd.f32 %v7416_v21, %v2436_v6  ;;  %vm2974_vm5 = vcmask 392512   ;;  %vm2978_vm6 = vcmask 458112   ;;  %v2980_v39 = vadd.s32 4294967240, %v7440_v60 }
 0x1ca   :  { %v2302_v36 = vadd.f32 %v2301_v28, %v2300_v11  ;;  %v2967_v58 = vsel %vm2966_vm3, %v2965_v22, %v2963_v12  ;;  %3083 = vmatpush.msra.mxu0 %v2894_v5  ;;  %v2820_v12 = vadd.f32 %v7416_v21, %v7476_v13  ;;  %v2865_v9 = vmax.f32 %v2821_v61, 0.0  ;;  %v2883_v22 = vld [vmem:[%s7739_s3] sm:$0xff] }
 0x1cb   :  { %v7505_v15 = vsel %vm2970_vm4, %v2969_v51, %v2967_v58  ;;  %v2457_v53 = vpop.xlane.xlu1 %2456  ;;  %v7591_v51 = vadd.s32 4294967256, %v7440_v60  ;;  %v2844_v11 = vmax.f32 %v2800_v62, 0.0  ;;  %v2866_v58 = vmax.f32 %v2822_v26, 0.0 }
 0x1cc   :  { %v2304_v42 = vadd.f32 %v2303_v38, %v2302_v36  ;;  %3084 = vmatpush.msra.mxu0 %v2893_v32  ;;  %v2864_v47 = vmax.f32 %v2820_v12, 0.0  ;;  %v2823_v27 = vadd.f32 %v7416_v21, %v2457_v53  ;;  %v2976_v38 = vadd.s32 4294967248, %v7440_v60 }
 0x1cd   :  { %vm2982_vm7 = vcmask 523712   ;;  %vm2986_vm8 = vcmask 589312   ;;  %v2992_v56 = vadd.s32 4294967216, %v7440_v60  ;;  %vm2990_vm9 = vcmask 654912  }
 0x1ce   :  { %v2306_v8 = vadd.f32 %v2305_v52, %v2304_v42  ;;  %3085 = vmatpush.msra.mxu0 %v2892_v24  ;;  %v3032_v46 = vperm.slane %v2864_v47, %v7488_v25  ;;  %v3034_v52 = vperm.slane %v2865_v9, %v7480_v63  ;;  %v2867_v35 = vmax.f32 %v2823_v27, 0.0 }
 0x1cf   :  { %v1974_v59 = vpop.xlane.xlu0 %1973  ;;  %v2996_v24 = vadd.s32 4294967208, %v7440_v60  ;;  %vm2994_vm10 = vcmask 720512   ;;  %v3000_v62 = vadd.s32 4294967200, %v7440_v60  ;;  %vm2998_vm11 = vcmask 786112  }
 0x1d0   :  { %v2308_v10 = vadd.f32 %v2307_v29, %v2306_v8  ;;  %v7508_v37 = vpop.xlane.xlu2 %1994  ;;  %3086 = vmatpush.msra.mxu0 %v2891_v4  ;;  %v2801_v28 = vadd.f32 %v7416_v21, %v1974_v59  ;;  %v2984_v29 = vadd.s32 4294967232, %v7440_v60  ;;  %v2973_v8 = vperm.slane %v2844_v11, %v7591_v51 }
 0x1d1   :  { %v2802_v6 = vadd.f32 %v7416_v21, %v7508_v37  ;;  %v2988_v59 = vadd.s32 4294967224, %v7440_v60  ;;  %v3033_v33 = vsel %vm2966_vm3, %v3032_v46, %v7473_v43  ;;  %v3038_v4 = vperm.slane %v2867_v35, %v2976_v38 }
 0x1d2   :  { %2309 = vadd.xlane.f32.xlu0 %v2308_v10  ;;  %3087 = vmatpush.msra.mxu0 %v2890_v49  ;;  %v2845_v42 = vmax.f32 %v2801_v28, 0.0  ;;  %v3035_v43 = vsel %vm2970_vm4, %v3034_v52, %v3033_v33  ;;  %v3004_v33 = vadd.s32 4294967192, %v7440_v60  ;;  %vm3002_vm12 = vcmask 851712  }
 0x1d3   :  { %v7510_v17 = vpop.xlane.xlu1 %2015  ;;  %vm3006_vm13 = vcmask 917312   ;;  %vm3010_vm14 = vcmask 982912   ;;  %vm3014_vm15 = vcmask 1048512  }
 0x1d4   :  { %3088 = vmatpush.msra.mxu0 %v2889_v7  ;;  %v2803_v10 = vadd.f32 %v7416_v21, %v7510_v17  ;;  %v3036_v17 = vperm.slane %v2866_v58, %v7591_v51  ;;  %v2977_v49 = vperm.slane %v2845_v42, %v2976_v38 }
 0x1d6   :  { %3089 = vmatpush.msra.mxu0 %v2888_v30  ;;  %v2847_v30 = vmax.f32 %v2803_v10, 0.0  ;;  %v2904_v10 = vld [vmem:[%s7739_s3 + $0xa8] sm:$0x7] }
 0x1d7   :  { %v2478_v3 = vpop.xlane.xlu0 %2477  ;;  %3137 = vmatpush.msk.msra.mxu1 %vm2269_vm0, %v2904_v10  ;;  %vm3069_vm0 = vcmask 1041409  }
 0x1d8   :  { %v7512_v16 = vpop.xlane.xlu2 %2498  ;;  %3090 = vmatpush.msra.mxu0 %v2887_v45  ;;  %v2824_v36 = vadd.f32 %v7416_v21, %v2478_v3  ;;  %v2985_v27 = vperm.slane %v2847_v30, %v2984_v29 }
 0x1d9   :  { %v2825_v53 = vadd.f32 %v7416_v21, %v7512_v16  ;;  %v2846_v16 = vmax.f32 %v2802_v6, 0.0 }
 0x1da   :  { %3091 = vmatpush.msra.mxu0 %v2886_v41  ;;  %v2868_v31 = vmax.f32 %v2824_v36, 0.0 }
 0x1db   :  { %v7514_v2 = vpop.xlane.xlu1 %2519  ;;  %v2869_v45 = vmax.f32 %v2825_v53, 0.0  ;;  %v2981_v47 = vperm.slane %v2846_v16, %v2980_v39 }
 0x1dc   :  { %3092 = vmatpush.msra.mxu0 %v2885_v55  ;;  %v2826_v32 = vadd.f32 %v7416_v21, %v7514_v2  ;;  %v3040_v61 = vperm.slane %v2868_v31, %v2980_v39  ;;  %v3037_v55 = vsel %vm2974_vm5, %v3036_v17, %v3035_v43 }
 0x1dd   :  { %v3039_v26 = vsel %vm2978_vm6, %v3038_v4, %v3037_v55 }
 0x1de   :  { %3093 = vmatpush.msra.mxu0 %v2884_v0  ;;  %v3041_v38 = vsel %vm2982_vm7, %v3040_v61, %v3039_v26 }
 0x1df   :  { %v7524_v44 = vpop.xlane.xlu0 %2036 }
 0x1e0   :  { %v7516_v1 = vpop.xlane.xlu2 %2057  ;;  %3094 = vmatpush.msra.mxu0 %v2883_v22  ;;  %v2804_v19 = vadd.f32 %v7416_v21, %v7524_v44  ;;  %v2975_v44 = vsel %vm2974_vm5, %v2973_v8, %v7505_v15 }
 0x1e1   :  { %v2805_v12 = vadd.f32 %v7416_v21, %v7516_v1  ;;  %v2979_v1 = vsel %vm2978_vm6, %v2977_v49, %v2975_v44  ;;  %vm3073_vm6 = vcmask 351232  }
 0x1e2   :  { %v2848_v41 = vmax.f32 %v2804_v19, 0.0 }
 0x1e3   :  { %v7532_v14 = vpop.xlane.xlu1 %2078  ;;  %v2849_v28 = vmax.f32 %v2805_v12, 0.0 }
 0x1e4   :  { %v2806_v2 = vadd.f32 %v7416_v21, %v7532_v14  ;;  %v3042_v14 = vperm.slane %v2869_v45, %v2984_v29 }
 0x1e5   :  { %v2993_v53 = vperm.slane %v2849_v28, %v2992_v56 }
 0x1e6   :  { %v2850_v36 = vmax.f32 %v2806_v2, 0.0  ;;  %v3043_v31 = vsel %vm2986_vm8, %v3042_v14, %v3041_v38  ;;  %v3012_v2 = vadd.s32 4294967176, %v7440_v60 }
 0x1e7   :  { %v7542_v54 = vpop.xlane.xlu0 %2540 }
 0x1e8   :  { %v7534_v20 = vpop.xlane.xlu2 %2561  ;;  %v2827_v7 = vadd.f32 %v7416_v21, %v7542_v54  ;;  %v2870_v54 = vmax.f32 %v2826_v32, 0.0  ;;  %v2997_v19 = vperm.slane %v2850_v36, %v2996_v24 }
 0x1e9   :  { %v2828_v15 = vadd.f32 %v7416_v21, %v7534_v20  ;;  %v2989_v20 = vperm.slane %v2848_v41, %v2988_v59 }
 0x1ea   :  { %v2871_v0 = vmax.f32 %v2827_v7, 0.0  ;;  %v3044_v6 = vperm.slane %v2870_v54, %v2988_v59  ;;  %v3008_v7 = vadd.s32 4294967184, %v7440_v60 }
 0x1eb   :  { %v7550_v57 = vpop.xlane.xlu1 %2582 }
 0x1ec   :  { %v2829_v11 = vadd.f32 %v7416_v21, %v7550_v57  ;;  %v2983_v57 = vsel %vm2982_vm7, %v2981_v47, %v2979_v1  ;;  %v3046_v42 = vperm.slane %v2871_v0, %v2992_v56  ;;  %v3045_v16 = vsel %vm2990_vm9, %v3044_v6, %v3043_v31 }
 0x1ee   :  { %v2873_v59 = vmax.f32 %v2829_v11, 0.0  ;;  %v3047_v4 = vsel %vm2994_vm10, %v3046_v42, %v3045_v16  ;;  %v2899_v42 = vld [vmem:[%s7739_s3 + $0x80] sm:$0xff] }
 0x1ef   :  { %v7560_v40 = vpop.xlane.xlu0 %2099 }
 0x1f0   :  { %v7552_v23 = vpop.xlane.xlu2 %2120  ;;  %v2807_v9 = vadd.f32 %v7416_v21, %v7560_v40  ;;  %v2872_v40 = vmax.f32 %v2828_v15, 0.0  ;;  %v3050_v45 = vperm.slane %v2873_v59, %v3000_v62 }
 0x1f1   :  { %v2808_v52 = vadd.f32 %v7416_v21, %v7552_v23  ;;  %v2903_v23 = vld [vmem:[%s7739_s3 + $0xa0] sm:$0xff] }
 0x1f2   :  { %v2851_v29 = vmax.f32 %v2807_v9, 0.0  ;;  %v3048_v32 = vperm.slane %v2872_v40, %v2996_v24  ;;  %3110 = vmatpush.msra.mxu1 %v2903_v23  ;;  %v2902_v40 = vld [vmem:[%s7739_s3 + $0x98] sm:$0xff] }
 0x1f3   :  { %v7575_v34 = vpop.xlane.xlu1 %2204  ;;  %v2852_v43 = vmax.f32 %v2808_v52, 0.0 }
 0x1f4   :  { %v3001_v49 = vperm.slane %v2851_v29, %v3000_v62  ;;  %v3049_v47 = vsel %vm2998_vm11, %v3048_v32, %v3047_v4  ;;  %3111 = vmatpush.msra.mxu1 %v2902_v40  ;;  %v2812_v31 = vadd.f32 %v7416_v21, %v7575_v34 }
 0x1f5   :  { %v3005_v54 = vperm.slane %v2852_v43, %v3004_v33  ;;  %v3051_v62 = vsel %vm3002_vm12, %v3050_v45, %v3049_v47 }
 0x1f6   :  { %v2856_v4 = vmax.f32 %v2812_v31, 0.0 }
 0x1f7   :  { %v7582_v13 = vpop.xlane.xlu0 %2183 }
 0x1f8   :  { %v7577_v48 = vpop.xlane.xlu2 %2603 }
 0x1f9   :  { %v2830_v58 = vadd.f32 %v7416_v21, %v7577_v48  ;;  %v2987_v48 = vsel %vm2986_vm8, %v2985_v27, %v2983_v57  ;;  %v2900_v57 = vld [vmem:[%s7739_s3 + $0x88] sm:$0xff] }
 0x1fb   :  { %v7610_v3 = vpop.xlane.xlu1 %2687  ;;  %v2874_v17 = vmax.f32 %v2830_v58, 0.0 }
 0x1fc   :  { %v2834_v10 = vadd.f32 %v7416_v21, %v7610_v3 }
 0x1fd   :  { %v3052_v41 = vperm.slane %v2874_v17, %v3004_v33 }
 0x1ff   :  { %v7617_v5 = vpop.xlane.xlu0 %2666  ;;  %v3053_v28 = vsel %vm3006_vm13, %v3052_v41, %v3051_v62  ;;  %v3017_v41 = vperm.slane %v2856_v4, %v7445_v18 }
 0x200   :  { %v2142_v37 = vpop.xlane.xlu2 %2141 }
 0x201   :  { %v2809_v8 = vadd.f32 %v7416_v21, %v2142_v37  ;;  %v2991_v37 = vsel %vm2990_vm9, %v2989_v20, %v2987_v48  ;;  %v2833_v48 = vadd.f32 %v7416_v21, %v7617_v5 }
 0x202   :  { %v2995_v30 = vsel %vm2994_vm10, %v2993_v53, %v2991_v37  ;;  %v2811_v37 = vadd.f32 %v7416_v21, %v7582_v13 }
 0x203   :  { %v2625_v22 = vpop.xlane.xlu1 %2624  ;;  %v2853_v44 = vmax.f32 %v2809_v8, 0.0  ;;  %v2999_v61 = vsel %vm2998_vm11, %v2997_v19, %v2995_v30  ;;  %v2878_v19 = vmax.f32 %v2834_v10, 0.0  ;;  %v2877_v17 = vmax.f32 %v2833_v48, 0.0 }
 0x204   :  { %v2831_v35 = vadd.f32 %v7416_v21, %v2625_v22  ;;  %v3003_v1 = vsel %vm3002_vm12, %v3001_v49, %v2999_v61  ;;  %v2855_v34 = vmax.f32 %v2811_v37, 0.0 }
 0x205   :  { %v3009_v0 = vperm.slane %v2853_v44, %v3008_v7  ;;  %v3007_v22 = vsel %vm3006_vm13, %v3005_v54, %v3003_v1  ;;  %v3059_v49 = vperm.slane %v2878_v19, %v7445_v18  ;;  %v3058_v13 = vperm.slane %v2877_v17, %v7440_v60 }
 0x206   :  { %v2875_v56 = vmax.f32 %v2831_v35, 0.0  ;;  %v2901_v35 = vld [vmem:[%s7739_s3 + $0x90] sm:$0xff] }
 0x207   :  { %v7647_v39 = vpop.xlane.xlu0 %2225  ;;  %v3011_v20 = vsel %vm3010_vm14, %v3009_v0, %v3007_v22  ;;  %3112 = vmatpush.msra.mxu1 %v2901_v35  ;;  %v3140_v22 = vld [vmem:[%s7740_s4] ss:$0 sm:$0xff] }
 0x208   :  { %v7642_v46 = vpop.xlane.xlu2 %2708  ;;  %v3054_v15 = vperm.slane %v2875_v56, %v3008_v7  ;;  %v2813_v3 = vadd.f32 %v7416_v21, %v7647_v39 }
 0x209   :  { %3113 = vmatpush.msra.mxu1 %v2900_v57  ;;  %v2835_v53 = vadd.f32 %v7416_v21, %v7642_v46 }
 0x20a   :  { %v3055_v38 = vsel %vm3010_vm14, %v3054_v15, %v3053_v28  ;;  %v2857_v44 = vmax.f32 %v2813_v3, 0.0 }
 0x20b   :  { %v2247_v52 = vpop.xlane.xlu1 %2246  ;;  %3114 = vmatpush.msra.mxu1 %v2899_v42  ;;  %v2879_v16 = vmax.f32 %v2835_v53, 0.0 }
 0x20c   :  { %v2814_v46 = vadd.f32 %v7416_v21, %v2247_v52  ;;  %v3019_v47 = vperm.slane %v2857_v44, %v7451_v50 }
 0x20d   :  { %v3061_v7 = vperm.slane %v2879_v16, %v7451_v50 }
 0x20e   :  { %v2858_v39 = vmax.f32 %v2814_v46, 0.0 }
 0x20f   :  { %v2163_v55 = vpop.xlane.xlu0 %2162 }
 0x210   :  { %v2646_v12 = vpop.xlane.xlu2 %2645  ;;  %v2810_v26 = vadd.f32 %v7416_v21, %v2163_v55 }
 0x211   :  { %v2832_v24 = vadd.f32 %v7416_v21, %v2646_v12 }
 0x212   :  { %v2854_v27 = vmax.f32 %v2810_v26, 0.0  ;;  %v3021_v26 = vperm.slane %v2858_v39, %v7488_v25 }
 0x213   :  { %v2876_v9 = vmax.f32 %v2832_v24, 0.0  ;;  %v3060_v24 = vsel %vm2958_vm1, %v3059_v49, %v3058_v13 }
 0x214   :  { %v3013_v11 = vperm.slane %v2854_v27, %v3012_v2  ;;  %v2268_v29 = vpop.xlane.xlu1 %2267  ;;  %v3062_v55 = vsel %vm2962_vm2, %v3061_v7, %v3060_v24 }
 0x215   :  { %v3056_v14 = vperm.slane %v2876_v9, %v3012_v2  ;;  %v2815_v56 = vadd.f32 %v7416_v21, %v2268_v29  ;;  %v3016_v2 = vperm.slane %v2855_v34, %v7440_v60 }
 0x216   :  { %v3015_v58 = vsel %vm3014_vm15, %v3013_v11, %v3011_v20 }
 0x217   :  { %v3057_v36 = vsel %vm3014_vm15, %v3056_v14, %v3055_v38  ;;  %v2859_v61 = vmax.f32 %v2815_v56, 0.0  ;;  %v3018_v60 = vsel %vm2958_vm1, %v3017_v41, %v3016_v2  ;;  %vm3119_vm1 = vcmask 17408  }
 0x218   :  { %v3070_v6 = vsel %vm3069_vm0, %v3057_v36, %v3015_v58  ;;  %v3020_v27 = vsel %vm2962_vm2, %v3019_v47, %v3018_v60 }
 0x219   :  { %3095 = vmatmul.f32.vlgmr.msra.gmra.mxu0 %v3070_v6  ;;  %v3023_v18 = vperm.slane %v2859_v61, %v7480_v63  ;;  %v3022_v14 = vsel %vm2966_vm3, %v3021_v26, %v3020_v27 }
 0x21b   :  { %v3024_v11 = vsel %vm2970_vm4, %v3023_v18, %v3022_v14 }
 0x21e   :  { %v2730_v8 = vpop.xlane.xlu0 %2729 }
 0x21f   :  { %v2836_v59 = vadd.f32 %v7416_v21, %v2730_v8 }
 0x221   :  { %v2880_v32 = vmax.f32 %v2836_v59, 0.0 }
 0x223   :  { %v3063_v45 = vperm.slane %v2880_v32, %v7488_v25 }
 0x225   :  { %v3064_v1 = vsel %vm2966_vm3, %v3063_v45, %v3062_v55 }
 0x228   :  { %v2751_v33 = vpop.xlane.xlu2 %2750 }
 0x229   :  { %v2837_v5 = vadd.f32 %v7416_v21, %v2751_v33 }
 0x22b   :  { %v2881_v30 = vmax.f32 %v2837_v5, 0.0 }
 0x22d   :  { %v3065_v54 = vperm.slane %v2881_v30, %v7480_v63 }
 0x22f   :  { %v3066_v50 = vsel %vm2970_vm4, %v3065_v54, %v3064_v1 }
 0x234   :  { %v2792_v23 = vpop.xlane.xlu1 %2791 }
 0x235   :  { %v2838_v43 = vadd.f32 %v7416_v21, %v2792_v23 }
 0x237   :  { %v2882_v12 = vmax.f32 %v2838_v43, 0.0 }
 0x239   :  { %v3067_v0 = vperm.slane %v2882_v12, %v7591_v51 }
 0x23b   :  { %v3068_v25 = vsel %vm2974_vm5, %v3067_v0, %v3066_v50 }
 0x245   :  { %v2310_v15 = vpop.xlane.xlu0 %2309 }
 0x246   :  { %v2816_v9 = vadd.f32 %v7416_v21, %v2310_v15 }
 0x248   :  { %v2860_v62 = vmax.f32 %v2816_v9, 0.0 }
 0x24a   :  { %v3025_v28 = vperm.slane %v2860_v62, %v7591_v51 }
 0x24c   :  { %v3026_v21 = vsel %vm2974_vm5, %v3025_v28, %v3024_v11 }
 0x24d   :  { %v3071_v63 = vsel %vm3069_vm0, %v3068_v25, %v3026_v21 }
 0x24e   :  { %3138 = vmatmul.msk.f32.vlgmr.msra.gmra.mxu1 %vm3073_vm6, %v3071_v63 }
 0x296   :  { %v3096_v38 = vpop.f32.mrf.mxu0 }
 0x297   :  { %v3097_v51 = vadd.f32 %v3140_v22, %v3096_v38 }
 0x2cb   :  { %v3116_v20 = vpop.f32.mrf.mxu1 }
 0x2cc   :  { %v3117_v36 = vadd.f32 %v3116_v20, %v3097_v51 }
 0x2ce   :  { %3120 = vst.msk [vmem:[#allocation3] sm:$0x3] %vm3119_vm1, %v3117_v36 }
 0x2cf   :  { %3131 = dma.vmem_to_hbm [thread:$0]  %s3127_s2, 32, %s3129_s11, [#allocation4]  }
 0x2d0   :  { %3165 = dma.done.wait [#allocation4], 32  }
 0x2d1   :  { %3166 = vsyncadd [#allocation4], 4294967264 }
 0x2d2   :  { %3136 = vsyncpa [#allocation4], 1 }

</bundles_post_ra>
